<compile_context>
chip_gen: v7x
topology: tpu7x:2x2x1
jax: 0.10.0
libtpu: 0.0.40
codegen_flags: <defaults>
</compile_context>

<pallas_src>
import functools

import jax
import jax.numpy as jnp
from jax.experimental import pallas as pl
from jax.experimental.pallas import tpu as pltpu


# ----------------------------------------------------------------------------
# LSTM cell math (shared by kernels and the pure-JAX reference)
# ----------------------------------------------------------------------------
def _lstm_cell(gates, c_prev, H):
    """gates: (B, 4H) pre-activations in PyTorch (i, f, g, o) order."""
    i_g = jax.nn.sigmoid(gates[:, 0 * H:1 * H])
    f_g = jax.nn.sigmoid(gates[:, 1 * H:2 * H])
    g_g = jnp.tanh(gates[:, 2 * H:3 * H])
    o_g = jax.nn.sigmoid(gates[:, 3 * H:4 * H])
    c_new = f_g * c_prev + i_g * g_g
    h_new = o_g * jnp.tanh(c_new)
    return h_new, c_new


# ----------------------------------------------------------------------------
# Fused bidirectional LSTM layer kernel (whole sequence resident in VMEM)
# ----------------------------------------------------------------------------
def _bilstm_layer_kernel(x_ref, wih_ref, whh_f_ref, whh_b_ref, b_ref,
                         out_ref, hN_ref, cN_ref,
                         gxf_sc, gxb_sc, outf_sc, outb_sc):
    """x_ref: (T,B,I); wih_ref: (I,8H)=[W_ih_fwd|W_ih_bwd] (pre-transposed);
    whh_*_ref: (H,4H); b_ref: (1,8H)=[b_fwd|b_bwd] with b = b_ih + b_hh;
    out_ref: (T,B,2H); hN_ref/cN_ref: (2,B,H)."""
    T, B, I = x_ref.shape
    H = whh_f_ref.shape[0]
    G = 4 * H

    # --- Prologue: one MXU matmul for the input path of all steps, both dirs.
    x2 = x_ref[...].reshape(T * B, I)
    gx = (jnp.dot(x2, wih_ref[...], preferred_element_type=jnp.float32)
          + b_ref[...])                       # bias broadcast hoisted here
    gx = gx.reshape(T, B, 2 * G)
    gxf_sc[...] = gx[:, :, :G]
    gxb_sc[...] = gx[:, :, G:]

    whh_f = whh_f_ref[...]
    whh_b = whh_b_ref[...]
    zeros = jnp.zeros((B, H), jnp.float32)

    # --- Serial recurrence: only h_prev @ W_hh remains on the critical path.
    def step(s, carry):
        h_f, c_f, h_b, c_b = carry
        tb = T - 1 - s                        # reversed index for backward dir
        gates_f = gxf_sc[s] + jnp.dot(h_f, whh_f,
                                      preferred_element_type=jnp.float32)
        gates_b = gxb_sc[tb] + jnp.dot(h_b, whh_b,
                                       preferred_element_type=jnp.float32)
        h_f, c_f = _lstm_cell(gates_f, c_f, H)
        h_b, c_b = _lstm_cell(gates_b, c_b, H)
        outf_sc[s] = h_f
        outb_sc[tb] = h_b
        return h_f, c_f, h_b, c_b

    h_f, c_f, h_b, c_b = jax.lax.fori_loop(
        0, T, step, (zeros, zeros, zeros, zeros), unroll=True)

    # --- Epilogue: single lane-packed writeback; finals written exactly once.
    out_ref[...] = jnp.concatenate([outf_sc[...], outb_sc[...]], axis=-1)
    hN_ref[0] = h_f
    hN_ref[1] = h_b
    cN_ref[0] = c_f
    cN_ref[1] = c_b


def _run_bilstm_layer(x, wih_cat, whh_f, whh_b, b_cat):
    """x: (T,B,I) f32. Returns (output (T,B,2H), h_n (2,B,H), c_n (2,B,H))."""
    T, B, _ = x.shape
    H = whh_f.shape[0]
    vmem = pl.BlockSpec(memory_space=pltpu.MemorySpace.VMEM)
    return pl.pallas_call(
        _bilstm_layer_kernel,
        out_shape=(
            jax.ShapeDtypeStruct((T, B, 2 * H), jnp.float32),
            jax.ShapeDtypeStruct((2, B, H), jnp.float32),
            jax.ShapeDtypeStruct((2, B, H), jnp.float32),
        ),
        in_specs=[vmem, vmem, vmem, vmem, vmem],
        out_specs=(vmem, vmem, vmem),
        scratch_shapes=[
            pltpu.VMEM((T, B, 4 * H), jnp.float32),   # fwd input-path gates
            pltpu.VMEM((T, B, 4 * H), jnp.float32),   # bwd input-path gates
            pltpu.VMEM((T, B, H), jnp.float32),       # fwd hidden slab
            pltpu.VMEM((T, B, H), jnp.float32),       # bwd hidden slab
        ],
        compiler_params=pltpu.CompilerParams(
            vmem_limit_bytes=64 * 1024 * 1024),
    )(x, wih_cat, whh_f, whh_b, b_cat)


# ----------------------------------------------------------------------------
# Unidirectional layer kernel (used when bidirectional=False)
# ----------------------------------------------------------------------------
def _lstm_layer_kernel(x_ref, wih_ref, whh_ref, b_ref,
                       out_ref, hN_ref, cN_ref, gx_sc):
    T, B, I = x_ref.shape
    H = whh_ref.shape[0]

    x2 = x_ref[...].reshape(T * B, I)
    gx_sc[...] = (jnp.dot(x2, wih_ref[...], preferred_element_type=jnp.float32)
                  + b_ref[...]).reshape(T, B, 4 * H)

    whh = whh_ref[...]
    zeros = jnp.zeros((B, H), jnp.float32)

    def step(s, carry):
        h, c = carry
        gates = gx_sc[s] + jnp.dot(h, whh, preferred_element_type=jnp.float32)
        h, c = _lstm_cell(gates, c, H)
        out_ref[s] = h
        return h, c

    h, c = jax.lax.fori_loop(0, T, step, (zeros, zeros), unroll=True)
    hN_ref[...] = h
    cN_ref[...] = c


def _run_lstm_layer(x, wih_T, whh_T, bias):
    T, B, _ = x.shape
    H = whh_T.shape[0]
    vmem = pl.BlockSpec(memory_space=pltpu.MemorySpace.VMEM)
    return pl.pallas_call(
        _lstm_layer_kernel,
        out_shape=(
            jax.ShapeDtypeStruct((T, B, H), jnp.float32),
            jax.ShapeDtypeStruct((B, H), jnp.float32),
            jax.ShapeDtypeStruct((B, H), jnp.float32),
        ),
        in_specs=[vmem, vmem, vmem, vmem],
        out_specs=(vmem, vmem, vmem),
        scratch_shapes=[pltpu.VMEM((T, B, 4 * H), jnp.float32)],
        compiler_params=pltpu.CompilerParams(
            vmem_limit_bytes=64 * 1024 * 1024),
    )(x, wih_T, whh_T, bias)


# ----------------------------------------------------------------------------
# Parameter init (PyTorch-equivalent shapes; weights stored pre-transposed and
# per-layer direction weights fused for the kernel layout)
# ----------------------------------------------------------------------------
def init_encoder_params(key, vocab_size, emb_size, lstm_size, num_layers,
                        bidirectional=True):
    params = {}
    key, k_emb = jax.random.split(key)
    params["embedding"] = jax.random.normal(
        k_emb, (vocab_size, emb_size), jnp.float32) * 0.1

    num_dirs = 2 if bidirectional else 1
    k = 1.0 / (lstm_size ** 0.5)
    layers = []
    for layer in range(num_layers):
        in_size = emb_size if layer == 0 else num_dirs * lstm_size
        wihs, whhs, bs = [], [], []
        for _ in range(num_dirs):
            key, k1, k2, k3, k4 = jax.random.split(key, 5)
            # PyTorch: W_ih (4H, in), W_hh (4H, H), b_ih (4H), b_hh (4H)
            wih_T = jax.random.uniform(k1, (in_size, 4 * lstm_size),
                                       jnp.float32, -k, k)
            whh_T = jax.random.uniform(k2, (lstm_size, 4 * lstm_size),
                                       jnp.float32, -k, k)
            b_ih = jax.random.uniform(k3, (4 * lstm_size,), jnp.float32, -k, k)
            b_hh = jax.random.uniform(k4, (4 * lstm_size,), jnp.float32, -k, k)
            wihs.append(wih_T)
            whhs.append(whh_T)
            bs.append(b_ih + b_hh)
        if bidirectional:
            wih_cat = jnp.concatenate(wihs, axis=-1)                # (in, 8H)
            b_cat = jnp.concatenate(bs, axis=0).reshape(1, 8 * lstm_size)
            layers.append((wih_cat, whhs[0], whhs[1], b_cat))
        else:
            layers.append((wihs[0], whhs[0], bs[0].reshape(1, 4 * lstm_size)))
    params["lstm"] = layers
    return params


# ----------------------------------------------------------------------------
# Encoder forward (Pallas) and a pure-JAX reference for validation
# ----------------------------------------------------------------------------
@functools.partial(jax.jit, static_argnames=("bidirectional",))
def encoder_forward(params, word_input, bidirectional=True):
    """word_input: (B, T) int32. Returns (h_n, c_n, output) like the module."""
    emb = jnp.take(params["embedding"], word_input, axis=0)   # (B, T, E)
    # embedding dropout (eval mode) -> identity
    x = jnp.transpose(emb, (1, 0, 2)).astype(jnp.float32)     # (T, B, E)

    h_list, c_list = [], []
    for lp in params["lstm"]:
        if bidirectional:
            wih_cat, whh_f, whh_b, b_cat = lp
            x, h2, c2 = _run_bilstm_layer(x, wih_cat, whh_f, whh_b, b_cat)
            h_list += [h2[0], h2[1]]
            c_list += [c2[0], c2[1]]
        else:
            wih_T, whh_T, b = lp
            x, h1, c1 = _run_lstm_layer(x, wih_T, whh_T, b)
            h_list.append(h1)
            c_list.append(c1)
        # inter-layer LSTM dropout (eval mode) -> identity

    h_n = jnp.stack(h_list, axis=0)   # (num_layers * num_dirs, B, H)
    c_n = jnp.stack(c_list, axis=0)
    return h_n, c_n, x


def _ref_lstm_dir(x, wih_T, whh_T, b):
    """Pure-JAX single-direction LSTM over time-major x: (T, B, I)."""
    H = whh_T.shape[0]
    B = x.shape[1]
    hi = jax.lax.Precision.HIGHEST

    def cell(carry, x_t):
        h, c = carry
        gates = (jnp.dot(x_t, wih_T, precision=hi)
                 + jnp.dot(h, whh_T, precision=hi) + b)
        h, c = _lstm_cell(gates, c, H)
        return (h, c), h

    init = (jnp.zeros((B, H), jnp.float32), jnp.zeros((B, H), jnp.float32))
    (h, c), ys = jax.lax.scan(cell, init, x)
    return ys, h, c


def encoder_reference(params, word_input, bidirectional=True):
    emb = jnp.take(params["embedding"], word_input, axis=0)
    x = jnp.transpose(emb, (1, 0, 2)).astype(jnp.float32)
    h_list, c_list = [], []
    for lp in params["lstm"]:
        if bidirectional:
            wih_cat, whh_f, whh_b, b_cat = lp
            G = 4 * whh_f.shape[0]
            out_f, h_f, c_f = _ref_lstm_dir(x, wih_cat[:, :G], whh_f,
                                            b_cat[:, :G])
            out_b, h_b, c_b = _ref_lstm_dir(x[::-1], wih_cat[:, G:], whh_b,
                                            b_cat[:, G:])
            x = jnp.concatenate([out_f, out_b[::-1]], axis=-1)
            h_list += [h_f, h_b]
            c_list += [c_f, c_b]
        else:
            wih_T, whh_T, b = lp
            out_u, h_u, c_u = _ref_lstm_dir(x, wih_T, whh_T, b)
            x = out_u
            h_list.append(h_u)
            c_list.append(c_u)
    return jnp.stack(h_list, axis=0), jnp.stack(c_list, axis=0), x


if __name__ == "__main__":
    VOCAB = 20
    EMB = 16
    HIDDEN = 32
    NUM_LAYERS = 2
    BATCH = 8
    SEQ = 8

    key = jax.random.PRNGKey(0)
    key, k_in = jax.random.split(key)
    word_input = jax.random.randint(k_in, (BATCH, SEQ), 0, VOCAB, jnp.int32)

    params = init_encoder_params(key, VOCAB, EMB, HIDDEN, NUM_LAYERS,
                                 bidirectional=True)

    h_n, c_n, output = encoder_forward(params, word_input, bidirectional=True)
    jax.block_until_ready((h_n, c_n, output))

    assert h_n.shape == (NUM_LAYERS * 2, BATCH, HIDDEN), h_n.shape
    assert c_n.shape == (NUM_LAYERS * 2, BATCH, HIDDEN), c_n.shape
    assert output.shape == (SEQ, BATCH, 2 * HIDDEN), output.shape
    assert jnp.all(jnp.isfinite(h_n)) and jnp.all(jnp.isfinite(c_n))
    assert jnp.all(jnp.isfinite(output))

    # Numerical check against a pure-JAX (lax.scan) reference of the same math.
    h_ref, c_ref, out_r = encoder_reference(params, word_input,
                                            bidirectional=True)
    err = max(float(jnp.max(jnp.abs(h_n - h_ref))),
              float(jnp.max(jnp.abs(c_n - c_ref))),
              float(jnp.max(jnp.abs(output - out_r))))
    assert err < 1e-2, f"max abs error vs reference = {err}"

    print("KERNEL_OK")
</pallas_src>

<mosaic_0001>
module attributes {stable_mosaic.version = 11 : i64} {
  func.func @_bilstm_layer_kernel(%arg0: memref<8x8x64xf32, #tpu.memory_space<vmem>>, %arg1: memref<64x256xf32, #tpu.memory_space<vmem>>, %arg2: memref<32x128xf32, #tpu.memory_space<vmem>>, %arg3: memref<32x128xf32, #tpu.memory_space<vmem>>, %arg4: memref<1x256xf32, #tpu.memory_space<vmem>>, %arg5: memref<8x8x64xf32, #tpu.memory_space<vmem>>, %arg6: memref<2x8x32xf32, #tpu.memory_space<vmem>>, %arg7: memref<2x8x32xf32, #tpu.memory_space<vmem>>, %arg8: memref<8x8x128xf32, #tpu.memory_space<vmem>>, %arg9: memref<8x8x128xf32, #tpu.memory_space<vmem>>, %arg10: memref<8x8x32xf32, #tpu.memory_space<vmem>>, %arg11: memref<8x8x32xf32, #tpu.memory_space<vmem>>) attributes {dimension_semantics = [], scalar_prefetch = 0 : i64, scratch_operands = 4 : i64, tpu.core_type = #tpu.core_type<tc>} {
    %c0 = arith.constant 0 : index
    %c0_0 = arith.constant 0 : index
    %c0_1 = arith.constant 0 : index
    %0 = vector.load %arg0[%c0, %c0_0, %c0_1] : memref<8x8x64xf32, #tpu.memory_space<vmem>>, vector<8x8x64xf32>
    %1 = vector.shape_cast %0 : vector<8x8x64xf32> to vector<64x64xf32>
    %c0_2 = arith.constant 0 : index
    %c0_3 = arith.constant 0 : index
    %2 = vector.load %arg1[%c0_2, %c0_3] : memref<64x256xf32, #tpu.memory_space<vmem>>, vector<64x256xf32>
    %cst = arith.constant dense<0.000000e+00> : vector<64x256xf32>
    %3 = tpu.matmul %1, %2, %cst {dimension_numbers = #tpu.dot_dimension_numbers<[1], [0], [0], [1], [0, 0, 1, 1], [], []>} : vector<64x64xf32>, vector<64x256xf32>, vector<64x256xf32> -> vector<64x256xf32>
    %c0_4 = arith.constant 0 : index
    %c0_5 = arith.constant 0 : index
    %4 = vector.load %arg4[%c0_4, %c0_5] : memref<1x256xf32, #tpu.memory_space<vmem>>, vector<1x256xf32>
    %5 = vector.broadcast %4 : vector<1x256xf32> to vector<64x256xf32>
    %6 = arith.addf %3, %5 : vector<64x256xf32>
    %7 = vector.shape_cast %6 : vector<64x256xf32> to vector<8x8x256xf32>
    %8 = vector.extract_strided_slice %7 {offsets = [0, 0, 0], sizes = [8, 8, 128], strides = [1, 1, 1]} : vector<8x8x256xf32> to vector<8x8x128xf32>
    %c0_6 = arith.constant 0 : index
    %c0_7 = arith.constant 0 : index
    %c0_8 = arith.constant 0 : index
    %9 = vector.load %arg8[%c0_6, %c0_7, %c0_8] : memref<8x8x128xf32, #tpu.memory_space<vmem>>, vector<8x8x128xf32>
    tpu.vector_store %arg8[%c0_6, %c0_7, %c0_8], %8 {strides = array<i32>} : memref<8x8x128xf32, #tpu.memory_space<vmem>>, vector<8x8x128xf32>,
    %10 = vector.extract_strided_slice %7 {offsets = [0, 0, 128], sizes = [8, 8, 128], strides = [1, 1, 1]} : vector<8x8x256xf32> to vector<8x8x128xf32>
    %c0_9 = arith.constant 0 : index
    %c0_10 = arith.constant 0 : index
    %c0_11 = arith.constant 0 : index
    %11 = vector.load %arg9[%c0_9, %c0_10, %c0_11] : memref<8x8x128xf32, #tpu.memory_space<vmem>>, vector<8x8x128xf32>
    tpu.vector_store %arg9[%c0_9, %c0_10, %c0_11], %10 {strides = array<i32>} : memref<8x8x128xf32, #tpu.memory_space<vmem>>, vector<8x8x128xf32>,
    %c0_12 = arith.constant 0 : index
    %c0_13 = arith.constant 0 : index
    %12 = vector.load %arg2[%c0_12, %c0_13] : memref<32x128xf32, #tpu.memory_space<vmem>>, vector<32x128xf32>
    %c0_14 = arith.constant 0 : index
    %c0_15 = arith.constant 0 : index
    %13 = vector.load %arg3[%c0_14, %c0_15] : memref<32x128xf32, #tpu.memory_space<vmem>>, vector<32x128xf32>
    %cst_16 = arith.constant 0.000000e+00 : f32
    %14 = vector.broadcast %cst_16 : f32 to vector<8x32xf32>
    %c0_i32 = arith.constant 0 : i32
    %c7_i32 = arith.constant 7 : i32
    %15 = arith.subi %c7_i32, %c0_i32 : i32
    %16 = arith.index_cast %c0_i32 : i32 to index
    %c0_17 = arith.constant 0 : index
    %c0_18 = arith.constant 0 : index
    %17 = vector.load %arg8[%16, %c0_17, %c0_18] : memref<8x8x128xf32, #tpu.memory_space<vmem>>, vector<1x8x128xf32>
    %18 = vector.shape_cast %17 : vector<1x8x128xf32> to vector<8x128xf32>
    %cst_19 = arith.constant dense<0.000000e+00> : vector<8x128xf32>
    %19 = tpu.matmul %14, %12, %cst_19 {dimension_numbers = #tpu.dot_dimension_numbers<[1], [0], [0], [1], [0, 0, 1, 1], [], []>} : vector<8x32xf32>, vector<32x128xf32>, vector<8x128xf32> -> vector<8x128xf32>
    %20 = arith.addf %18, %19 : vector<8x128xf32>
    %21 = arith.index_cast %15 : i32 to index
    %c0_20 = arith.constant 0 : index
    %c0_21 = arith.constant 0 : index
    %22 = vector.load %arg9[%21, %c0_20, %c0_21] : memref<8x8x128xf32, #tpu.memory_space<vmem>>, vector<1x8x128xf32>
    %23 = vector.shape_cast %22 : vector<1x8x128xf32> to vector<8x128xf32>
    %cst_22 = arith.constant dense<0.000000e+00> : vector<8x128xf32>
    %24 = tpu.matmul %14, %13, %cst_22 {dimension_numbers = #tpu.dot_dimension_numbers<[1], [0], [0], [1], [0, 0, 1, 1], [], []>} : vector<8x32xf32>, vector<32x128xf32>, vector<8x128xf32> -> vector<8x128xf32>
    %25 = arith.addf %23, %24 : vector<8x128xf32>
    %26 = vector.extract_strided_slice %20 {offsets = [0, 0], sizes = [8, 32], strides = [1, 1]} : vector<8x128xf32> to vector<8x32xf32>
    %27 = arith.negf %26 : vector<8x32xf32>
    %28 = math.exp %27 : vector<8x32xf32>
    %cst_23 = arith.constant 1.000000e+00 : f32
    %29 = vector.broadcast %cst_23 : f32 to vector<8x32xf32>
    %30 = arith.addf %29, %28 : vector<8x32xf32>
    %31 = arith.divf %29, %30 : vector<8x32xf32>
    %32 = vector.extract_strided_slice %20 {offsets = [0, 32], sizes = [8, 32], strides = [1, 1]} : vector<8x128xf32> to vector<8x32xf32>
    %33 = arith.negf %32 : vector<8x32xf32>
    %34 = math.exp %33 : vector<8x32xf32>
    %cst_24 = arith.constant 1.000000e+00 : f32
    %35 = vector.broadcast %cst_24 : f32 to vector<8x32xf32>
    %36 = arith.addf %35, %34 : vector<8x32xf32>
    %37 = arith.divf %35, %36 : vector<8x32xf32>
    %38 = vector.extract_strided_slice %20 {offsets = [0, 64], sizes = [8, 32], strides = [1, 1]} : vector<8x128xf32> to vector<8x32xf32>
    %39 = math.tanh %38 : vector<8x32xf32>
    %40 = vector.extract_strided_slice %20 {offsets = [0, 96], sizes = [8, 32], strides = [1, 1]} : vector<8x128xf32> to vector<8x32xf32>
    %41 = arith.negf %40 : vector<8x32xf32>
    %42 = math.exp %41 : vector<8x32xf32>
    %cst_25 = arith.constant 1.000000e+00 : f32
    %43 = vector.broadcast %cst_25 : f32 to vector<8x32xf32>
    %44 = arith.addf %43, %42 : vector<8x32xf32>
    %45 = arith.divf %43, %44 : vector<8x32xf32>
    %46 = arith.mulf %37, %14 : vector<8x32xf32>
    %47 = arith.mulf %31, %39 : vector<8x32xf32>
    %48 = arith.addf %46, %47 : vector<8x32xf32>
    %49 = math.tanh %48 : vector<8x32xf32>
    %50 = arith.mulf %45, %49 : vector<8x32xf32>
    %51 = vector.extract_strided_slice %25 {offsets = [0, 0], sizes = [8, 32], strides = [1, 1]} : vector<8x128xf32> to vector<8x32xf32>
    %52 = arith.negf %51 : vector<8x32xf32>
    %53 = math.exp %52 : vector<8x32xf32>
    %cst_26 = arith.constant 1.000000e+00 : f32
    %54 = vector.broadcast %cst_26 : f32 to vector<8x32xf32>
    %55 = arith.addf %54, %53 : vector<8x32xf32>
    %56 = arith.divf %54, %55 : vector<8x32xf32>
    %57 = vector.extract_strided_slice %25 {offsets = [0, 32], sizes = [8, 32], strides = [1, 1]} : vector<8x128xf32> to vector<8x32xf32>
    %58 = arith.negf %57 : vector<8x32xf32>
    %59 = math.exp %58 : vector<8x32xf32>
    %cst_27 = arith.constant 1.000000e+00 : f32
    %60 = vector.broadcast %cst_27 : f32 to vector<8x32xf32>
    %61 = arith.addf %60, %59 : vector<8x32xf32>
    %62 = arith.divf %60, %61 : vector<8x32xf32>
    %63 = vector.extract_strided_slice %25 {offsets = [0, 64], sizes = [8, 32], strides = [1, 1]} : vector<8x128xf32> to vector<8x32xf32>
    %64 = math.tanh %63 : vector<8x32xf32>
    %65 = vector.extract_strided_slice %25 {offsets = [0, 96], sizes = [8, 32], strides = [1, 1]} : vector<8x128xf32> to vector<8x32xf32>
    %66 = arith.negf %65 : vector<8x32xf32>
    %67 = math.exp %66 : vector<8x32xf32>
    %cst_28 = arith.constant 1.000000e+00 : f32
    %68 = vector.broadcast %cst_28 : f32 to vector<8x32xf32>
    %69 = arith.addf %68, %67 : vector<8x32xf32>
    %70 = arith.divf %68, %69 : vector<8x32xf32>
    %71 = arith.mulf %62, %14 : vector<8x32xf32>
    %72 = arith.mulf %56, %64 : vector<8x32xf32>
    %73 = arith.addf %71, %72 : vector<8x32xf32>
    %74 = math.tanh %73 : vector<8x32xf32>
    %75 = arith.mulf %70, %74 : vector<8x32xf32>
    %76 = arith.index_cast %c0_i32 : i32 to index
    %c0_29 = arith.constant 0 : index
    %c0_30 = arith.constant 0 : index
    %77 = vector.load %arg10[%76, %c0_29, %c0_30] : memref<8x8x32xf32, #tpu.memory_space<vmem>>, vector<1x8x32xf32>
    %78 = vector.shape_cast %77 : vector<1x8x32xf32> to vector<8x32xf32>
    %79 = vector.shape_cast %50 : vector<8x32xf32> to vector<1x8x32xf32>
    tpu.vector_store %arg10[%76, %c0_29, %c0_30], %79 {strides = array<i32>} : memref<8x8x32xf32, #tpu.memory_space<vmem>>, vector<1x8x32xf32>,
    %80 = arith.index_cast %15 : i32 to index
    %c0_31 = arith.constant 0 : index
    %c0_32 = arith.constant 0 : index
    %81 = vector.load %arg11[%80, %c0_31, %c0_32] : memref<8x8x32xf32, #tpu.memory_space<vmem>>, vector<1x8x32xf32>
    %82 = vector.shape_cast %81 : vector<1x8x32xf32> to vector<8x32xf32>
    %83 = vector.shape_cast %75 : vector<8x32xf32> to vector<1x8x32xf32>
    tpu.vector_store %arg11[%80, %c0_31, %c0_32], %83 {strides = array<i32>} : memref<8x8x32xf32, #tpu.memory_space<vmem>>, vector<1x8x32xf32>,
    %c1_i32 = arith.constant 1 : i32
    %c7_i32_33 = arith.constant 7 : i32
    %84 = arith.subi %c7_i32_33, %c1_i32 : i32
    %85 = arith.index_cast %c1_i32 : i32 to index
    %c0_34 = arith.constant 0 : index
    %c0_35 = arith.constant 0 : index
    %86 = vector.load %arg8[%85, %c0_34, %c0_35] : memref<8x8x128xf32, #tpu.memory_space<vmem>>, vector<1x8x128xf32>
    %87 = vector.shape_cast %86 : vector<1x8x128xf32> to vector<8x128xf32>
    %cst_36 = arith.constant dense<0.000000e+00> : vector<8x128xf32>
    %88 = tpu.matmul %50, %12, %cst_36 {dimension_numbers = #tpu.dot_dimension_numbers<[1], [0], [0], [1], [0, 0, 1, 1], [], []>} : vector<8x32xf32>, vector<32x128xf32>, vector<8x128xf32> -> vector<8x128xf32>
    %89 = arith.addf %87, %88 : vector<8x128xf32>
    %90 = arith.index_cast %84 : i32 to index
    %c0_37 = arith.constant 0 : index
    %c0_38 = arith.constant 0 : index
    %91 = vector.load %arg9[%90, %c0_37, %c0_38] : memref<8x8x128xf32, #tpu.memory_space<vmem>>, vector<1x8x128xf32>
    %92 = vector.shape_cast %91 : vector<1x8x128xf32> to vector<8x128xf32>
    %cst_39 = arith.constant dense<0.000000e+00> : vector<8x128xf32>
    %93 = tpu.matmul %75, %13, %cst_39 {dimension_numbers = #tpu.dot_dimension_numbers<[1], [0], [0], [1], [0, 0, 1, 1], [], []>} : vector<8x32xf32>, vector<32x128xf32>, vector<8x128xf32> -> vector<8x128xf32>
    %94 = arith.addf %92, %93 : vector<8x128xf32>
    %95 = vector.extract_strided_slice %89 {offsets = [0, 0], sizes = [8, 32], strides = [1, 1]} : vector<8x128xf32> to vector<8x32xf32>
    %96 = arith.negf %95 : vector<8x32xf32>
    %97 = math.exp %96 : vector<8x32xf32>
    %cst_40 = arith.constant 1.000000e+00 : f32
    %98 = vector.broadcast %cst_40 : f32 to vector<8x32xf32>
    %99 = arith.addf %98, %97 : vector<8x32xf32>
    %100 = arith.divf %98, %99 : vector<8x32xf32>
    %101 = vector.extract_strided_slice %89 {offsets = [0, 32], sizes = [8, 32], strides = [1, 1]} : vector<8x128xf32> to vector<8x32xf32>
    %102 = arith.negf %101 : vector<8x32xf32>
    %103 = math.exp %102 : vector<8x32xf32>
    %cst_41 = arith.constant 1.000000e+00 : f32
    %104 = vector.broadcast %cst_41 : f32 to vector<8x32xf32>
    %105 = arith.addf %104, %103 : vector<8x32xf32>
    %106 = arith.divf %104, %105 : vector<8x32xf32>
    %107 = vector.extract_strided_slice %89 {offsets = [0, 64], sizes = [8, 32], strides = [1, 1]} : vector<8x128xf32> to vector<8x32xf32>
    %108 = math.tanh %107 : vector<8x32xf32>
    %109 = vector.extract_strided_slice %89 {offsets = [0, 96], sizes = [8, 32], strides = [1, 1]} : vector<8x128xf32> to vector<8x32xf32>
    %110 = arith.negf %109 : vector<8x32xf32>
    %111 = math.exp %110 : vector<8x32xf32>
    %cst_42 = arith.constant 1.000000e+00 : f32
    %112 = vector.broadcast %cst_42 : f32 to vector<8x32xf32>
    %113 = arith.addf %112, %111 : vector<8x32xf32>
    %114 = arith.divf %112, %113 : vector<8x32xf32>
    %115 = arith.mulf %106, %48 : vector<8x32xf32>
    %116 = arith.mulf %100, %108 : vector<8x32xf32>
    %117 = arith.addf %115, %116 : vector<8x32xf32>
    %118 = math.tanh %117 : vector<8x32xf32>
    %119 = arith.mulf %114, %118 : vector<8x32xf32>
    %120 = vector.extract_strided_slice %94 {offsets = [0, 0], sizes = [8, 32], strides = [1, 1]} : vector<8x128xf32> to vector<8x32xf32>
    %121 = arith.negf %120 : vector<8x32xf32>
    %122 = math.exp %121 : vector<8x32xf32>
    %cst_43 = arith.constant 1.000000e+00 : f32
    %123 = vector.broadcast %cst_43 : f32 to vector<8x32xf32>
    %124 = arith.addf %123, %122 : vector<8x32xf32>
    %125 = arith.divf %123, %124 : vector<8x32xf32>
    %126 = vector.extract_strided_slice %94 {offsets = [0, 32], sizes = [8, 32], strides = [1, 1]} : vector<8x128xf32> to vector<8x32xf32>
    %127 = arith.negf %126 : vector<8x32xf32>
    %128 = math.exp %127 : vector<8x32xf32>
    %cst_44 = arith.constant 1.000000e+00 : f32
    %129 = vector.broadcast %cst_44 : f32 to vector<8x32xf32>
    %130 = arith.addf %129, %128 : vector<8x32xf32>
    %131 = arith.divf %129, %130 : vector<8x32xf32>
    %132 = vector.extract_strided_slice %94 {offsets = [0, 64], sizes = [8, 32], strides = [1, 1]} : vector<8x128xf32> to vector<8x32xf32>
    %133 = math.tanh %132 : vector<8x32xf32>
    %134 = vector.extract_strided_slice %94 {offsets = [0, 96], sizes = [8, 32], strides = [1, 1]} : vector<8x128xf32> to vector<8x32xf32>
    %135 = arith.negf %134 : vector<8x32xf32>
    %136 = math.exp %135 : vector<8x32xf32>
    %cst_45 = arith.constant 1.000000e+00 : f32
    %137 = vector.broadcast %cst_45 : f32 to vector<8x32xf32>
    %138 = arith.addf %137, %136 : vector<8x32xf32>
    %139 = arith.divf %137, %138 : vector<8x32xf32>
    %140 = arith.mulf %131, %73 : vector<8x32xf32>
    %141 = arith.mulf %125, %133 : vector<8x32xf32>
    %142 = arith.addf %140, %141 : vector<8x32xf32>
    %143 = math.tanh %142 : vector<8x32xf32>
    %144 = arith.mulf %139, %143 : vector<8x32xf32>
    %145 = arith.index_cast %c1_i32 : i32 to index
    %c0_46 = arith.constant 0 : index
    %c0_47 = arith.constant 0 : index
    %146 = vector.load %arg10[%145, %c0_46, %c0_47] : memref<8x8x32xf32, #tpu.memory_space<vmem>>, vector<1x8x32xf32>
    %147 = vector.shape_cast %146 : vector<1x8x32xf32> to vector<8x32xf32>
    %148 = vector.shape_cast %119 : vector<8x32xf32> to vector<1x8x32xf32>
    tpu.vector_store %arg10[%145, %c0_46, %c0_47], %148 {strides = array<i32>} : memref<8x8x32xf32, #tpu.memory_space<vmem>>, vector<1x8x32xf32>,
    %149 = arith.index_cast %84 : i32 to index
    %c0_48 = arith.constant 0 : index
    %c0_49 = arith.constant 0 : index
    %150 = vector.load %arg11[%149, %c0_48, %c0_49] : memref<8x8x32xf32, #tpu.memory_space<vmem>>, vector<1x8x32xf32>
    %151 = vector.shape_cast %150 : vector<1x8x32xf32> to vector<8x32xf32>
    %152 = vector.shape_cast %144 : vector<8x32xf32> to vector<1x8x32xf32>
    tpu.vector_store %arg11[%149, %c0_48, %c0_49], %152 {strides = array<i32>} : memref<8x8x32xf32, #tpu.memory_space<vmem>>, vector<1x8x32xf32>,
    %c2_i32 = arith.constant 2 : i32
    %c7_i32_50 = arith.constant 7 : i32
    %153 = arith.subi %c7_i32_50, %c2_i32 : i32
    %154 = arith.index_cast %c2_i32 : i32 to index
    %c0_51 = arith.constant 0 : index
    %c0_52 = arith.constant 0 : index
    %155 = vector.load %arg8[%154, %c0_51, %c0_52] : memref<8x8x128xf32, #tpu.memory_space<vmem>>, vector<1x8x128xf32>
    %156 = vector.shape_cast %155 : vector<1x8x128xf32> to vector<8x128xf32>
    %cst_53 = arith.constant dense<0.000000e+00> : vector<8x128xf32>
    %157 = tpu.matmul %119, %12, %cst_53 {dimension_numbers = #tpu.dot_dimension_numbers<[1], [0], [0], [1], [0, 0, 1, 1], [], []>} : vector<8x32xf32>, vector<32x128xf32>, vector<8x128xf32> -> vector<8x128xf32>
    %158 = arith.addf %156, %157 : vector<8x128xf32>
    %159 = arith.index_cast %153 : i32 to index
    %c0_54 = arith.constant 0 : index
    %c0_55 = arith.constant 0 : index
    %160 = vector.load %arg9[%159, %c0_54, %c0_55] : memref<8x8x128xf32, #tpu.memory_space<vmem>>, vector<1x8x128xf32>
    %161 = vector.shape_cast %160 : vector<1x8x128xf32> to vector<8x128xf32>
    %cst_56 = arith.constant dense<0.000000e+00> : vector<8x128xf32>
    %162 = tpu.matmul %144, %13, %cst_56 {dimension_numbers = #tpu.dot_dimension_numbers<[1], [0], [0], [1], [0, 0, 1, 1], [], []>} : vector<8x32xf32>, vector<32x128xf32>, vector<8x128xf32> -> vector<8x128xf32>
    %163 = arith.addf %161, %162 : vector<8x128xf32>
    %164 = vector.extract_strided_slice %158 {offsets = [0, 0], sizes = [8, 32], strides = [1, 1]} : vector<8x128xf32> to vector<8x32xf32>
    %165 = arith.negf %164 : vector<8x32xf32>
    %166 = math.exp %165 : vector<8x32xf32>
    %cst_57 = arith.constant 1.000000e+00 : f32
    %167 = vector.broadcast %cst_57 : f32 to vector<8x32xf32>
    %168 = arith.addf %167, %166 : vector<8x32xf32>
    %169 = arith.divf %167, %168 : vector<8x32xf32>
    %170 = vector.extract_strided_slice %158 {offsets = [0, 32], sizes = [8, 32], strides = [1, 1]} : vector<8x128xf32> to vector<8x32xf32>
    %171 = arith.negf %170 : vector<8x32xf32>
    %172 = math.exp %171 : vector<8x32xf32>
    %cst_58 = arith.constant 1.000000e+00 : f32
    %173 = vector.broadcast %cst_58 : f32 to vector<8x32xf32>
    %174 = arith.addf %173, %172 : vector<8x32xf32>
    %175 = arith.divf %173, %174 : vector<8x32xf32>
    %176 = vector.extract_strided_slice %158 {offsets = [0, 64], sizes = [8, 32], strides = [1, 1]} : vector<8x128xf32> to vector<8x32xf32>
    %177 = math.tanh %176 : vector<8x32xf32>
    %178 = vector.extract_strided_slice %158 {offsets = [0, 96], sizes = [8, 32], strides = [1, 1]} : vector<8x128xf32> to vector<8x32xf32>
    %179 = arith.negf %178 : vector<8x32xf32>
    %180 = math.exp %179 : vector<8x32xf32>
    %cst_59 = arith.constant 1.000000e+00 : f32
    %181 = vector.broadcast %cst_59 : f32 to vector<8x32xf32>
    %182 = arith.addf %181, %180 : vector<8x32xf32>
    %183 = arith.divf %181, %182 : vector<8x32xf32>
    %184 = arith.mulf %175, %117 : vector<8x32xf32>
    %185 = arith.mulf %169, %177 : vector<8x32xf32>
    %186 = arith.addf %184, %185 : vector<8x32xf32>
    %187 = math.tanh %186 : vector<8x32xf32>
    %188 = arith.mulf %183, %187 : vector<8x32xf32>
    %189 = vector.extract_strided_slice %163 {offsets = [0, 0], sizes = [8, 32], strides = [1, 1]} : vector<8x128xf32> to vector<8x32xf32>
    %190 = arith.negf %189 : vector<8x32xf32>
    %191 = math.exp %190 : vector<8x32xf32>
    %cst_60 = arith.constant 1.000000e+00 : f32
    %192 = vector.broadcast %cst_60 : f32 to vector<8x32xf32>
    %193 = arith.addf %192, %191 : vector<8x32xf32>
    %194 = arith.divf %192, %193 : vector<8x32xf32>
    %195 = vector.extract_strided_slice %163 {offsets = [0, 32], sizes = [8, 32], strides = [1, 1]} : vector<8x128xf32> to vector<8x32xf32>
    %196 = arith.negf %195 : vector<8x32xf32>
    %197 = math.exp %196 : vector<8x32xf32>
    %cst_61 = arith.constant 1.000000e+00 : f32
    %198 = vector.broadcast %cst_61 : f32 to vector<8x32xf32>
    %199 = arith.addf %198, %197 : vector<8x32xf32>
    %200 = arith.divf %198, %199 : vector<8x32xf32>
    %201 = vector.extract_strided_slice %163 {offsets = [0, 64], sizes = [8, 32], strides = [1, 1]} : vector<8x128xf32> to vector<8x32xf32>
    %202 = math.tanh %201 : vector<8x32xf32>
    %203 = vector.extract_strided_slice %163 {offsets = [0, 96], sizes = [8, 32], strides = [1, 1]} : vector<8x128xf32> to vector<8x32xf32>
    %204 = arith.negf %203 : vector<8x32xf32>
    %205 = math.exp %204 : vector<8x32xf32>
    %cst_62 = arith.constant 1.000000e+00 : f32
    %206 = vector.broadcast %cst_62 : f32 to vector<8x32xf32>
    %207 = arith.addf %206, %205 : vector<8x32xf32>
    %208 = arith.divf %206, %207 : vector<8x32xf32>
    %209 = arith.mulf %200, %142 : vector<8x32xf32>
    %210 = arith.mulf %194, %202 : vector<8x32xf32>
    %211 = arith.addf %209, %210 : vector<8x32xf32>
    %212 = math.tanh %211 : vector<8x32xf32>
    %213 = arith.mulf %208, %212 : vector<8x32xf32>
    %214 = arith.index_cast %c2_i32 : i32 to index
    %c0_63 = arith.constant 0 : index
    %c0_64 = arith.constant 0 : index
    %215 = vector.load %arg10[%214, %c0_63, %c0_64] : memref<8x8x32xf32, #tpu.memory_space<vmem>>, vector<1x8x32xf32>
    %216 = vector.shape_cast %215 : vector<1x8x32xf32> to vector<8x32xf32>
    %217 = vector.shape_cast %188 : vector<8x32xf32> to vector<1x8x32xf32>
    tpu.vector_store %arg10[%214, %c0_63, %c0_64], %217 {strides = array<i32>} : memref<8x8x32xf32, #tpu.memory_space<vmem>>, vector<1x8x32xf32>,
    %218 = arith.index_cast %153 : i32 to index
    %c0_65 = arith.constant 0 : index
    %c0_66 = arith.constant 0 : index
    %219 = vector.load %arg11[%218, %c0_65, %c0_66] : memref<8x8x32xf32, #tpu.memory_space<vmem>>, vector<1x8x32xf32>
    %220 = vector.shape_cast %219 : vector<1x8x32xf32> to vector<8x32xf32>
    %221 = vector.shape_cast %213 : vector<8x32xf32> to vector<1x8x32xf32>
    tpu.vector_store %arg11[%218, %c0_65, %c0_66], %221 {strides = array<i32>} : memref<8x8x32xf32, #tpu.memory_space<vmem>>, vector<1x8x32xf32>,
    %c3_i32 = arith.constant 3 : i32
    %c7_i32_67 = arith.constant 7 : i32
    %222 = arith.subi %c7_i32_67, %c3_i32 : i32
    %223 = arith.index_cast %c3_i32 : i32 to index
    %c0_68 = arith.constant 0 : index
    %c0_69 = arith.constant 0 : index
    %224 = vector.load %arg8[%223, %c0_68, %c0_69] : memref<8x8x128xf32, #tpu.memory_space<vmem>>, vector<1x8x128xf32>
    %225 = vector.shape_cast %224 : vector<1x8x128xf32> to vector<8x128xf32>
    %cst_70 = arith.constant dense<0.000000e+00> : vector<8x128xf32>
    %226 = tpu.matmul %188, %12, %cst_70 {dimension_numbers = #tpu.dot_dimension_numbers<[1], [0], [0], [1], [0, 0, 1, 1], [], []>} : vector<8x32xf32>, vector<32x128xf32>, vector<8x128xf32> -> vector<8x128xf32>
    %227 = arith.addf %225, %226 : vector<8x128xf32>
    %228 = arith.index_cast %222 : i32 to index
    %c0_71 = arith.constant 0 : index
    %c0_72 = arith.constant 0 : index
    %229 = vector.load %arg9[%228, %c0_71, %c0_72] : memref<8x8x128xf32, #tpu.memory_space<vmem>>, vector<1x8x128xf32>
    %230 = vector.shape_cast %229 : vector<1x8x128xf32> to vector<8x128xf32>
    %cst_73 = arith.constant dense<0.000000e+00> : vector<8x128xf32>
    %231 = tpu.matmul %213, %13, %cst_73 {dimension_numbers = #tpu.dot_dimension_numbers<[1], [0], [0], [1], [0, 0, 1, 1], [], []>} : vector<8x32xf32>, vector<32x128xf32>, vector<8x128xf32> -> vector<8x128xf32>
    %232 = arith.addf %230, %231 : vector<8x128xf32>
    %233 = vector.extract_strided_slice %227 {offsets = [0, 0], sizes = [8, 32], strides = [1, 1]} : vector<8x128xf32> to vector<8x32xf32>
    %234 = arith.negf %233 : vector<8x32xf32>
    %235 = math.exp %234 : vector<8x32xf32>
    %cst_74 = arith.constant 1.000000e+00 : f32
    %236 = vector.broadcast %cst_74 : f32 to vector<8x32xf32>
    %237 = arith.addf %236, %235 : vector<8x32xf32>
    %238 = arith.divf %236, %237 : vector<8x32xf32>
    %239 = vector.extract_strided_slice %227 {offsets = [0, 32], sizes = [8, 32], strides = [1, 1]} : vector<8x128xf32> to vector<8x32xf32>
    %240 = arith.negf %239 : vector<8x32xf32>
    %241 = math.exp %240 : vector<8x32xf32>
    %cst_75 = arith.constant 1.000000e+00 : f32
    %242 = vector.broadcast %cst_75 : f32 to vector<8x32xf32>
    %243 = arith.addf %242, %241 : vector<8x32xf32>
    %244 = arith.divf %242, %243 : vector<8x32xf32>
    %245 = vector.extract_strided_slice %227 {offsets = [0, 64], sizes = [8, 32], strides = [1, 1]} : vector<8x128xf32> to vector<8x32xf32>
    %246 = math.tanh %245 : vector<8x32xf32>
    %247 = vector.extract_strided_slice %227 {offsets = [0, 96], sizes = [8, 32], strides = [1, 1]} : vector<8x128xf32> to vector<8x32xf32>
    %248 = arith.negf %247 : vector<8x32xf32>
    %249 = math.exp %248 : vector<8x32xf32>
    %cst_76 = arith.constant 1.000000e+00 : f32
    %250 = vector.broadcast %cst_76 : f32 to vector<8x32xf32>
    %251 = arith.addf %250, %249 : vector<8x32xf32>
    %252 = arith.divf %250, %251 : vector<8x32xf32>
    %253 = arith.mulf %244, %186 : vector<8x32xf32>
    %254 = arith.mulf %238, %246 : vector<8x32xf32>
    %255 = arith.addf %253, %254 : vector<8x32xf32>
    %256 = math.tanh %255 : vector<8x32xf32>
    %257 = arith.mulf %252, %256 : vector<8x32xf32>
    %258 = vector.extract_strided_slice %232 {offsets = [0, 0], sizes = [8, 32], strides = [1, 1]} : vector<8x128xf32> to vector<8x32xf32>
    %259 = arith.negf %258 : vector<8x32xf32>
    %260 = math.exp %259 : vector<8x32xf32>
    %cst_77 = arith.constant 1.000000e+00 : f32
    %261 = vector.broadcast %cst_77 : f32 to vector<8x32xf32>
    %262 = arith.addf %261, %260 : vector<8x32xf32>
    %263 = arith.divf %261, %262 : vector<8x32xf32>
    %264 = vector.extract_strided_slice %232 {offsets = [0, 32], sizes = [8, 32], strides = [1, 1]} : vector<8x128xf32> to vector<8x32xf32>
    %265 = arith.negf %264 : vector<8x32xf32>
    %266 = math.exp %265 : vector<8x32xf32>
    %cst_78 = arith.constant 1.000000e+00 : f32
    %267 = vector.broadcast %cst_78 : f32 to vector<8x32xf32>
    %268 = arith.addf %267, %266 : vector<8x32xf32>
    %269 = arith.divf %267, %268 : vector<8x32xf32>
    %270 = vector.extract_strided_slice %232 {offsets = [0, 64], sizes = [8, 32], strides = [1, 1]} : vector<8x128xf32> to vector<8x32xf32>
    %271 = math.tanh %270 : vector<8x32xf32>
    %272 = vector.extract_strided_slice %232 {offsets = [0, 96], sizes = [8, 32], strides = [1, 1]} : vector<8x128xf32> to vector<8x32xf32>
    %273 = arith.negf %272 : vector<8x32xf32>
    %274 = math.exp %273 : vector<8x32xf32>
    %cst_79 = arith.constant 1.000000e+00 : f32
    %275 = vector.broadcast %cst_79 : f32 to vector<8x32xf32>
    %276 = arith.addf %275, %274 : vector<8x32xf32>
    %277 = arith.divf %275, %276 : vector<8x32xf32>
    %278 = arith.mulf %269, %211 : vector<8x32xf32>
    %279 = arith.mulf %263, %271 : vector<8x32xf32>
    %280 = arith.addf %278, %279 : vector<8x32xf32>
    %281 = math.tanh %280 : vector<8x32xf32>
    %282 = arith.mulf %277, %281 : vector<8x32xf32>
    %283 = arith.index_cast %c3_i32 : i32 to index
    %c0_80 = arith.constant 0 : index
    %c0_81 = arith.constant 0 : index
    %284 = vector.load %arg10[%283, %c0_80, %c0_81] : memref<8x8x32xf32, #tpu.memory_space<vmem>>, vector<1x8x32xf32>
    %285 = vector.shape_cast %284 : vector<1x8x32xf32> to vector<8x32xf32>
    %286 = vector.shape_cast %257 : vector<8x32xf32> to vector<1x8x32xf32>
    tpu.vector_store %arg10[%283, %c0_80, %c0_81], %286 {strides = array<i32>} : memref<8x8x32xf32, #tpu.memory_space<vmem>>, vector<1x8x32xf32>,
    %287 = arith.index_cast %222 : i32 to index
    %c0_82 = arith.constant 0 : index
    %c0_83 = arith.constant 0 : index
    %288 = vector.load %arg11[%287, %c0_82, %c0_83] : memref<8x8x32xf32, #tpu.memory_space<vmem>>, vector<1x8x32xf32>
    %289 = vector.shape_cast %288 : vector<1x8x32xf32> to vector<8x32xf32>
    %290 = vector.shape_cast %282 : vector<8x32xf32> to vector<1x8x32xf32>
    tpu.vector_store %arg11[%287, %c0_82, %c0_83], %290 {strides = array<i32>} : memref<8x8x32xf32, #tpu.memory_space<vmem>>, vector<1x8x32xf32>,
    %c4_i32 = arith.constant 4 : i32
    %c7_i32_84 = arith.constant 7 : i32
    %291 = arith.subi %c7_i32_84, %c4_i32 : i32
    %292 = arith.index_cast %c4_i32 : i32 to index
    %c0_85 = arith.constant 0 : index
    %c0_86 = arith.constant 0 : index
    %293 = vector.load %arg8[%292, %c0_85, %c0_86] : memref<8x8x128xf32, #tpu.memory_space<vmem>>, vector<1x8x128xf32>
    %294 = vector.shape_cast %293 : vector<1x8x128xf32> to vector<8x128xf32>
    %cst_87 = arith.constant dense<0.000000e+00> : vector<8x128xf32>
    %295 = tpu.matmul %257, %12, %cst_87 {dimension_numbers = #tpu.dot_dimension_numbers<[1], [0], [0], [1], [0, 0, 1, 1], [], []>} : vector<8x32xf32>, vector<32x128xf32>, vector<8x128xf32> -> vector<8x128xf32>
    %296 = arith.addf %294, %295 : vector<8x128xf32>
    %297 = arith.index_cast %291 : i32 to index
    %c0_88 = arith.constant 0 : index
    %c0_89 = arith.constant 0 : index
    %298 = vector.load %arg9[%297, %c0_88, %c0_89] : memref<8x8x128xf32, #tpu.memory_space<vmem>>, vector<1x8x128xf32>
    %299 = vector.shape_cast %298 : vector<1x8x128xf32> to vector<8x128xf32>
    %cst_90 = arith.constant dense<0.000000e+00> : vector<8x128xf32>
    %300 = tpu.matmul %282, %13, %cst_90 {dimension_numbers = #tpu.dot_dimension_numbers<[1], [0], [0], [1], [0, 0, 1, 1], [], []>} : vector<8x32xf32>, vector<32x128xf32>, vector<8x128xf32> -> vector<8x128xf32>
    %301 = arith.addf %299, %300 : vector<8x128xf32>
    %302 = vector.extract_strided_slice %296 {offsets = [0, 0], sizes = [8, 32], strides = [1, 1]} : vector<8x128xf32> to vector<8x32xf32>
    %303 = arith.negf %302 : vector<8x32xf32>
    %304 = math.exp %303 : vector<8x32xf32>
    %cst_91 = arith.constant 1.000000e+00 : f32
    %305 = vector.broadcast %cst_91 : f32 to vector<8x32xf32>
    %306 = arith.addf %305, %304 : vector<8x32xf32>
    %307 = arith.divf %305, %306 : vector<8x32xf32>
    %308 = vector.extract_strided_slice %296 {offsets = [0, 32], sizes = [8, 32], strides = [1, 1]} : vector<8x128xf32> to vector<8x32xf32>
    %309 = arith.negf %308 : vector<8x32xf32>
    %310 = math.exp %309 : vector<8x32xf32>
    %cst_92 = arith.constant 1.000000e+00 : f32
    %311 = vector.broadcast %cst_92 : f32 to vector<8x32xf32>
    %312 = arith.addf %311, %310 : vector<8x32xf32>
    %313 = arith.divf %311, %312 : vector<8x32xf32>
    %314 = vector.extract_strided_slice %296 {offsets = [0, 64], sizes = [8, 32], strides = [1, 1]} : vector<8x128xf32> to vector<8x32xf32>
    %315 = math.tanh %314 : vector<8x32xf32>
    %316 = vector.extract_strided_slice %296 {offsets = [0, 96], sizes = [8, 32], strides = [1, 1]} : vector<8x128xf32> to vector<8x32xf32>
    %317 = arith.negf %316 : vector<8x32xf32>
    %318 = math.exp %317 : vector<8x32xf32>
    %cst_93 = arith.constant 1.000000e+00 : f32
    %319 = vector.broadcast %cst_93 : f32 to vector<8x32xf32>
    %320 = arith.addf %319, %318 : vector<8x32xf32>
    %321 = arith.divf %319, %320 : vector<8x32xf32>
    %322 = arith.mulf %313, %255 : vector<8x32xf32>
    %323 = arith.mulf %307, %315 : vector<8x32xf32>
    %324 = arith.addf %322, %323 : vector<8x32xf32>
    %325 = math.tanh %324 : vector<8x32xf32>
    %326 = arith.mulf %321, %325 : vector<8x32xf32>
    %327 = vector.extract_strided_slice %301 {offsets = [0, 0], sizes = [8, 32], strides = [1, 1]} : vector<8x128xf32> to vector<8x32xf32>
    %328 = arith.negf %327 : vector<8x32xf32>
    %329 = math.exp %328 : vector<8x32xf32>
    %cst_94 = arith.constant 1.000000e+00 : f32
    %330 = vector.broadcast %cst_94 : f32 to vector<8x32xf32>
    %331 = arith.addf %330, %329 : vector<8x32xf32>
    %332 = arith.divf %330, %331 : vector<8x32xf32>
    %333 = vector.extract_strided_slice %301 {offsets = [0, 32], sizes = [8, 32], strides = [1, 1]} : vector<8x128xf32> to vector<8x32xf32>
    %334 = arith.negf %333 : vector<8x32xf32>
    %335 = math.exp %334 : vector<8x32xf32>
    %cst_95 = arith.constant 1.000000e+00 : f32
    %336 = vector.broadcast %cst_95 : f32 to vector<8x32xf32>
    %337 = arith.addf %336, %335 : vector<8x32xf32>
    %338 = arith.divf %336, %337 : vector<8x32xf32>
    %339 = vector.extract_strided_slice %301 {offsets = [0, 64], sizes = [8, 32], strides = [1, 1]} : vector<8x128xf32> to vector<8x32xf32>
    %340 = math.tanh %339 : vector<8x32xf32>
    %341 = vector.extract_strided_slice %301 {offsets = [0, 96], sizes = [8, 32], strides = [1, 1]} : vector<8x128xf32> to vector<8x32xf32>
    %342 = arith.negf %341 : vector<8x32xf32>
    %343 = math.exp %342 : vector<8x32xf32>
    %cst_96 = arith.constant 1.000000e+00 : f32
    %344 = vector.broadcast %cst_96 : f32 to vector<8x32xf32>
    %345 = arith.addf %344, %343 : vector<8x32xf32>
    %346 = arith.divf %344, %345 : vector<8x32xf32>
    %347 = arith.mulf %338, %280 : vector<8x32xf32>
    %348 = arith.mulf %332, %340 : vector<8x32xf32>
    %349 = arith.addf %347, %348 : vector<8x32xf32>
    %350 = math.tanh %349 : vector<8x32xf32>
    %351 = arith.mulf %346, %350 : vector<8x32xf32>
    %352 = arith.index_cast %c4_i32 : i32 to index
    %c0_97 = arith.constant 0 : index
    %c0_98 = arith.constant 0 : index
    %353 = vector.load %arg10[%352, %c0_97, %c0_98] : memref<8x8x32xf32, #tpu.memory_space<vmem>>, vector<1x8x32xf32>
    %354 = vector.shape_cast %353 : vector<1x8x32xf32> to vector<8x32xf32>
    %355 = vector.shape_cast %326 : vector<8x32xf32> to vector<1x8x32xf32>
    tpu.vector_store %arg10[%352, %c0_97, %c0_98], %355 {strides = array<i32>} : memref<8x8x32xf32, #tpu.memory_space<vmem>>, vector<1x8x32xf32>,
    %356 = arith.index_cast %291 : i32 to index
    %c0_99 = arith.constant 0 : index
    %c0_100 = arith.constant 0 : index
    %357 = vector.load %arg11[%356, %c0_99, %c0_100] : memref<8x8x32xf32, #tpu.memory_space<vmem>>, vector<1x8x32xf32>
    %358 = vector.shape_cast %357 : vector<1x8x32xf32> to vector<8x32xf32>
    %359 = vector.shape_cast %351 : vector<8x32xf32> to vector<1x8x32xf32>
    tpu.vector_store %arg11[%356, %c0_99, %c0_100], %359 {strides = array<i32>} : memref<8x8x32xf32, #tpu.memory_space<vmem>>, vector<1x8x32xf32>,
    %c5_i32 = arith.constant 5 : i32
    %c7_i32_101 = arith.constant 7 : i32
    %360 = arith.subi %c7_i32_101, %c5_i32 : i32
    %361 = arith.index_cast %c5_i32 : i32 to index
    %c0_102 = arith.constant 0 : index
    %c0_103 = arith.constant 0 : index
    %362 = vector.load %arg8[%361, %c0_102, %c0_103] : memref<8x8x128xf32, #tpu.memory_space<vmem>>, vector<1x8x128xf32>
    %363 = vector.shape_cast %362 : vector<1x8x128xf32> to vector<8x128xf32>
    %cst_104 = arith.constant dense<0.000000e+00> : vector<8x128xf32>
    %364 = tpu.matmul %326, %12, %cst_104 {dimension_numbers = #tpu.dot_dimension_numbers<[1], [0], [0], [1], [0, 0, 1, 1], [], []>} : vector<8x32xf32>, vector<32x128xf32>, vector<8x128xf32> -> vector<8x128xf32>
    %365 = arith.addf %363, %364 : vector<8x128xf32>
    %366 = arith.index_cast %360 : i32 to index
    %c0_105 = arith.constant 0 : index
    %c0_106 = arith.constant 0 : index
    %367 = vector.load %arg9[%366, %c0_105, %c0_106] : memref<8x8x128xf32, #tpu.memory_space<vmem>>, vector<1x8x128xf32>
    %368 = vector.shape_cast %367 : vector<1x8x128xf32> to vector<8x128xf32>
    %cst_107 = arith.constant dense<0.000000e+00> : vector<8x128xf32>
    %369 = tpu.matmul %351, %13, %cst_107 {dimension_numbers = #tpu.dot_dimension_numbers<[1], [0], [0], [1], [0, 0, 1, 1], [], []>} : vector<8x32xf32>, vector<32x128xf32>, vector<8x128xf32> -> vector<8x128xf32>
    %370 = arith.addf %368, %369 : vector<8x128xf32>
    %371 = vector.extract_strided_slice %365 {offsets = [0, 0], sizes = [8, 32], strides = [1, 1]} : vector<8x128xf32> to vector<8x32xf32>
    %372 = arith.negf %371 : vector<8x32xf32>
    %373 = math.exp %372 : vector<8x32xf32>
    %cst_108 = arith.constant 1.000000e+00 : f32
    %374 = vector.broadcast %cst_108 : f32 to vector<8x32xf32>
    %375 = arith.addf %374, %373 : vector<8x32xf32>
    %376 = arith.divf %374, %375 : vector<8x32xf32>
    %377 = vector.extract_strided_slice %365 {offsets = [0, 32], sizes = [8, 32], strides = [1, 1]} : vector<8x128xf32> to vector<8x32xf32>
    %378 = arith.negf %377 : vector<8x32xf32>
    %379 = math.exp %378 : vector<8x32xf32>
    %cst_109 = arith.constant 1.000000e+00 : f32
    %380 = vector.broadcast %cst_109 : f32 to vector<8x32xf32>
    %381 = arith.addf %380, %379 : vector<8x32xf32>
    %382 = arith.divf %380, %381 : vector<8x32xf32>
    %383 = vector.extract_strided_slice %365 {offsets = [0, 64], sizes = [8, 32], strides = [1, 1]} : vector<8x128xf32> to vector<8x32xf32>
    %384 = math.tanh %383 : vector<8x32xf32>
    %385 = vector.extract_strided_slice %365 {offsets = [0, 96], sizes = [8, 32], strides = [1, 1]} : vector<8x128xf32> to vector<8x32xf32>
    %386 = arith.negf %385 : vector<8x32xf32>
    %387 = math.exp %386 : vector<8x32xf32>
    %cst_110 = arith.constant 1.000000e+00 : f32
    %388 = vector.broadcast %cst_110 : f32 to vector<8x32xf32>
    %389 = arith.addf %388, %387 : vector<8x32xf32>
    %390 = arith.divf %388, %389 : vector<8x32xf32>
    %391 = arith.mulf %382, %324 : vector<8x32xf32>
    %392 = arith.mulf %376, %384 : vector<8x32xf32>
    %393 = arith.addf %391, %392 : vector<8x32xf32>
    %394 = math.tanh %393 : vector<8x32xf32>
    %395 = arith.mulf %390, %394 : vector<8x32xf32>
    %396 = vector.extract_strided_slice %370 {offsets = [0, 0], sizes = [8, 32], strides = [1, 1]} : vector<8x128xf32> to vector<8x32xf32>
    %397 = arith.negf %396 : vector<8x32xf32>
    %398 = math.exp %397 : vector<8x32xf32>
    %cst_111 = arith.constant 1.000000e+00 : f32
    %399 = vector.broadcast %cst_111 : f32 to vector<8x32xf32>
    %400 = arith.addf %399, %398 : vector<8x32xf32>
    %401 = arith.divf %399, %400 : vector<8x32xf32>
    %402 = vector.extract_strided_slice %370 {offsets = [0, 32], sizes = [8, 32], strides = [1, 1]} : vector<8x128xf32> to vector<8x32xf32>
    %403 = arith.negf %402 : vector<8x32xf32>
    %404 = math.exp %403 : vector<8x32xf32>
    %cst_112 = arith.constant 1.000000e+00 : f32
    %405 = vector.broadcast %cst_112 : f32 to vector<8x32xf32>
    %406 = arith.addf %405, %404 : vector<8x32xf32>
    %407 = arith.divf %405, %406 : vector<8x32xf32>
    %408 = vector.extract_strided_slice %370 {offsets = [0, 64], sizes = [8, 32], strides = [1, 1]} : vector<8x128xf32> to vector<8x32xf32>
    %409 = math.tanh %408 : vector<8x32xf32>
    %410 = vector.extract_strided_slice %370 {offsets = [0, 96], sizes = [8, 32], strides = [1, 1]} : vector<8x128xf32> to vector<8x32xf32>
    %411 = arith.negf %410 : vector<8x32xf32>
    %412 = math.exp %411 : vector<8x32xf32>
    %cst_113 = arith.constant 1.000000e+00 : f32
    %413 = vector.broadcast %cst_113 : f32 to vector<8x32xf32>
    %414 = arith.addf %413, %412 : vector<8x32xf32>
    %415 = arith.divf %413, %414 : vector<8x32xf32>
    %416 = arith.mulf %407, %349 : vector<8x32xf32>
    %417 = arith.mulf %401, %409 : vector<8x32xf32>
    %418 = arith.addf %416, %417 : vector<8x32xf32>
    %419 = math.tanh %418 : vector<8x32xf32>
    %420 = arith.mulf %415, %419 : vector<8x32xf32>
    %421 = arith.index_cast %c5_i32 : i32 to index
    %c0_114 = arith.constant 0 : index
    %c0_115 = arith.constant 0 : index
    %422 = vector.load %arg10[%421, %c0_114, %c0_115] : memref<8x8x32xf32, #tpu.memory_space<vmem>>, vector<1x8x32xf32>
    %423 = vector.shape_cast %422 : vector<1x8x32xf32> to vector<8x32xf32>
    %424 = vector.shape_cast %395 : vector<8x32xf32> to vector<1x8x32xf32>
    tpu.vector_store %arg10[%421, %c0_114, %c0_115], %424 {strides = array<i32>} : memref<8x8x32xf32, #tpu.memory_space<vmem>>, vector<1x8x32xf32>,
    %425 = arith.index_cast %360 : i32 to index
    %c0_116 = arith.constant 0 : index
    %c0_117 = arith.constant 0 : index
    %426 = vector.load %arg11[%425, %c0_116, %c0_117] : memref<8x8x32xf32, #tpu.memory_space<vmem>>, vector<1x8x32xf32>
    %427 = vector.shape_cast %426 : vector<1x8x32xf32> to vector<8x32xf32>
    %428 = vector.shape_cast %420 : vector<8x32xf32> to vector<1x8x32xf32>
    tpu.vector_store %arg11[%425, %c0_116, %c0_117], %428 {strides = array<i32>} : memref<8x8x32xf32, #tpu.memory_space<vmem>>, vector<1x8x32xf32>,
    %c6_i32 = arith.constant 6 : i32
    %c7_i32_118 = arith.constant 7 : i32
    %429 = arith.subi %c7_i32_118, %c6_i32 : i32
    %430 = arith.index_cast %c6_i32 : i32 to index
    %c0_119 = arith.constant 0 : index
    %c0_120 = arith.constant 0 : index
    %431 = vector.load %arg8[%430, %c0_119, %c0_120] : memref<8x8x128xf32, #tpu.memory_space<vmem>>, vector<1x8x128xf32>
    %432 = vector.shape_cast %431 : vector<1x8x128xf32> to vector<8x128xf32>
    %cst_121 = arith.constant dense<0.000000e+00> : vector<8x128xf32>
    %433 = tpu.matmul %395, %12, %cst_121 {dimension_numbers = #tpu.dot_dimension_numbers<[1], [0], [0], [1], [0, 0, 1, 1], [], []>} : vector<8x32xf32>, vector<32x128xf32>, vector<8x128xf32> -> vector<8x128xf32>
    %434 = arith.addf %432, %433 : vector<8x128xf32>
    %435 = arith.index_cast %429 : i32 to index
    %c0_122 = arith.constant 0 : index
    %c0_123 = arith.constant 0 : index
    %436 = vector.load %arg9[%435, %c0_122, %c0_123] : memref<8x8x128xf32, #tpu.memory_space<vmem>>, vector<1x8x128xf32>
    %437 = vector.shape_cast %436 : vector<1x8x128xf32> to vector<8x128xf32>
    %cst_124 = arith.constant dense<0.000000e+00> : vector<8x128xf32>
    %438 = tpu.matmul %420, %13, %cst_124 {dimension_numbers = #tpu.dot_dimension_numbers<[1], [0], [0], [1], [0, 0, 1, 1], [], []>} : vector<8x32xf32>, vector<32x128xf32>, vector<8x128xf32> -> vector<8x128xf32>
    %439 = arith.addf %437, %438 : vector<8x128xf32>
    %440 = vector.extract_strided_slice %434 {offsets = [0, 0], sizes = [8, 32], strides = [1, 1]} : vector<8x128xf32> to vector<8x32xf32>
    %441 = arith.negf %440 : vector<8x32xf32>
    %442 = math.exp %441 : vector<8x32xf32>
    %cst_125 = arith.constant 1.000000e+00 : f32
    %443 = vector.broadcast %cst_125 : f32 to vector<8x32xf32>
    %444 = arith.addf %443, %442 : vector<8x32xf32>
    %445 = arith.divf %443, %444 : vector<8x32xf32>
    %446 = vector.extract_strided_slice %434 {offsets = [0, 32], sizes = [8, 32], strides = [1, 1]} : vector<8x128xf32> to vector<8x32xf32>
    %447 = arith.negf %446 : vector<8x32xf32>
    %448 = math.exp %447 : vector<8x32xf32>
    %cst_126 = arith.constant 1.000000e+00 : f32
    %449 = vector.broadcast %cst_126 : f32 to vector<8x32xf32>
    %450 = arith.addf %449, %448 : vector<8x32xf32>
    %451 = arith.divf %449, %450 : vector<8x32xf32>
    %452 = vector.extract_strided_slice %434 {offsets = [0, 64], sizes = [8, 32], strides = [1, 1]} : vector<8x128xf32> to vector<8x32xf32>
    %453 = math.tanh %452 : vector<8x32xf32>
    %454 = vector.extract_strided_slice %434 {offsets = [0, 96], sizes = [8, 32], strides = [1, 1]} : vector<8x128xf32> to vector<8x32xf32>
    %455 = arith.negf %454 : vector<8x32xf32>
    %456 = math.exp %455 : vector<8x32xf32>
    %cst_127 = arith.constant 1.000000e+00 : f32
    %457 = vector.broadcast %cst_127 : f32 to vector<8x32xf32>
    %458 = arith.addf %457, %456 : vector<8x32xf32>
    %459 = arith.divf %457, %458 : vector<8x32xf32>
    %460 = arith.mulf %451, %393 : vector<8x32xf32>
    %461 = arith.mulf %445, %453 : vector<8x32xf32>
    %462 = arith.addf %460, %461 : vector<8x32xf32>
    %463 = math.tanh %462 : vector<8x32xf32>
    %464 = arith.mulf %459, %463 : vector<8x32xf32>
    %465 = vector.extract_strided_slice %439 {offsets = [0, 0], sizes = [8, 32], strides = [1, 1]} : vector<8x128xf32> to vector<8x32xf32>
    %466 = arith.negf %465 : vector<8x32xf32>
    %467 = math.exp %466 : vector<8x32xf32>
    %cst_128 = arith.constant 1.000000e+00 : f32
    %468 = vector.broadcast %cst_128 : f32 to vector<8x32xf32>
    %469 = arith.addf %468, %467 : vector<8x32xf32>
    %470 = arith.divf %468, %469 : vector<8x32xf32>
    %471 = vector.extract_strided_slice %439 {offsets = [0, 32], sizes = [8, 32], strides = [1, 1]} : vector<8x128xf32> to vector<8x32xf32>
    %472 = arith.negf %471 : vector<8x32xf32>
    %473 = math.exp %472 : vector<8x32xf32>
    %cst_129 = arith.constant 1.000000e+00 : f32
    %474 = vector.broadcast %cst_129 : f32 to vector<8x32xf32>
    %475 = arith.addf %474, %473 : vector<8x32xf32>
    %476 = arith.divf %474, %475 : vector<8x32xf32>
    %477 = vector.extract_strided_slice %439 {offsets = [0, 64], sizes = [8, 32], strides = [1, 1]} : vector<8x128xf32> to vector<8x32xf32>
    %478 = math.tanh %477 : vector<8x32xf32>
    %479 = vector.extract_strided_slice %439 {offsets = [0, 96], sizes = [8, 32], strides = [1, 1]} : vector<8x128xf32> to vector<8x32xf32>
    %480 = arith.negf %479 : vector<8x32xf32>
    %481 = math.exp %480 : vector<8x32xf32>
    %cst_130 = arith.constant 1.000000e+00 : f32
    %482 = vector.broadcast %cst_130 : f32 to vector<8x32xf32>
    %483 = arith.addf %482, %481 : vector<8x32xf32>
    %484 = arith.divf %482, %483 : vector<8x32xf32>
    %485 = arith.mulf %476, %418 : vector<8x32xf32>
    %486 = arith.mulf %470, %478 : vector<8x32xf32>
    %487 = arith.addf %485, %486 : vector<8x32xf32>
    %488 = math.tanh %487 : vector<8x32xf32>
    %489 = arith.mulf %484, %488 : vector<8x32xf32>
    %490 = arith.index_cast %c6_i32 : i32 to index
    %c0_131 = arith.constant 0 : index
    %c0_132 = arith.constant 0 : index
    %491 = vector.load %arg10[%490, %c0_131, %c0_132] : memref<8x8x32xf32, #tpu.memory_space<vmem>>, vector<1x8x32xf32>
    %492 = vector.shape_cast %491 : vector<1x8x32xf32> to vector<8x32xf32>
    %493 = vector.shape_cast %464 : vector<8x32xf32> to vector<1x8x32xf32>
    tpu.vector_store %arg10[%490, %c0_131, %c0_132], %493 {strides = array<i32>} : memref<8x8x32xf32, #tpu.memory_space<vmem>>, vector<1x8x32xf32>,
    %494 = arith.index_cast %429 : i32 to index
    %c0_133 = arith.constant 0 : index
    %c0_134 = arith.constant 0 : index
    %495 = vector.load %arg11[%494, %c0_133, %c0_134] : memref<8x8x32xf32, #tpu.memory_space<vmem>>, vector<1x8x32xf32>
    %496 = vector.shape_cast %495 : vector<1x8x32xf32> to vector<8x32xf32>
    %497 = vector.shape_cast %489 : vector<8x32xf32> to vector<1x8x32xf32>
    tpu.vector_store %arg11[%494, %c0_133, %c0_134], %497 {strides = array<i32>} : memref<8x8x32xf32, #tpu.memory_space<vmem>>, vector<1x8x32xf32>,
    %c7_i32_135 = arith.constant 7 : i32
    %c7_i32_136 = arith.constant 7 : i32
    %498 = arith.subi %c7_i32_136, %c7_i32_135 : i32
    %499 = arith.index_cast %c7_i32_135 : i32 to index
    %c0_137 = arith.constant 0 : index
    %c0_138 = arith.constant 0 : index
    %500 = vector.load %arg8[%499, %c0_137, %c0_138] : memref<8x8x128xf32, #tpu.memory_space<vmem>>, vector<1x8x128xf32>
    %501 = vector.shape_cast %500 : vector<1x8x128xf32> to vector<8x128xf32>
    %cst_139 = arith.constant dense<0.000000e+00> : vector<8x128xf32>
    %502 = tpu.matmul %464, %12, %cst_139 {dimension_numbers = #tpu.dot_dimension_numbers<[1], [0], [0], [1], [0, 0, 1, 1], [], []>} : vector<8x32xf32>, vector<32x128xf32>, vector<8x128xf32> -> vector<8x128xf32>
    %503 = arith.addf %501, %502 : vector<8x128xf32>
    %504 = arith.index_cast %498 : i32 to index
    %c0_140 = arith.constant 0 : index
    %c0_141 = arith.constant 0 : index
    %505 = vector.load %arg9[%504, %c0_140, %c0_141] : memref<8x8x128xf32, #tpu.memory_space<vmem>>, vector<1x8x128xf32>
    %506 = vector.shape_cast %505 : vector<1x8x128xf32> to vector<8x128xf32>
    %cst_142 = arith.constant dense<0.000000e+00> : vector<8x128xf32>
    %507 = tpu.matmul %489, %13, %cst_142 {dimension_numbers = #tpu.dot_dimension_numbers<[1], [0], [0], [1], [0, 0, 1, 1], [], []>} : vector<8x32xf32>, vector<32x128xf32>, vector<8x128xf32> -> vector<8x128xf32>
    %508 = arith.addf %506, %507 : vector<8x128xf32>
    %509 = vector.extract_strided_slice %503 {offsets = [0, 0], sizes = [8, 32], strides = [1, 1]} : vector<8x128xf32> to vector<8x32xf32>
    %510 = arith.negf %509 : vector<8x32xf32>
    %511 = math.exp %510 : vector<8x32xf32>
    %cst_143 = arith.constant 1.000000e+00 : f32
    %512 = vector.broadcast %cst_143 : f32 to vector<8x32xf32>
    %513 = arith.addf %512, %511 : vector<8x32xf32>
    %514 = arith.divf %512, %513 : vector<8x32xf32>
    %515 = vector.extract_strided_slice %503 {offsets = [0, 32], sizes = [8, 32], strides = [1, 1]} : vector<8x128xf32> to vector<8x32xf32>
    %516 = arith.negf %515 : vector<8x32xf32>
    %517 = math.exp %516 : vector<8x32xf32>
    %cst_144 = arith.constant 1.000000e+00 : f32
    %518 = vector.broadcast %cst_144 : f32 to vector<8x32xf32>
    %519 = arith.addf %518, %517 : vector<8x32xf32>
    %520 = arith.divf %518, %519 : vector<8x32xf32>
    %521 = vector.extract_strided_slice %503 {offsets = [0, 64], sizes = [8, 32], strides = [1, 1]} : vector<8x128xf32> to vector<8x32xf32>
    %522 = math.tanh %521 : vector<8x32xf32>
    %523 = vector.extract_strided_slice %503 {offsets = [0, 96], sizes = [8, 32], strides = [1, 1]} : vector<8x128xf32> to vector<8x32xf32>
    %524 = arith.negf %523 : vector<8x32xf32>
    %525 = math.exp %524 : vector<8x32xf32>
    %cst_145 = arith.constant 1.000000e+00 : f32
    %526 = vector.broadcast %cst_145 : f32 to vector<8x32xf32>
    %527 = arith.addf %526, %525 : vector<8x32xf32>
    %528 = arith.divf %526, %527 : vector<8x32xf32>
    %529 = arith.mulf %520, %462 : vector<8x32xf32>
    %530 = arith.mulf %514, %522 : vector<8x32xf32>
    %531 = arith.addf %529, %530 : vector<8x32xf32>
    %532 = math.tanh %531 : vector<8x32xf32>
    %533 = arith.mulf %528, %532 : vector<8x32xf32>
    %534 = vector.extract_strided_slice %508 {offsets = [0, 0], sizes = [8, 32], strides = [1, 1]} : vector<8x128xf32> to vector<8x32xf32>
    %535 = arith.negf %534 : vector<8x32xf32>
    %536 = math.exp %535 : vector<8x32xf32>
    %cst_146 = arith.constant 1.000000e+00 : f32
    %537 = vector.broadcast %cst_146 : f32 to vector<8x32xf32>
    %538 = arith.addf %537, %536 : vector<8x32xf32>
    %539 = arith.divf %537, %538 : vector<8x32xf32>
    %540 = vector.extract_strided_slice %508 {offsets = [0, 32], sizes = [8, 32], strides = [1, 1]} : vector<8x128xf32> to vector<8x32xf32>
    %541 = arith.negf %540 : vector<8x32xf32>
    %542 = math.exp %541 : vector<8x32xf32>
    %cst_147 = arith.constant 1.000000e+00 : f32
    %543 = vector.broadcast %cst_147 : f32 to vector<8x32xf32>
    %544 = arith.addf %543, %542 : vector<8x32xf32>
    %545 = arith.divf %543, %544 : vector<8x32xf32>
    %546 = vector.extract_strided_slice %508 {offsets = [0, 64], sizes = [8, 32], strides = [1, 1]} : vector<8x128xf32> to vector<8x32xf32>
    %547 = math.tanh %546 : vector<8x32xf32>
    %548 = vector.extract_strided_slice %508 {offsets = [0, 96], sizes = [8, 32], strides = [1, 1]} : vector<8x128xf32> to vector<8x32xf32>
    %549 = arith.negf %548 : vector<8x32xf32>
    %550 = math.exp %549 : vector<8x32xf32>
    %cst_148 = arith.constant 1.000000e+00 : f32
    %551 = vector.broadcast %cst_148 : f32 to vector<8x32xf32>
    %552 = arith.addf %551, %550 : vector<8x32xf32>
    %553 = arith.divf %551, %552 : vector<8x32xf32>
    %554 = arith.mulf %545, %487 : vector<8x32xf32>
    %555 = arith.mulf %539, %547 : vector<8x32xf32>
    %556 = arith.addf %554, %555 : vector<8x32xf32>
    %557 = math.tanh %556 : vector<8x32xf32>
    %558 = arith.mulf %553, %557 : vector<8x32xf32>
    %559 = arith.index_cast %c7_i32_135 : i32 to index
    %c0_149 = arith.constant 0 : index
    %c0_150 = arith.constant 0 : index
    %560 = vector.load %arg10[%559, %c0_149, %c0_150] : memref<8x8x32xf32, #tpu.memory_space<vmem>>, vector<1x8x32xf32>
    %561 = vector.shape_cast %560 : vector<1x8x32xf32> to vector<8x32xf32>
    %562 = vector.shape_cast %533 : vector<8x32xf32> to vector<1x8x32xf32>
    tpu.vector_store %arg10[%559, %c0_149, %c0_150], %562 {strides = array<i32>} : memref<8x8x32xf32, #tpu.memory_space<vmem>>, vector<1x8x32xf32>,
    %563 = arith.index_cast %498 : i32 to index
    %c0_151 = arith.constant 0 : index
    %c0_152 = arith.constant 0 : index
    %564 = vector.load %arg11[%563, %c0_151, %c0_152] : memref<8x8x32xf32, #tpu.memory_space<vmem>>, vector<1x8x32xf32>
    %565 = vector.shape_cast %564 : vector<1x8x32xf32> to vector<8x32xf32>
    %566 = vector.shape_cast %558 : vector<8x32xf32> to vector<1x8x32xf32>
    tpu.vector_store %arg11[%563, %c0_151, %c0_152], %566 {strides = array<i32>} : memref<8x8x32xf32, #tpu.memory_space<vmem>>, vector<1x8x32xf32>,
    %c8_i32 = arith.constant 8 : i32
    %c0_153 = arith.constant 0 : index
    %c0_154 = arith.constant 0 : index
    %c0_155 = arith.constant 0 : index
    %567 = vector.load %arg10[%c0_153, %c0_154, %c0_155] : memref<8x8x32xf32, #tpu.memory_space<vmem>>, vector<8x8x32xf32>
    %c0_156 = arith.constant 0 : index
    %c0_157 = arith.constant 0 : index
    %c0_158 = arith.constant 0 : index
    %568 = vector.load %arg11[%c0_156, %c0_157, %c0_158] : memref<8x8x32xf32, #tpu.memory_space<vmem>>, vector<8x8x32xf32>
    %569 = tpu.concatenate %567, %568 in 2 : vector<8x8x32xf32>, vector<8x8x32xf32> -> vector<8x8x64xf32>
    %c0_159 = arith.constant 0 : index
    %c0_160 = arith.constant 0 : index
    %c0_161 = arith.constant 0 : index
    %570 = vector.load %arg5[%c0_159, %c0_160, %c0_161] : memref<8x8x64xf32, #tpu.memory_space<vmem>>, vector<8x8x64xf32>
    tpu.vector_store %arg5[%c0_159, %c0_160, %c0_161], %569 {strides = array<i32>} : memref<8x8x64xf32, #tpu.memory_space<vmem>>, vector<8x8x64xf32>,
    %c0_162 = arith.constant 0 : index
    %c0_163 = arith.constant 0 : index
    %c0_164 = arith.constant 0 : index
    %571 = vector.load %arg6[%c0_162, %c0_163, %c0_164] : memref<2x8x32xf32, #tpu.memory_space<vmem>>, vector<1x8x32xf32>
    %572 = vector.shape_cast %571 : vector<1x8x32xf32> to vector<8x32xf32>
    %573 = vector.shape_cast %533 : vector<8x32xf32> to vector<1x8x32xf32>
    tpu.vector_store %arg6[%c0_162, %c0_163, %c0_164], %573 {strides = array<i32>} : memref<2x8x32xf32, #tpu.memory_space<vmem>>, vector<1x8x32xf32>,
    %c1 = arith.constant 1 : index
    %c0_165 = arith.constant 0 : index
    %c0_166 = arith.constant 0 : index
    %574 = vector.load %arg6[%c1, %c0_165, %c0_166] : memref<2x8x32xf32, #tpu.memory_space<vmem>>, vector<1x8x32xf32>
    %575 = vector.shape_cast %574 : vector<1x8x32xf32> to vector<8x32xf32>
    %576 = vector.shape_cast %558 : vector<8x32xf32> to vector<1x8x32xf32>
    tpu.vector_store %arg6[%c1, %c0_165, %c0_166], %576 {strides = array<i32>} : memref<2x8x32xf32, #tpu.memory_space<vmem>>, vector<1x8x32xf32>,
    %c0_167 = arith.constant 0 : index
    %c0_168 = arith.constant 0 : index
    %c0_169 = arith.constant 0 : index
    %577 = vector.load %arg7[%c0_167, %c0_168, %c0_169] : memref<2x8x32xf32, #tpu.memory_space<vmem>>, vector<1x8x32xf32>
    %578 = vector.shape_cast %577 : vector<1x8x32xf32> to vector<8x32xf32>
    %579 = vector.shape_cast %531 : vector<8x32xf32> to vector<1x8x32xf32>
    tpu.vector_store %arg7[%c0_167, %c0_168, %c0_169], %579 {strides = array<i32>} : memref<2x8x32xf32, #tpu.memory_space<vmem>>, vector<1x8x32xf32>,
    %c1_170 = arith.constant 1 : index
    %c0_171 = arith.constant 0 : index
    %c0_172 = arith.constant 0 : index
    %580 = vector.load %arg7[%c1_170, %c0_171, %c0_172] : memref<2x8x32xf32, #tpu.memory_space<vmem>>, vector<1x8x32xf32>
    %581 = vector.shape_cast %580 : vector<1x8x32xf32> to vector<8x32xf32>
    %582 = vector.shape_cast %556 : vector<8x32xf32> to vector<1x8x32xf32>
    tpu.vector_store %arg7[%c1_170, %c0_171, %c0_172], %582 {strides = array<i32>} : memref<2x8x32xf32, #tpu.memory_space<vmem>>, vector<1x8x32xf32>,
    return
  }
}

module attributes {stable_mosaic.version = 11 : i64} {
  func.func @_bilstm_layer_kernel(%arg0: memref<8x8x16xf32, #tpu.memory_space<vmem>>, %arg1: memref<16x256xf32, #tpu.memory_space<vmem>>, %arg2: memref<32x128xf32, #tpu.memory_space<vmem>>, %arg3: memref<32x128xf32, #tpu.memory_space<vmem>>, %arg4: memref<1x256xf32, #tpu.memory_space<vmem>>, %arg5: memref<8x8x64xf32, #tpu.memory_space<vmem>>, %arg6: memref<2x8x32xf32, #tpu.memory_space<vmem>>, %arg7: memref<2x8x32xf32, #tpu.memory_space<vmem>>, %arg8: memref<8x8x128xf32, #tpu.memory_space<vmem>>, %arg9: memref<8x8x128xf32, #tpu.memory_space<vmem>>, %arg10: memref<8x8x32xf32, #tpu.memory_space<vmem>>, %arg11: memref<8x8x32xf32, #tpu.memory_space<vmem>>) attributes {dimension_semantics = [], scalar_prefetch = 0 : i64, scratch_operands = 4 : i64, tpu.core_type = #tpu.core_type<tc>} {
    %c0 = arith.constant 0 : index
    %c0_0 = arith.constant 0 : index
    %c0_1 = arith.constant 0 : index
    %0 = vector.load %arg0[%c0, %c0_0, %c0_1] : memref<8x8x16xf32, #tpu.memory_space<vmem>>, vector<8x8x16xf32>
    %1 = vector.shape_cast %0 : vector<8x8x16xf32> to vector<64x16xf32>
    %c0_2 = arith.constant 0 : index
    %c0_3 = arith.constant 0 : index
    %2 = vector.load %arg1[%c0_2, %c0_3] : memref<16x256xf32, #tpu.memory_space<vmem>>, vector<16x256xf32>
    %cst = arith.constant dense<0.000000e+00> : vector<64x256xf32>
    %3 = tpu.matmul %1, %2, %cst {dimension_numbers = #tpu.dot_dimension_numbers<[1], [0], [0], [1], [0, 0, 1, 1], [], []>} : vector<64x16xf32>, vector<16x256xf32>, vector<64x256xf32> -> vector<64x256xf32>
    %c0_4 = arith.constant 0 : index
    %c0_5 = arith.constant 0 : index
    %4 = vector.load %arg4[%c0_4, %c0_5] : memref<1x256xf32, #tpu.memory_space<vmem>>, vector<1x256xf32>
    %5 = vector.broadcast %4 : vector<1x256xf32> to vector<64x256xf32>
    %6 = arith.addf %3, %5 : vector<64x256xf32>
    %7 = vector.shape_cast %6 : vector<64x256xf32> to vector<8x8x256xf32>
    %8 = vector.extract_strided_slice %7 {offsets = [0, 0, 0], sizes = [8, 8, 128], strides = [1, 1, 1]} : vector<8x8x256xf32> to vector<8x8x128xf32>
    %c0_6 = arith.constant 0 : index
    %c0_7 = arith.constant 0 : index
    %c0_8 = arith.constant 0 : index
    %9 = vector.load %arg8[%c0_6, %c0_7, %c0_8] : memref<8x8x128xf32, #tpu.memory_space<vmem>>, vector<8x8x128xf32>
    tpu.vector_store %arg8[%c0_6, %c0_7, %c0_8], %8 {strides = array<i32>} : memref<8x8x128xf32, #tpu.memory_space<vmem>>, vector<8x8x128xf32>,
    %10 = vector.extract_strided_slice %7 {offsets = [0, 0, 128], sizes = [8, 8, 128], strides = [1, 1, 1]} : vector<8x8x256xf32> to vector<8x8x128xf32>
    %c0_9 = arith.constant 0 : index
    %c0_10 = arith.constant 0 : index
    %c0_11 = arith.constant 0 : index
    %11 = vector.load %arg9[%c0_9, %c0_10, %c0_11] : memref<8x8x128xf32, #tpu.memory_space<vmem>>, vector<8x8x128xf32>
    tpu.vector_store %arg9[%c0_9, %c0_10, %c0_11], %10 {strides = array<i32>} : memref<8x8x128xf32, #tpu.memory_space<vmem>>, vector<8x8x128xf32>,
    %c0_12 = arith.constant 0 : index
    %c0_13 = arith.constant 0 : index
    %12 = vector.load %arg2[%c0_12, %c0_13] : memref<32x128xf32, #tpu.memory_space<vmem>>, vector<32x128xf32>
    %c0_14 = arith.constant 0 : index
    %c0_15 = arith.constant 0 : index
    %13 = vector.load %arg3[%c0_14, %c0_15] : memref<32x128xf32, #tpu.memory_space<vmem>>, vector<32x128xf32>
    %cst_16 = arith.constant 0.000000e+00 : f32
    %14 = vector.broadcast %cst_16 : f32 to vector<8x32xf32>
    %c0_i32 = arith.constant 0 : i32
    %c7_i32 = arith.constant 7 : i32
    %15 = arith.subi %c7_i32, %c0_i32 : i32
    %16 = arith.index_cast %c0_i32 : i32 to index
    %c0_17 = arith.constant 0 : index
    %c0_18 = arith.constant 0 : index
    %17 = vector.load %arg8[%16, %c0_17, %c0_18] : memref<8x8x128xf32, #tpu.memory_space<vmem>>, vector<1x8x128xf32>
    %18 = vector.shape_cast %17 : vector<1x8x128xf32> to vector<8x128xf32>
    %cst_19 = arith.constant dense<0.000000e+00> : vector<8x128xf32>
    %19 = tpu.matmul %14, %12, %cst_19 {dimension_numbers = #tpu.dot_dimension_numbers<[1], [0], [0], [1], [0, 0, 1, 1], [], []>} : vector<8x32xf32>, vector<32x128xf32>, vector<8x128xf32> -> vector<8x128xf32>
    %20 = arith.addf %18, %19 : vector<8x128xf32>
    %21 = arith.index_cast %15 : i32 to index
    %c0_20 = arith.constant 0 : index
    %c0_21 = arith.constant 0 : index
    %22 = vector.load %arg9[%21, %c0_20, %c0_21] : memref<8x8x128xf32, #tpu.memory_space<vmem>>, vector<1x8x128xf32>
    %23 = vector.shape_cast %22 : vector<1x8x128xf32> to vector<8x128xf32>
    %cst_22 = arith.constant dense<0.000000e+00> : vector<8x128xf32>
    %24 = tpu.matmul %14, %13, %cst_22 {dimension_numbers = #tpu.dot_dimension_numbers<[1], [0], [0], [1], [0, 0, 1, 1], [], []>} : vector<8x32xf32>, vector<32x128xf32>, vector<8x128xf32> -> vector<8x128xf32>
    %25 = arith.addf %23, %24 : vector<8x128xf32>
    %26 = vector.extract_strided_slice %20 {offsets = [0, 0], sizes = [8, 32], strides = [1, 1]} : vector<8x128xf32> to vector<8x32xf32>
    %27 = arith.negf %26 : vector<8x32xf32>
    %28 = math.exp %27 : vector<8x32xf32>
    %cst_23 = arith.constant 1.000000e+00 : f32
    %29 = vector.broadcast %cst_23 : f32 to vector<8x32xf32>
    %30 = arith.addf %29, %28 : vector<8x32xf32>
    %31 = arith.divf %29, %30 : vector<8x32xf32>
    %32 = vector.extract_strided_slice %20 {offsets = [0, 32], sizes = [8, 32], strides = [1, 1]} : vector<8x128xf32> to vector<8x32xf32>
    %33 = arith.negf %32 : vector<8x32xf32>
    %34 = math.exp %33 : vector<8x32xf32>
    %cst_24 = arith.constant 1.000000e+00 : f32
    %35 = vector.broadcast %cst_24 : f32 to vector<8x32xf32>
    %36 = arith.addf %35, %34 : vector<8x32xf32>
    %37 = arith.divf %35, %36 : vector<8x32xf32>
    %38 = vector.extract_strided_slice %20 {offsets = [0, 64], sizes = [8, 32], strides = [1, 1]} : vector<8x128xf32> to vector<8x32xf32>
    %39 = math.tanh %38 : vector<8x32xf32>
    %40 = vector.extract_strided_slice %20 {offsets = [0, 96], sizes = [8, 32], strides = [1, 1]} : vector<8x128xf32> to vector<8x32xf32>
    %41 = arith.negf %40 : vector<8x32xf32>
    %42 = math.exp %41 : vector<8x32xf32>
    %cst_25 = arith.constant 1.000000e+00 : f32
    %43 = vector.broadcast %cst_25 : f32 to vector<8x32xf32>
    %44 = arith.addf %43, %42 : vector<8x32xf32>
    %45 = arith.divf %43, %44 : vector<8x32xf32>
    %46 = arith.mulf %37, %14 : vector<8x32xf32>
    %47 = arith.mulf %31, %39 : vector<8x32xf32>
    %48 = arith.addf %46, %47 : vector<8x32xf32>
    %49 = math.tanh %48 : vector<8x32xf32>
    %50 = arith.mulf %45, %49 : vector<8x32xf32>
    %51 = vector.extract_strided_slice %25 {offsets = [0, 0], sizes = [8, 32], strides = [1, 1]} : vector<8x128xf32> to vector<8x32xf32>
    %52 = arith.negf %51 : vector<8x32xf32>
    %53 = math.exp %52 : vector<8x32xf32>
    %cst_26 = arith.constant 1.000000e+00 : f32
    %54 = vector.broadcast %cst_26 : f32 to vector<8x32xf32>
    %55 = arith.addf %54, %53 : vector<8x32xf32>
    %56 = arith.divf %54, %55 : vector<8x32xf32>
    %57 = vector.extract_strided_slice %25 {offsets = [0, 32], sizes = [8, 32], strides = [1, 1]} : vector<8x128xf32> to vector<8x32xf32>
    %58 = arith.negf %57 : vector<8x32xf32>
    %59 = math.exp %58 : vector<8x32xf32>
    %cst_27 = arith.constant 1.000000e+00 : f32
    %60 = vector.broadcast %cst_27 : f32 to vector<8x32xf32>
    %61 = arith.addf %60, %59 : vector<8x32xf32>
    %62 = arith.divf %60, %61 : vector<8x32xf32>
    %63 = vector.extract_strided_slice %25 {offsets = [0, 64], sizes = [8, 32], strides = [1, 1]} : vector<8x128xf32> to vector<8x32xf32>
    %64 = math.tanh %63 : vector<8x32xf32>
    %65 = vector.extract_strided_slice %25 {offsets = [0, 96], sizes = [8, 32], strides = [1, 1]} : vector<8x128xf32> to vector<8x32xf32>
    %66 = arith.negf %65 : vector<8x32xf32>
    %67 = math.exp %66 : vector<8x32xf32>
    %cst_28 = arith.constant 1.000000e+00 : f32
    %68 = vector.broadcast %cst_28 : f32 to vector<8x32xf32>
    %69 = arith.addf %68, %67 : vector<8x32xf32>
    %70 = arith.divf %68, %69 : vector<8x32xf32>
    %71 = arith.mulf %62, %14 : vector<8x32xf32>
    %72 = arith.mulf %56, %64 : vector<8x32xf32>
    %73 = arith.addf %71, %72 : vector<8x32xf32>
    %74 = math.tanh %73 : vector<8x32xf32>
    %75 = arith.mulf %70, %74 : vector<8x32xf32>
    %76 = arith.index_cast %c0_i32 : i32 to index
    %c0_29 = arith.constant 0 : index
    %c0_30 = arith.constant 0 : index
    %77 = vector.load %arg10[%76, %c0_29, %c0_30] : memref<8x8x32xf32, #tpu.memory_space<vmem>>, vector<1x8x32xf32>
    %78 = vector.shape_cast %77 : vector<1x8x32xf32> to vector<8x32xf32>
    %79 = vector.shape_cast %50 : vector<8x32xf32> to vector<1x8x32xf32>
    tpu.vector_store %arg10[%76, %c0_29, %c0_30], %79 {strides = array<i32>} : memref<8x8x32xf32, #tpu.memory_space<vmem>>, vector<1x8x32xf32>,
    %80 = arith.index_cast %15 : i32 to index
    %c0_31 = arith.constant 0 : index
    %c0_32 = arith.constant 0 : index
    %81 = vector.load %arg11[%80, %c0_31, %c0_32] : memref<8x8x32xf32, #tpu.memory_space<vmem>>, vector<1x8x32xf32>
    %82 = vector.shape_cast %81 : vector<1x8x32xf32> to vector<8x32xf32>
    %83 = vector.shape_cast %75 : vector<8x32xf32> to vector<1x8x32xf32>
    tpu.vector_store %arg11[%80, %c0_31, %c0_32], %83 {strides = array<i32>} : memref<8x8x32xf32, #tpu.memory_space<vmem>>, vector<1x8x32xf32>,
    %c1_i32 = arith.constant 1 : i32
    %c7_i32_33 = arith.constant 7 : i32
    %84 = arith.subi %c7_i32_33, %c1_i32 : i32
    %85 = arith.index_cast %c1_i32 : i32 to index
    %c0_34 = arith.constant 0 : index
    %c0_35 = arith.constant 0 : index
    %86 = vector.load %arg8[%85, %c0_34, %c0_35] : memref<8x8x128xf32, #tpu.memory_space<vmem>>, vector<1x8x128xf32>
    %87 = vector.shape_cast %86 : vector<1x8x128xf32> to vector<8x128xf32>
    %cst_36 = arith.constant dense<0.000000e+00> : vector<8x128xf32>
    %88 = tpu.matmul %50, %12, %cst_36 {dimension_numbers = #tpu.dot_dimension_numbers<[1], [0], [0], [1], [0, 0, 1, 1], [], []>} : vector<8x32xf32>, vector<32x128xf32>, vector<8x128xf32> -> vector<8x128xf32>
    %89 = arith.addf %87, %88 : vector<8x128xf32>
    %90 = arith.index_cast %84 : i32 to index
    %c0_37 = arith.constant 0 : index
    %c0_38 = arith.constant 0 : index
    %91 = vector.load %arg9[%90, %c0_37, %c0_38] : memref<8x8x128xf32, #tpu.memory_space<vmem>>, vector<1x8x128xf32>
    %92 = vector.shape_cast %91 : vector<1x8x128xf32> to vector<8x128xf32>
    %cst_39 = arith.constant dense<0.000000e+00> : vector<8x128xf32>
    %93 = tpu.matmul %75, %13, %cst_39 {dimension_numbers = #tpu.dot_dimension_numbers<[1], [0], [0], [1], [0, 0, 1, 1], [], []>} : vector<8x32xf32>, vector<32x128xf32>, vector<8x128xf32> -> vector<8x128xf32>
    %94 = arith.addf %92, %93 : vector<8x128xf32>
    %95 = vector.extract_strided_slice %89 {offsets = [0, 0], sizes = [8, 32], strides = [1, 1]} : vector<8x128xf32> to vector<8x32xf32>
    %96 = arith.negf %95 : vector<8x32xf32>
    %97 = math.exp %96 : vector<8x32xf32>
    %cst_40 = arith.constant 1.000000e+00 : f32
    %98 = vector.broadcast %cst_40 : f32 to vector<8x32xf32>
    %99 = arith.addf %98, %97 : vector<8x32xf32>
    %100 = arith.divf %98, %99 : vector<8x32xf32>
    %101 = vector.extract_strided_slice %89 {offsets = [0, 32], sizes = [8, 32], strides = [1, 1]} : vector<8x128xf32> to vector<8x32xf32>
    %102 = arith.negf %101 : vector<8x32xf32>
    %103 = math.exp %102 : vector<8x32xf32>
    %cst_41 = arith.constant 1.000000e+00 : f32
    %104 = vector.broadcast %cst_41 : f32 to vector<8x32xf32>
    %105 = arith.addf %104, %103 : vector<8x32xf32>
    %106 = arith.divf %104, %105 : vector<8x32xf32>
    %107 = vector.extract_strided_slice %89 {offsets = [0, 64], sizes = [8, 32], strides = [1, 1]} : vector<8x128xf32> to vector<8x32xf32>
    %108 = math.tanh %107 : vector<8x32xf32>
    %109 = vector.extract_strided_slice %89 {offsets = [0, 96], sizes = [8, 32], strides = [1, 1]} : vector<8x128xf32> to vector<8x32xf32>
    %110 = arith.negf %109 : vector<8x32xf32>
    %111 = math.exp %110 : vector<8x32xf32>
    %cst_42 = arith.constant 1.000000e+00 : f32
    %112 = vector.broadcast %cst_42 : f32 to vector<8x32xf32>
    %113 = arith.addf %112, %111 : vector<8x32xf32>
    %114 = arith.divf %112, %113 : vector<8x32xf32>
    %115 = arith.mulf %106, %48 : vector<8x32xf32>
    %116 = arith.mulf %100, %108 : vector<8x32xf32>
    %117 = arith.addf %115, %116 : vector<8x32xf32>
    %118 = math.tanh %117 : vector<8x32xf32>
    %119 = arith.mulf %114, %118 : vector<8x32xf32>
    %120 = vector.extract_strided_slice %94 {offsets = [0, 0], sizes = [8, 32], strides = [1, 1]} : vector<8x128xf32> to vector<8x32xf32>
    %121 = arith.negf %120 : vector<8x32xf32>
    %122 = math.exp %121 : vector<8x32xf32>
    %cst_43 = arith.constant 1.000000e+00 : f32
    %123 = vector.broadcast %cst_43 : f32 to vector<8x32xf32>
    %124 = arith.addf %123, %122 : vector<8x32xf32>
    %125 = arith.divf %123, %124 : vector<8x32xf32>
    %126 = vector.extract_strided_slice %94 {offsets = [0, 32], sizes = [8, 32], strides = [1, 1]} : vector<8x128xf32> to vector<8x32xf32>
    %127 = arith.negf %126 : vector<8x32xf32>
    %128 = math.exp %127 : vector<8x32xf32>
    %cst_44 = arith.constant 1.000000e+00 : f32
    %129 = vector.broadcast %cst_44 : f32 to vector<8x32xf32>
    %130 = arith.addf %129, %128 : vector<8x32xf32>
    %131 = arith.divf %129, %130 : vector<8x32xf32>
    %132 = vector.extract_strided_slice %94 {offsets = [0, 64], sizes = [8, 32], strides = [1, 1]} : vector<8x128xf32> to vector<8x32xf32>
    %133 = math.tanh %132 : vector<8x32xf32>
    %134 = vector.extract_strided_slice %94 {offsets = [0, 96], sizes = [8, 32], strides = [1, 1]} : vector<8x128xf32> to vector<8x32xf32>
    %135 = arith.negf %134 : vector<8x32xf32>
    %136 = math.exp %135 : vector<8x32xf32>
    %cst_45 = arith.constant 1.000000e+00 : f32
    %137 = vector.broadcast %cst_45 : f32 to vector<8x32xf32>
    %138 = arith.addf %137, %136 : vector<8x32xf32>
    %139 = arith.divf %137, %138 : vector<8x32xf32>
    %140 = arith.mulf %131, %73 : vector<8x32xf32>
    %141 = arith.mulf %125, %133 : vector<8x32xf32>
    %142 = arith.addf %140, %141 : vector<8x32xf32>
    %143 = math.tanh %142 : vector<8x32xf32>
    %144 = arith.mulf %139, %143 : vector<8x32xf32>
    %145 = arith.index_cast %c1_i32 : i32 to index
    %c0_46 = arith.constant 0 : index
    %c0_47 = arith.constant 0 : index
    %146 = vector.load %arg10[%145, %c0_46, %c0_47] : memref<8x8x32xf32, #tpu.memory_space<vmem>>, vector<1x8x32xf32>
    %147 = vector.shape_cast %146 : vector<1x8x32xf32> to vector<8x32xf32>
    %148 = vector.shape_cast %119 : vector<8x32xf32> to vector<1x8x32xf32>
    tpu.vector_store %arg10[%145, %c0_46, %c0_47], %148 {strides = array<i32>} : memref<8x8x32xf32, #tpu.memory_space<vmem>>, vector<1x8x32xf32>,
    %149 = arith.index_cast %84 : i32 to index
    %c0_48 = arith.constant 0 : index
    %c0_49 = arith.constant 0 : index
    %150 = vector.load %arg11[%149, %c0_48, %c0_49] : memref<8x8x32xf32, #tpu.memory_space<vmem>>, vector<1x8x32xf32>
    %151 = vector.shape_cast %150 : vector<1x8x32xf32> to vector<8x32xf32>
    %152 = vector.shape_cast %144 : vector<8x32xf32> to vector<1x8x32xf32>
    tpu.vector_store %arg11[%149, %c0_48, %c0_49], %152 {strides = array<i32>} : memref<8x8x32xf32, #tpu.memory_space<vmem>>, vector<1x8x32xf32>,
    %c2_i32 = arith.constant 2 : i32
    %c7_i32_50 = arith.constant 7 : i32
    %153 = arith.subi %c7_i32_50, %c2_i32 : i32
    %154 = arith.index_cast %c2_i32 : i32 to index
    %c0_51 = arith.constant 0 : index
    %c0_52 = arith.constant 0 : index
    %155 = vector.load %arg8[%154, %c0_51, %c0_52] : memref<8x8x128xf32, #tpu.memory_space<vmem>>, vector<1x8x128xf32>
    %156 = vector.shape_cast %155 : vector<1x8x128xf32> to vector<8x128xf32>
    %cst_53 = arith.constant dense<0.000000e+00> : vector<8x128xf32>
    %157 = tpu.matmul %119, %12, %cst_53 {dimension_numbers = #tpu.dot_dimension_numbers<[1], [0], [0], [1], [0, 0, 1, 1], [], []>} : vector<8x32xf32>, vector<32x128xf32>, vector<8x128xf32> -> vector<8x128xf32>
    %158 = arith.addf %156, %157 : vector<8x128xf32>
    %159 = arith.index_cast %153 : i32 to index
    %c0_54 = arith.constant 0 : index
    %c0_55 = arith.constant 0 : index
    %160 = vector.load %arg9[%159, %c0_54, %c0_55] : memref<8x8x128xf32, #tpu.memory_space<vmem>>, vector<1x8x128xf32>
    %161 = vector.shape_cast %160 : vector<1x8x128xf32> to vector<8x128xf32>
    %cst_56 = arith.constant dense<0.000000e+00> : vector<8x128xf32>
    %162 = tpu.matmul %144, %13, %cst_56 {dimension_numbers = #tpu.dot_dimension_numbers<[1], [0], [0], [1], [0, 0, 1, 1], [], []>} : vector<8x32xf32>, vector<32x128xf32>, vector<8x128xf32> -> vector<8x128xf32>
    %163 = arith.addf %161, %162 : vector<8x128xf32>
    %164 = vector.extract_strided_slice %158 {offsets = [0, 0], sizes = [8, 32], strides = [1, 1]} : vector<8x128xf32> to vector<8x32xf32>
    %165 = arith.negf %164 : vector<8x32xf32>
    %166 = math.exp %165 : vector<8x32xf32>
    %cst_57 = arith.constant 1.000000e+00 : f32
    %167 = vector.broadcast %cst_57 : f32 to vector<8x32xf32>
    %168 = arith.addf %167, %166 : vector<8x32xf32>
    %169 = arith.divf %167, %168 : vector<8x32xf32>
    %170 = vector.extract_strided_slice %158 {offsets = [0, 32], sizes = [8, 32], strides = [1, 1]} : vector<8x128xf32> to vector<8x32xf32>
    %171 = arith.negf %170 : vector<8x32xf32>
    %172 = math.exp %171 : vector<8x32xf32>
    %cst_58 = arith.constant 1.000000e+00 : f32
    %173 = vector.broadcast %cst_58 : f32 to vector<8x32xf32>
    %174 = arith.addf %173, %172 : vector<8x32xf32>
    %175 = arith.divf %173, %174 : vector<8x32xf32>
    %176 = vector.extract_strided_slice %158 {offsets = [0, 64], sizes = [8, 32], strides = [1, 1]} : vector<8x128xf32> to vector<8x32xf32>
    %177 = math.tanh %176 : vector<8x32xf32>
    %178 = vector.extract_strided_slice %158 {offsets = [0, 96], sizes = [8, 32], strides = [1, 1]} : vector<8x128xf32> to vector<8x32xf32>
    %179 = arith.negf %178 : vector<8x32xf32>
    %180 = math.exp %179 : vector<8x32xf32>
    %cst_59 = arith.constant 1.000000e+00 : f32
    %181 = vector.broadcast %cst_59 : f32 to vector<8x32xf32>
    %182 = arith.addf %181, %180 : vector<8x32xf32>
    %183 = arith.divf %181, %182 : vector<8x32xf32>
    %184 = arith.mulf %175, %117 : vector<8x32xf32>
    %185 = arith.mulf %169, %177 : vector<8x32xf32>
    %186 = arith.addf %184, %185 : vector<8x32xf32>
    %187 = math.tanh %186 : vector<8x32xf32>
    %188 = arith.mulf %183, %187 : vector<8x32xf32>
    %189 = vector.extract_strided_slice %163 {offsets = [0, 0], sizes = [8, 32], strides = [1, 1]} : vector<8x128xf32> to vector<8x32xf32>
    %190 = arith.negf %189 : vector<8x32xf32>
    %191 = math.exp %190 : vector<8x32xf32>
    %cst_60 = arith.constant 1.000000e+00 : f32
    %192 = vector.broadcast %cst_60 : f32 to vector<8x32xf32>
    %193 = arith.addf %192, %191 : vector<8x32xf32>
    %194 = arith.divf %192, %193 : vector<8x32xf32>
    %195 = vector.extract_strided_slice %163 {offsets = [0, 32], sizes = [8, 32], strides = [1, 1]} : vector<8x128xf32> to vector<8x32xf32>
    %196 = arith.negf %195 : vector<8x32xf32>
    %197 = math.exp %196 : vector<8x32xf32>
    %cst_61 = arith.constant 1.000000e+00 : f32
    %198 = vector.broadcast %cst_61 : f32 to vector<8x32xf32>
    %199 = arith.addf %198, %197 : vector<8x32xf32>
    %200 = arith.divf %198, %199 : vector<8x32xf32>
    %201 = vector.extract_strided_slice %163 {offsets = [0, 64], sizes = [8, 32], strides = [1, 1]} : vector<8x128xf32> to vector<8x32xf32>
    %202 = math.tanh %201 : vector<8x32xf32>
    %203 = vector.extract_strided_slice %163 {offsets = [0, 96], sizes = [8, 32], strides = [1, 1]} : vector<8x128xf32> to vector<8x32xf32>
    %204 = arith.negf %203 : vector<8x32xf32>
    %205 = math.exp %204 : vector<8x32xf32>
    %cst_62 = arith.constant 1.000000e+00 : f32
    %206 = vector.broadcast %cst_62 : f32 to vector<8x32xf32>
    %207 = arith.addf %206, %205 : vector<8x32xf32>
    %208 = arith.divf %206, %207 : vector<8x32xf32>
    %209 = arith.mulf %200, %142 : vector<8x32xf32>
    %210 = arith.mulf %194, %202 : vector<8x32xf32>
    %211 = arith.addf %209, %210 : vector<8x32xf32>
    %212 = math.tanh %211 : vector<8x32xf32>
    %213 = arith.mulf %208, %212 : vector<8x32xf32>
    %214 = arith.index_cast %c2_i32 : i32 to index
    %c0_63 = arith.constant 0 : index
    %c0_64 = arith.constant 0 : index
    %215 = vector.load %arg10[%214, %c0_63, %c0_64] : memref<8x8x32xf32, #tpu.memory_space<vmem>>, vector<1x8x32xf32>
    %216 = vector.shape_cast %215 : vector<1x8x32xf32> to vector<8x32xf32>
    %217 = vector.shape_cast %188 : vector<8x32xf32> to vector<1x8x32xf32>
    tpu.vector_store %arg10[%214, %c0_63, %c0_64], %217 {strides = array<i32>} : memref<8x8x32xf32, #tpu.memory_space<vmem>>, vector<1x8x32xf32>,
    %218 = arith.index_cast %153 : i32 to index
    %c0_65 = arith.constant 0 : index
    %c0_66 = arith.constant 0 : index
    %219 = vector.load %arg11[%218, %c0_65, %c0_66] : memref<8x8x32xf32, #tpu.memory_space<vmem>>, vector<1x8x32xf32>
    %220 = vector.shape_cast %219 : vector<1x8x32xf32> to vector<8x32xf32>
    %221 = vector.shape_cast %213 : vector<8x32xf32> to vector<1x8x32xf32>
    tpu.vector_store %arg11[%218, %c0_65, %c0_66], %221 {strides = array<i32>} : memref<8x8x32xf32, #tpu.memory_space<vmem>>, vector<1x8x32xf32>,
    %c3_i32 = arith.constant 3 : i32
    %c7_i32_67 = arith.constant 7 : i32
    %222 = arith.subi %c7_i32_67, %c3_i32 : i32
    %223 = arith.index_cast %c3_i32 : i32 to index
    %c0_68 = arith.constant 0 : index
    %c0_69 = arith.constant 0 : index
    %224 = vector.load %arg8[%223, %c0_68, %c0_69] : memref<8x8x128xf32, #tpu.memory_space<vmem>>, vector<1x8x128xf32>
    %225 = vector.shape_cast %224 : vector<1x8x128xf32> to vector<8x128xf32>
    %cst_70 = arith.constant dense<0.000000e+00> : vector<8x128xf32>
    %226 = tpu.matmul %188, %12, %cst_70 {dimension_numbers = #tpu.dot_dimension_numbers<[1], [0], [0], [1], [0, 0, 1, 1], [], []>} : vector<8x32xf32>, vector<32x128xf32>, vector<8x128xf32> -> vector<8x128xf32>
    %227 = arith.addf %225, %226 : vector<8x128xf32>
    %228 = arith.index_cast %222 : i32 to index
    %c0_71 = arith.constant 0 : index
    %c0_72 = arith.constant 0 : index
    %229 = vector.load %arg9[%228, %c0_71, %c0_72] : memref<8x8x128xf32, #tpu.memory_space<vmem>>, vector<1x8x128xf32>
    %230 = vector.shape_cast %229 : vector<1x8x128xf32> to vector<8x128xf32>
    %cst_73 = arith.constant dense<0.000000e+00> : vector<8x128xf32>
    %231 = tpu.matmul %213, %13, %cst_73 {dimension_numbers = #tpu.dot_dimension_numbers<[1], [0], [0], [1], [0, 0, 1, 1], [], []>} : vector<8x32xf32>, vector<32x128xf32>, vector<8x128xf32> -> vector<8x128xf32>
    %232 = arith.addf %230, %231 : vector<8x128xf32>
    %233 = vector.extract_strided_slice %227 {offsets = [0, 0], sizes = [8, 32], strides = [1, 1]} : vector<8x128xf32> to vector<8x32xf32>
    %234 = arith.negf %233 : vector<8x32xf32>
    %235 = math.exp %234 : vector<8x32xf32>
    %cst_74 = arith.constant 1.000000e+00 : f32
    %236 = vector.broadcast %cst_74 : f32 to vector<8x32xf32>
    %237 = arith.addf %236, %235 : vector<8x32xf32>
    %238 = arith.divf %236, %237 : vector<8x32xf32>
    %239 = vector.extract_strided_slice %227 {offsets = [0, 32], sizes = [8, 32], strides = [1, 1]} : vector<8x128xf32> to vector<8x32xf32>
    %240 = arith.negf %239 : vector<8x32xf32>
    %241 = math.exp %240 : vector<8x32xf32>
    %cst_75 = arith.constant 1.000000e+00 : f32
    %242 = vector.broadcast %cst_75 : f32 to vector<8x32xf32>
    %243 = arith.addf %242, %241 : vector<8x32xf32>
    %244 = arith.divf %242, %243 : vector<8x32xf32>
    %245 = vector.extract_strided_slice %227 {offsets = [0, 64], sizes = [8, 32], strides = [1, 1]} : vector<8x128xf32> to vector<8x32xf32>
    %246 = math.tanh %245 : vector<8x32xf32>
    %247 = vector.extract_strided_slice %227 {offsets = [0, 96], sizes = [8, 32], strides = [1, 1]} : vector<8x128xf32> to vector<8x32xf32>
    %248 = arith.negf %247 : vector<8x32xf32>
    %249 = math.exp %248 : vector<8x32xf32>
    %cst_76 = arith.constant 1.000000e+00 : f32
    %250 = vector.broadcast %cst_76 : f32 to vector<8x32xf32>
    %251 = arith.addf %250, %249 : vector<8x32xf32>
    %252 = arith.divf %250, %251 : vector<8x32xf32>
    %253 = arith.mulf %244, %186 : vector<8x32xf32>
    %254 = arith.mulf %238, %246 : vector<8x32xf32>
    %255 = arith.addf %253, %254 : vector<8x32xf32>
    %256 = math.tanh %255 : vector<8x32xf32>
    %257 = arith.mulf %252, %256 : vector<8x32xf32>
    %258 = vector.extract_strided_slice %232 {offsets = [0, 0], sizes = [8, 32], strides = [1, 1]} : vector<8x128xf32> to vector<8x32xf32>
    %259 = arith.negf %258 : vector<8x32xf32>
    %260 = math.exp %259 : vector<8x32xf32>
    %cst_77 = arith.constant 1.000000e+00 : f32
    %261 = vector.broadcast %cst_77 : f32 to vector<8x32xf32>
    %262 = arith.addf %261, %260 : vector<8x32xf32>
    %263 = arith.divf %261, %262 : vector<8x32xf32>
    %264 = vector.extract_strided_slice %232 {offsets = [0, 32], sizes = [8, 32], strides = [1, 1]} : vector<8x128xf32> to vector<8x32xf32>
    %265 = arith.negf %264 : vector<8x32xf32>
    %266 = math.exp %265 : vector<8x32xf32>
    %cst_78 = arith.constant 1.000000e+00 : f32
    %267 = vector.broadcast %cst_78 : f32 to vector<8x32xf32>
    %268 = arith.addf %267, %266 : vector<8x32xf32>
    %269 = arith.divf %267, %268 : vector<8x32xf32>
    %270 = vector.extract_strided_slice %232 {offsets = [0, 64], sizes = [8, 32], strides = [1, 1]} : vector<8x128xf32> to vector<8x32xf32>
    %271 = math.tanh %270 : vector<8x32xf32>
    %272 = vector.extract_strided_slice %232 {offsets = [0, 96], sizes = [8, 32], strides = [1, 1]} : vector<8x128xf32> to vector<8x32xf32>
    %273 = arith.negf %272 : vector<8x32xf32>
    %274 = math.exp %273 : vector<8x32xf32>
    %cst_79 = arith.constant 1.000000e+00 : f32
    %275 = vector.broadcast %cst_79 : f32 to vector<8x32xf32>
    %276 = arith.addf %275, %274 : vector<8x32xf32>
    %277 = arith.divf %275, %276 : vector<8x32xf32>
    %278 = arith.mulf %269, %211 : vector<8x32xf32>
    %279 = arith.mulf %263, %271 : vector<8x32xf32>
    %280 = arith.addf %278, %279 : vector<8x32xf32>
    %281 = math.tanh %280 : vector<8x32xf32>
    %282 = arith.mulf %277, %281 : vector<8x32xf32>
    %283 = arith.index_cast %c3_i32 : i32 to index
    %c0_80 = arith.constant 0 : index
    %c0_81 = arith.constant 0 : index
    %284 = vector.load %arg10[%283, %c0_80, %c0_81] : memref<8x8x32xf32, #tpu.memory_space<vmem>>, vector<1x8x32xf32>
    %285 = vector.shape_cast %284 : vector<1x8x32xf32> to vector<8x32xf32>
    %286 = vector.shape_cast %257 : vector<8x32xf32> to vector<1x8x32xf32>
    tpu.vector_store %arg10[%283, %c0_80, %c0_81], %286 {strides = array<i32>} : memref<8x8x32xf32, #tpu.memory_space<vmem>>, vector<1x8x32xf32>,
    %287 = arith.index_cast %222 : i32 to index
    %c0_82 = arith.constant 0 : index
    %c0_83 = arith.constant 0 : index
    %288 = vector.load %arg11[%287, %c0_82, %c0_83] : memref<8x8x32xf32, #tpu.memory_space<vmem>>, vector<1x8x32xf32>
    %289 = vector.shape_cast %288 : vector<1x8x32xf32> to vector<8x32xf32>
    %290 = vector.shape_cast %282 : vector<8x32xf32> to vector<1x8x32xf32>
    tpu.vector_store %arg11[%287, %c0_82, %c0_83], %290 {strides = array<i32>} : memref<8x8x32xf32, #tpu.memory_space<vmem>>, vector<1x8x32xf32>,
    %c4_i32 = arith.constant 4 : i32
    %c7_i32_84 = arith.constant 7 : i32
    %291 = arith.subi %c7_i32_84, %c4_i32 : i32
    %292 = arith.index_cast %c4_i32 : i32 to index
    %c0_85 = arith.constant 0 : index
    %c0_86 = arith.constant 0 : index
    %293 = vector.load %arg8[%292, %c0_85, %c0_86] : memref<8x8x128xf32, #tpu.memory_space<vmem>>, vector<1x8x128xf32>
    %294 = vector.shape_cast %293 : vector<1x8x128xf32> to vector<8x128xf32>
    %cst_87 = arith.constant dense<0.000000e+00> : vector<8x128xf32>
    %295 = tpu.matmul %257, %12, %cst_87 {dimension_numbers = #tpu.dot_dimension_numbers<[1], [0], [0], [1], [0, 0, 1, 1], [], []>} : vector<8x32xf32>, vector<32x128xf32>, vector<8x128xf32> -> vector<8x128xf32>
    %296 = arith.addf %294, %295 : vector<8x128xf32>
    %297 = arith.index_cast %291 : i32 to index
    %c0_88 = arith.constant 0 : index
    %c0_89 = arith.constant 0 : index
    %298 = vector.load %arg9[%297, %c0_88, %c0_89] : memref<8x8x128xf32, #tpu.memory_space<vmem>>, vector<1x8x128xf32>
    %299 = vector.shape_cast %298 : vector<1x8x128xf32> to vector<8x128xf32>
    %cst_90 = arith.constant dense<0.000000e+00> : vector<8x128xf32>
    %300 = tpu.matmul %282, %13, %cst_90 {dimension_numbers = #tpu.dot_dimension_numbers<[1], [0], [0], [1], [0, 0, 1, 1], [], []>} : vector<8x32xf32>, vector<32x128xf32>, vector<8x128xf32> -> vector<8x128xf32>
    %301 = arith.addf %299, %300 : vector<8x128xf32>
    %302 = vector.extract_strided_slice %296 {offsets = [0, 0], sizes = [8, 32], strides = [1, 1]} : vector<8x128xf32> to vector<8x32xf32>
    %303 = arith.negf %302 : vector<8x32xf32>
    %304 = math.exp %303 : vector<8x32xf32>
    %cst_91 = arith.constant 1.000000e+00 : f32
    %305 = vector.broadcast %cst_91 : f32 to vector<8x32xf32>
    %306 = arith.addf %305, %304 : vector<8x32xf32>
    %307 = arith.divf %305, %306 : vector<8x32xf32>
    %308 = vector.extract_strided_slice %296 {offsets = [0, 32], sizes = [8, 32], strides = [1, 1]} : vector<8x128xf32> to vector<8x32xf32>
    %309 = arith.negf %308 : vector<8x32xf32>
    %310 = math.exp %309 : vector<8x32xf32>
    %cst_92 = arith.constant 1.000000e+00 : f32
    %311 = vector.broadcast %cst_92 : f32 to vector<8x32xf32>
    %312 = arith.addf %311, %310 : vector<8x32xf32>
    %313 = arith.divf %311, %312 : vector<8x32xf32>
    %314 = vector.extract_strided_slice %296 {offsets = [0, 64], sizes = [8, 32], strides = [1, 1]} : vector<8x128xf32> to vector<8x32xf32>
    %315 = math.tanh %314 : vector<8x32xf32>
    %316 = vector.extract_strided_slice %296 {offsets = [0, 96], sizes = [8, 32], strides = [1, 1]} : vector<8x128xf32> to vector<8x32xf32>
    %317 = arith.negf %316 : vector<8x32xf32>
    %318 = math.exp %317 : vector<8x32xf32>
    %cst_93 = arith.constant 1.000000e+00 : f32
    %319 = vector.broadcast %cst_93 : f32 to vector<8x32xf32>
    %320 = arith.addf %319, %318 : vector<8x32xf32>
    %321 = arith.divf %319, %320 : vector<8x32xf32>
    %322 = arith.mulf %313, %255 : vector<8x32xf32>
    %323 = arith.mulf %307, %315 : vector<8x32xf32>
    %324 = arith.addf %322, %323 : vector<8x32xf32>
    %325 = math.tanh %324 : vector<8x32xf32>
    %326 = arith.mulf %321, %325 : vector<8x32xf32>
    %327 = vector.extract_strided_slice %301 {offsets = [0, 0], sizes = [8, 32], strides = [1, 1]} : vector<8x128xf32> to vector<8x32xf32>
    %328 = arith.negf %327 : vector<8x32xf32>
    %329 = math.exp %328 : vector<8x32xf32>
    %cst_94 = arith.constant 1.000000e+00 : f32
    %330 = vector.broadcast %cst_94 : f32 to vector<8x32xf32>
    %331 = arith.addf %330, %329 : vector<8x32xf32>
    %332 = arith.divf %330, %331 : vector<8x32xf32>
    %333 = vector.extract_strided_slice %301 {offsets = [0, 32], sizes = [8, 32], strides = [1, 1]} : vector<8x128xf32> to vector<8x32xf32>
    %334 = arith.negf %333 : vector<8x32xf32>
    %335 = math.exp %334 : vector<8x32xf32>
    %cst_95 = arith.constant 1.000000e+00 : f32
    %336 = vector.broadcast %cst_95 : f32 to vector<8x32xf32>
    %337 = arith.addf %336, %335 : vector<8x32xf32>
    %338 = arith.divf %336, %337 : vector<8x32xf32>
    %339 = vector.extract_strided_slice %301 {offsets = [0, 64], sizes = [8, 32], strides = [1, 1]} : vector<8x128xf32> to vector<8x32xf32>
    %340 = math.tanh %339 : vector<8x32xf32>
    %341 = vector.extract_strided_slice %301 {offsets = [0, 96], sizes = [8, 32], strides = [1, 1]} : vector<8x128xf32> to vector<8x32xf32>
    %342 = arith.negf %341 : vector<8x32xf32>
    %343 = math.exp %342 : vector<8x32xf32>
    %cst_96 = arith.constant 1.000000e+00 : f32
    %344 = vector.broadcast %cst_96 : f32 to vector<8x32xf32>
    %345 = arith.addf %344, %343 : vector<8x32xf32>
    %346 = arith.divf %344, %345 : vector<8x32xf32>
    %347 = arith.mulf %338, %280 : vector<8x32xf32>
    %348 = arith.mulf %332, %340 : vector<8x32xf32>
    %349 = arith.addf %347, %348 : vector<8x32xf32>
    %350 = math.tanh %349 : vector<8x32xf32>
    %351 = arith.mulf %346, %350 : vector<8x32xf32>
    %352 = arith.index_cast %c4_i32 : i32 to index
    %c0_97 = arith.constant 0 : index
    %c0_98 = arith.constant 0 : index
    %353 = vector.load %arg10[%352, %c0_97, %c0_98] : memref<8x8x32xf32, #tpu.memory_space<vmem>>, vector<1x8x32xf32>
    %354 = vector.shape_cast %353 : vector<1x8x32xf32> to vector<8x32xf32>
    %355 = vector.shape_cast %326 : vector<8x32xf32> to vector<1x8x32xf32>
    tpu.vector_store %arg10[%352, %c0_97, %c0_98], %355 {strides = array<i32>} : memref<8x8x32xf32, #tpu.memory_space<vmem>>, vector<1x8x32xf32>,
    %356 = arith.index_cast %291 : i32 to index
    %c0_99 = arith.constant 0 : index
    %c0_100 = arith.constant 0 : index
    %357 = vector.load %arg11[%356, %c0_99, %c0_100] : memref<8x8x32xf32, #tpu.memory_space<vmem>>, vector<1x8x32xf32>
    %358 = vector.shape_cast %357 : vector<1x8x32xf32> to vector<8x32xf32>
    %359 = vector.shape_cast %351 : vector<8x32xf32> to vector<1x8x32xf32>
    tpu.vector_store %arg11[%356, %c0_99, %c0_100], %359 {strides = array<i32>} : memref<8x8x32xf32, #tpu.memory_space<vmem>>, vector<1x8x32xf32>,
    %c5_i32 = arith.constant 5 : i32
    %c7_i32_101 = arith.constant 7 : i32
    %360 = arith.subi %c7_i32_101, %c5_i32 : i32
    %361 = arith.index_cast %c5_i32 : i32 to index
    %c0_102 = arith.constant 0 : index
    %c0_103 = arith.constant 0 : index
    %362 = vector.load %arg8[%361, %c0_102, %c0_103] : memref<8x8x128xf32, #tpu.memory_space<vmem>>, vector<1x8x128xf32>
    %363 = vector.shape_cast %362 : vector<1x8x128xf32> to vector<8x128xf32>
    %cst_104 = arith.constant dense<0.000000e+00> : vector<8x128xf32>
    %364 = tpu.matmul %326, %12, %cst_104 {dimension_numbers = #tpu.dot_dimension_numbers<[1], [0], [0], [1], [0, 0, 1, 1], [], []>} : vector<8x32xf32>, vector<32x128xf32>, vector<8x128xf32> -> vector<8x128xf32>
    %365 = arith.addf %363, %364 : vector<8x128xf32>
    %366 = arith.index_cast %360 : i32 to index
    %c0_105 = arith.constant 0 : index
    %c0_106 = arith.constant 0 : index
    %367 = vector.load %arg9[%366, %c0_105, %c0_106] : memref<8x8x128xf32, #tpu.memory_space<vmem>>, vector<1x8x128xf32>
    %368 = vector.shape_cast %367 : vector<1x8x128xf32> to vector<8x128xf32>
    %cst_107 = arith.constant dense<0.000000e+00> : vector<8x128xf32>
    %369 = tpu.matmul %351, %13, %cst_107 {dimension_numbers = #tpu.dot_dimension_numbers<[1], [0], [0], [1], [0, 0, 1, 1], [], []>} : vector<8x32xf32>, vector<32x128xf32>, vector<8x128xf32> -> vector<8x128xf32>
    %370 = arith.addf %368, %369 : vector<8x128xf32>
    %371 = vector.extract_strided_slice %365 {offsets = [0, 0], sizes = [8, 32], strides = [1, 1]} : vector<8x128xf32> to vector<8x32xf32>
    %372 = arith.negf %371 : vector<8x32xf32>
    %373 = math.exp %372 : vector<8x32xf32>
    %cst_108 = arith.constant 1.000000e+00 : f32
    %374 = vector.broadcast %cst_108 : f32 to vector<8x32xf32>
    %375 = arith.addf %374, %373 : vector<8x32xf32>
    %376 = arith.divf %374, %375 : vector<8x32xf32>
    %377 = vector.extract_strided_slice %365 {offsets = [0, 32], sizes = [8, 32], strides = [1, 1]} : vector<8x128xf32> to vector<8x32xf32>
    %378 = arith.negf %377 : vector<8x32xf32>
    %379 = math.exp %378 : vector<8x32xf32>
    %cst_109 = arith.constant 1.000000e+00 : f32
    %380 = vector.broadcast %cst_109 : f32 to vector<8x32xf32>
    %381 = arith.addf %380, %379 : vector<8x32xf32>
    %382 = arith.divf %380, %381 : vector<8x32xf32>
    %383 = vector.extract_strided_slice %365 {offsets = [0, 64], sizes = [8, 32], strides = [1, 1]} : vector<8x128xf32> to vector<8x32xf32>
    %384 = math.tanh %383 : vector<8x32xf32>
    %385 = vector.extract_strided_slice %365 {offsets = [0, 96], sizes = [8, 32], strides = [1, 1]} : vector<8x128xf32> to vector<8x32xf32>
    %386 = arith.negf %385 : vector<8x32xf32>
    %387 = math.exp %386 : vector<8x32xf32>
    %cst_110 = arith.constant 1.000000e+00 : f32
    %388 = vector.broadcast %cst_110 : f32 to vector<8x32xf32>
    %389 = arith.addf %388, %387 : vector<8x32xf32>
    %390 = arith.divf %388, %389 : vector<8x32xf32>
    %391 = arith.mulf %382, %324 : vector<8x32xf32>
    %392 = arith.mulf %376, %384 : vector<8x32xf32>
    %393 = arith.addf %391, %392 : vector<8x32xf32>
    %394 = math.tanh %393 : vector<8x32xf32>
    %395 = arith.mulf %390, %394 : vector<8x32xf32>
    %396 = vector.extract_strided_slice %370 {offsets = [0, 0], sizes = [8, 32], strides = [1, 1]} : vector<8x128xf32> to vector<8x32xf32>
    %397 = arith.negf %396 : vector<8x32xf32>
    %398 = math.exp %397 : vector<8x32xf32>
    %cst_111 = arith.constant 1.000000e+00 : f32
    %399 = vector.broadcast %cst_111 : f32 to vector<8x32xf32>
    %400 = arith.addf %399, %398 : vector<8x32xf32>
    %401 = arith.divf %399, %400 : vector<8x32xf32>
    %402 = vector.extract_strided_slice %370 {offsets = [0, 32], sizes = [8, 32], strides = [1, 1]} : vector<8x128xf32> to vector<8x32xf32>
    %403 = arith.negf %402 : vector<8x32xf32>
    %404 = math.exp %403 : vector<8x32xf32>
    %cst_112 = arith.constant 1.000000e+00 : f32
    %405 = vector.broadcast %cst_112 : f32 to vector<8x32xf32>
    %406 = arith.addf %405, %404 : vector<8x32xf32>
    %407 = arith.divf %405, %406 : vector<8x32xf32>
    %408 = vector.extract_strided_slice %370 {offsets = [0, 64], sizes = [8, 32], strides = [1, 1]} : vector<8x128xf32> to vector<8x32xf32>
    %409 = math.tanh %408 : vector<8x32xf32>
    %410 = vector.extract_strided_slice %370 {offsets = [0, 96], sizes = [8, 32], strides = [1, 1]} : vector<8x128xf32> to vector<8x32xf32>
    %411 = arith.negf %410 : vector<8x32xf32>
    %412 = math.exp %411 : vector<8x32xf32>
    %cst_113 = arith.constant 1.000000e+00 : f32
    %413 = vector.broadcast %cst_113 : f32 to vector<8x32xf32>
    %414 = arith.addf %413, %412 : vector<8x32xf32>
    %415 = arith.divf %413, %414 : vector<8x32xf32>
    %416 = arith.mulf %407, %349 : vector<8x32xf32>
    %417 = arith.mulf %401, %409 : vector<8x32xf32>
    %418 = arith.addf %416, %417 : vector<8x32xf32>
    %419 = math.tanh %418 : vector<8x32xf32>
    %420 = arith.mulf %415, %419 : vector<8x32xf32>
    %421 = arith.index_cast %c5_i32 : i32 to index
    %c0_114 = arith.constant 0 : index
    %c0_115 = arith.constant 0 : index
    %422 = vector.load %arg10[%421, %c0_114, %c0_115] : memref<8x8x32xf32, #tpu.memory_space<vmem>>, vector<1x8x32xf32>
    %423 = vector.shape_cast %422 : vector<1x8x32xf32> to vector<8x32xf32>
    %424 = vector.shape_cast %395 : vector<8x32xf32> to vector<1x8x32xf32>
    tpu.vector_store %arg10[%421, %c0_114, %c0_115], %424 {strides = array<i32>} : memref<8x8x32xf32, #tpu.memory_space<vmem>>, vector<1x8x32xf32>,
    %425 = arith.index_cast %360 : i32 to index
    %c0_116 = arith.constant 0 : index
    %c0_117 = arith.constant 0 : index
    %426 = vector.load %arg11[%425, %c0_116, %c0_117] : memref<8x8x32xf32, #tpu.memory_space<vmem>>, vector<1x8x32xf32>
    %427 = vector.shape_cast %426 : vector<1x8x32xf32> to vector<8x32xf32>
    %428 = vector.shape_cast %420 : vector<8x32xf32> to vector<1x8x32xf32>
    tpu.vector_store %arg11[%425, %c0_116, %c0_117], %428 {strides = array<i32>} : memref<8x8x32xf32, #tpu.memory_space<vmem>>, vector<1x8x32xf32>,
    %c6_i32 = arith.constant 6 : i32
    %c7_i32_118 = arith.constant 7 : i32
    %429 = arith.subi %c7_i32_118, %c6_i32 : i32
    %430 = arith.index_cast %c6_i32 : i32 to index
    %c0_119 = arith.constant 0 : index
    %c0_120 = arith.constant 0 : index
    %431 = vector.load %arg8[%430, %c0_119, %c0_120] : memref<8x8x128xf32, #tpu.memory_space<vmem>>, vector<1x8x128xf32>
    %432 = vector.shape_cast %431 : vector<1x8x128xf32> to vector<8x128xf32>
    %cst_121 = arith.constant dense<0.000000e+00> : vector<8x128xf32>
    %433 = tpu.matmul %395, %12, %cst_121 {dimension_numbers = #tpu.dot_dimension_numbers<[1], [0], [0], [1], [0, 0, 1, 1], [], []>} : vector<8x32xf32>, vector<32x128xf32>, vector<8x128xf32> -> vector<8x128xf32>
    %434 = arith.addf %432, %433 : vector<8x128xf32>
    %435 = arith.index_cast %429 : i32 to index
    %c0_122 = arith.constant 0 : index
    %c0_123 = arith.constant 0 : index
    %436 = vector.load %arg9[%435, %c0_122, %c0_123] : memref<8x8x128xf32, #tpu.memory_space<vmem>>, vector<1x8x128xf32>
    %437 = vector.shape_cast %436 : vector<1x8x128xf32> to vector<8x128xf32>
    %cst_124 = arith.constant dense<0.000000e+00> : vector<8x128xf32>
    %438 = tpu.matmul %420, %13, %cst_124 {dimension_numbers = #tpu.dot_dimension_numbers<[1], [0], [0], [1], [0, 0, 1, 1], [], []>} : vector<8x32xf32>, vector<32x128xf32>, vector<8x128xf32> -> vector<8x128xf32>
    %439 = arith.addf %437, %438 : vector<8x128xf32>
    %440 = vector.extract_strided_slice %434 {offsets = [0, 0], sizes = [8, 32], strides = [1, 1]} : vector<8x128xf32> to vector<8x32xf32>
    %441 = arith.negf %440 : vector<8x32xf32>
    %442 = math.exp %441 : vector<8x32xf32>
    %cst_125 = arith.constant 1.000000e+00 : f32
    %443 = vector.broadcast %cst_125 : f32 to vector<8x32xf32>
    %444 = arith.addf %443, %442 : vector<8x32xf32>
    %445 = arith.divf %443, %444 : vector<8x32xf32>
    %446 = vector.extract_strided_slice %434 {offsets = [0, 32], sizes = [8, 32], strides = [1, 1]} : vector<8x128xf32> to vector<8x32xf32>
    %447 = arith.negf %446 : vector<8x32xf32>
    %448 = math.exp %447 : vector<8x32xf32>
    %cst_126 = arith.constant 1.000000e+00 : f32
    %449 = vector.broadcast %cst_126 : f32 to vector<8x32xf32>
    %450 = arith.addf %449, %448 : vector<8x32xf32>
    %451 = arith.divf %449, %450 : vector<8x32xf32>
    %452 = vector.extract_strided_slice %434 {offsets = [0, 64], sizes = [8, 32], strides = [1, 1]} : vector<8x128xf32> to vector<8x32xf32>
    %453 = math.tanh %452 : vector<8x32xf32>
    %454 = vector.extract_strided_slice %434 {offsets = [0, 96], sizes = [8, 32], strides = [1, 1]} : vector<8x128xf32> to vector<8x32xf32>
    %455 = arith.negf %454 : vector<8x32xf32>
    %456 = math.exp %455 : vector<8x32xf32>
    %cst_127 = arith.constant 1.000000e+00 : f32
    %457 = vector.broadcast %cst_127 : f32 to vector<8x32xf32>
    %458 = arith.addf %457, %456 : vector<8x32xf32>
    %459 = arith.divf %457, %458 : vector<8x32xf32>
    %460 = arith.mulf %451, %393 : vector<8x32xf32>
    %461 = arith.mulf %445, %453 : vector<8x32xf32>
    %462 = arith.addf %460, %461 : vector<8x32xf32>
    %463 = math.tanh %462 : vector<8x32xf32>
    %464 = arith.mulf %459, %463 : vector<8x32xf32>
    %465 = vector.extract_strided_slice %439 {offsets = [0, 0], sizes = [8, 32], strides = [1, 1]} : vector<8x128xf32> to vector<8x32xf32>
    %466 = arith.negf %465 : vector<8x32xf32>
    %467 = math.exp %466 : vector<8x32xf32>
    %cst_128 = arith.constant 1.000000e+00 : f32
    %468 = vector.broadcast %cst_128 : f32 to vector<8x32xf32>
    %469 = arith.addf %468, %467 : vector<8x32xf32>
    %470 = arith.divf %468, %469 : vector<8x32xf32>
    %471 = vector.extract_strided_slice %439 {offsets = [0, 32], sizes = [8, 32], strides = [1, 1]} : vector<8x128xf32> to vector<8x32xf32>
    %472 = arith.negf %471 : vector<8x32xf32>
    %473 = math.exp %472 : vector<8x32xf32>
    %cst_129 = arith.constant 1.000000e+00 : f32
    %474 = vector.broadcast %cst_129 : f32 to vector<8x32xf32>
    %475 = arith.addf %474, %473 : vector<8x32xf32>
    %476 = arith.divf %474, %475 : vector<8x32xf32>
    %477 = vector.extract_strided_slice %439 {offsets = [0, 64], sizes = [8, 32], strides = [1, 1]} : vector<8x128xf32> to vector<8x32xf32>
    %478 = math.tanh %477 : vector<8x32xf32>
    %479 = vector.extract_strided_slice %439 {offsets = [0, 96], sizes = [8, 32], strides = [1, 1]} : vector<8x128xf32> to vector<8x32xf32>
    %480 = arith.negf %479 : vector<8x32xf32>
    %481 = math.exp %480 : vector<8x32xf32>
    %cst_130 = arith.constant 1.000000e+00 : f32
    %482 = vector.broadcast %cst_130 : f32 to vector<8x32xf32>
    %483 = arith.addf %482, %481 : vector<8x32xf32>
    %484 = arith.divf %482, %483 : vector<8x32xf32>
    %485 = arith.mulf %476, %418 : vector<8x32xf32>
    %486 = arith.mulf %470, %478 : vector<8x32xf32>
    %487 = arith.addf %485, %486 : vector<8x32xf32>
    %488 = math.tanh %487 : vector<8x32xf32>
    %489 = arith.mulf %484, %488 : vector<8x32xf32>
    %490 = arith.index_cast %c6_i32 : i32 to index
    %c0_131 = arith.constant 0 : index
    %c0_132 = arith.constant 0 : index
    %491 = vector.load %arg10[%490, %c0_131, %c0_132] : memref<8x8x32xf32, #tpu.memory_space<vmem>>, vector<1x8x32xf32>
    %492 = vector.shape_cast %491 : vector<1x8x32xf32> to vector<8x32xf32>
    %493 = vector.shape_cast %464 : vector<8x32xf32> to vector<1x8x32xf32>
    tpu.vector_store %arg10[%490, %c0_131, %c0_132], %493 {strides = array<i32>} : memref<8x8x32xf32, #tpu.memory_space<vmem>>, vector<1x8x32xf32>,
    %494 = arith.index_cast %429 : i32 to index
    %c0_133 = arith.constant 0 : index
    %c0_134 = arith.constant 0 : index
    %495 = vector.load %arg11[%494, %c0_133, %c0_134] : memref<8x8x32xf32, #tpu.memory_space<vmem>>, vector<1x8x32xf32>
    %496 = vector.shape_cast %495 : vector<1x8x32xf32> to vector<8x32xf32>
    %497 = vector.shape_cast %489 : vector<8x32xf32> to vector<1x8x32xf32>
    tpu.vector_store %arg11[%494, %c0_133, %c0_134], %497 {strides = array<i32>} : memref<8x8x32xf32, #tpu.memory_space<vmem>>, vector<1x8x32xf32>,
    %c7_i32_135 = arith.constant 7 : i32
    %c7_i32_136 = arith.constant 7 : i32
    %498 = arith.subi %c7_i32_136, %c7_i32_135 : i32
    %499 = arith.index_cast %c7_i32_135 : i32 to index
    %c0_137 = arith.constant 0 : index
    %c0_138 = arith.constant 0 : index
    %500 = vector.load %arg8[%499, %c0_137, %c0_138] : memref<8x8x128xf32, #tpu.memory_space<vmem>>, vector<1x8x128xf32>
    %501 = vector.shape_cast %500 : vector<1x8x128xf32> to vector<8x128xf32>
    %cst_139 = arith.constant dense<0.000000e+00> : vector<8x128xf32>
    %502 = tpu.matmul %464, %12, %cst_139 {dimension_numbers = #tpu.dot_dimension_numbers<[1], [0], [0], [1], [0, 0, 1, 1], [], []>} : vector<8x32xf32>, vector<32x128xf32>, vector<8x128xf32> -> vector<8x128xf32>
    %503 = arith.addf %501, %502 : vector<8x128xf32>
    %504 = arith.index_cast %498 : i32 to index
    %c0_140 = arith.constant 0 : index
    %c0_141 = arith.constant 0 : index
    %505 = vector.load %arg9[%504, %c0_140, %c0_141] : memref<8x8x128xf32, #tpu.memory_space<vmem>>, vector<1x8x128xf32>
    %506 = vector.shape_cast %505 : vector<1x8x128xf32> to vector<8x128xf32>
    %cst_142 = arith.constant dense<0.000000e+00> : vector<8x128xf32>
    %507 = tpu.matmul %489, %13, %cst_142 {dimension_numbers = #tpu.dot_dimension_numbers<[1], [0], [0], [1], [0, 0, 1, 1], [], []>} : vector<8x32xf32>, vector<32x128xf32>, vector<8x128xf32> -> vector<8x128xf32>
    %508 = arith.addf %506, %507 : vector<8x128xf32>
    %509 = vector.extract_strided_slice %503 {offsets = [0, 0], sizes = [8, 32], strides = [1, 1]} : vector<8x128xf32> to vector<8x32xf32>
    %510 = arith.negf %509 : vector<8x32xf32>
    %511 = math.exp %510 : vector<8x32xf32>
    %cst_143 = arith.constant 1.000000e+00 : f32
    %512 = vector.broadcast %cst_143 : f32 to vector<8x32xf32>
    %513 = arith.addf %512, %511 : vector<8x32xf32>
    %514 = arith.divf %512, %513 : vector<8x32xf32>
    %515 = vector.extract_strided_slice %503 {offsets = [0, 32], sizes = [8, 32], strides = [1, 1]} : vector<8x128xf32> to vector<8x32xf32>
    %516 = arith.negf %515 : vector<8x32xf32>
    %517 = math.exp %516 : vector<8x32xf32>
    %cst_144 = arith.constant 1.000000e+00 : f32
    %518 = vector.broadcast %cst_144 : f32 to vector<8x32xf32>
    %519 = arith.addf %518, %517 : vector<8x32xf32>
    %520 = arith.divf %518, %519 : vector<8x32xf32>
    %521 = vector.extract_strided_slice %503 {offsets = [0, 64], sizes = [8, 32], strides = [1, 1]} : vector<8x128xf32> to vector<8x32xf32>
    %522 = math.tanh %521 : vector<8x32xf32>
    %523 = vector.extract_strided_slice %503 {offsets = [0, 96], sizes = [8, 32], strides = [1, 1]} : vector<8x128xf32> to vector<8x32xf32>
    %524 = arith.negf %523 : vector<8x32xf32>
    %525 = math.exp %524 : vector<8x32xf32>
    %cst_145 = arith.constant 1.000000e+00 : f32
    %526 = vector.broadcast %cst_145 : f32 to vector<8x32xf32>
    %527 = arith.addf %526, %525 : vector<8x32xf32>
    %528 = arith.divf %526, %527 : vector<8x32xf32>
    %529 = arith.mulf %520, %462 : vector<8x32xf32>
    %530 = arith.mulf %514, %522 : vector<8x32xf32>
    %531 = arith.addf %529, %530 : vector<8x32xf32>
    %532 = math.tanh %531 : vector<8x32xf32>
    %533 = arith.mulf %528, %532 : vector<8x32xf32>
    %534 = vector.extract_strided_slice %508 {offsets = [0, 0], sizes = [8, 32], strides = [1, 1]} : vector<8x128xf32> to vector<8x32xf32>
    %535 = arith.negf %534 : vector<8x32xf32>
    %536 = math.exp %535 : vector<8x32xf32>
    %cst_146 = arith.constant 1.000000e+00 : f32
    %537 = vector.broadcast %cst_146 : f32 to vector<8x32xf32>
    %538 = arith.addf %537, %536 : vector<8x32xf32>
    %539 = arith.divf %537, %538 : vector<8x32xf32>
    %540 = vector.extract_strided_slice %508 {offsets = [0, 32], sizes = [8, 32], strides = [1, 1]} : vector<8x128xf32> to vector<8x32xf32>
    %541 = arith.negf %540 : vector<8x32xf32>
    %542 = math.exp %541 : vector<8x32xf32>
    %cst_147 = arith.constant 1.000000e+00 : f32
    %543 = vector.broadcast %cst_147 : f32 to vector<8x32xf32>
    %544 = arith.addf %543, %542 : vector<8x32xf32>
    %545 = arith.divf %543, %544 : vector<8x32xf32>
    %546 = vector.extract_strided_slice %508 {offsets = [0, 64], sizes = [8, 32], strides = [1, 1]} : vector<8x128xf32> to vector<8x32xf32>
    %547 = math.tanh %546 : vector<8x32xf32>
    %548 = vector.extract_strided_slice %508 {offsets = [0, 96], sizes = [8, 32], strides = [1, 1]} : vector<8x128xf32> to vector<8x32xf32>
    %549 = arith.negf %548 : vector<8x32xf32>
    %550 = math.exp %549 : vector<8x32xf32>
    %cst_148 = arith.constant 1.000000e+00 : f32
    %551 = vector.broadcast %cst_148 : f32 to vector<8x32xf32>
    %552 = arith.addf %551, %550 : vector<8x32xf32>
    %553 = arith.divf %551, %552 : vector<8x32xf32>
    %554 = arith.mulf %545, %487 : vector<8x32xf32>
    %555 = arith.mulf %539, %547 : vector<8x32xf32>
    %556 = arith.addf %554, %555 : vector<8x32xf32>
    %557 = math.tanh %556 : vector<8x32xf32>
    %558 = arith.mulf %553, %557 : vector<8x32xf32>
    %559 = arith.index_cast %c7_i32_135 : i32 to index
    %c0_149 = arith.constant 0 : index
    %c0_150 = arith.constant 0 : index
    %560 = vector.load %arg10[%559, %c0_149, %c0_150] : memref<8x8x32xf32, #tpu.memory_space<vmem>>, vector<1x8x32xf32>
    %561 = vector.shape_cast %560 : vector<1x8x32xf32> to vector<8x32xf32>
    %562 = vector.shape_cast %533 : vector<8x32xf32> to vector<1x8x32xf32>
    tpu.vector_store %arg10[%559, %c0_149, %c0_150], %562 {strides = array<i32>} : memref<8x8x32xf32, #tpu.memory_space<vmem>>, vector<1x8x32xf32>,
    %563 = arith.index_cast %498 : i32 to index
    %c0_151 = arith.constant 0 : index
    %c0_152 = arith.constant 0 : index
    %564 = vector.load %arg11[%563, %c0_151, %c0_152] : memref<8x8x32xf32, #tpu.memory_space<vmem>>, vector<1x8x32xf32>
    %565 = vector.shape_cast %564 : vector<1x8x32xf32> to vector<8x32xf32>
    %566 = vector.shape_cast %558 : vector<8x32xf32> to vector<1x8x32xf32>
    tpu.vector_store %arg11[%563, %c0_151, %c0_152], %566 {strides = array<i32>} : memref<8x8x32xf32, #tpu.memory_space<vmem>>, vector<1x8x32xf32>,
    %c8_i32 = arith.constant 8 : i32
    %c0_153 = arith.constant 0 : index
    %c0_154 = arith.constant 0 : index
    %c0_155 = arith.constant 0 : index
    %567 = vector.load %arg10[%c0_153, %c0_154, %c0_155] : memref<8x8x32xf32, #tpu.memory_space<vmem>>, vector<8x8x32xf32>
    %c0_156 = arith.constant 0 : index
    %c0_157 = arith.constant 0 : index
    %c0_158 = arith.constant 0 : index
    %568 = vector.load %arg11[%c0_156, %c0_157, %c0_158] : memref<8x8x32xf32, #tpu.memory_space<vmem>>, vector<8x8x32xf32>
    %569 = tpu.concatenate %567, %568 in 2 : vector<8x8x32xf32>, vector<8x8x32xf32> -> vector<8x8x64xf32>
    %c0_159 = arith.constant 0 : index
    %c0_160 = arith.constant 0 : index
    %c0_161 = arith.constant 0 : index
    %570 = vector.load %arg5[%c0_159, %c0_160, %c0_161] : memref<8x8x64xf32, #tpu.memory_space<vmem>>, vector<8x8x64xf32>
    tpu.vector_store %arg5[%c0_159, %c0_160, %c0_161], %569 {strides = array<i32>} : memref<8x8x64xf32, #tpu.memory_space<vmem>>, vector<8x8x64xf32>,
    %c0_162 = arith.constant 0 : index
    %c0_163 = arith.constant 0 : index
    %c0_164 = arith.constant 0 : index
    %571 = vector.load %arg6[%c0_162, %c0_163, %c0_164] : memref<2x8x32xf32, #tpu.memory_space<vmem>>, vector<1x8x32xf32>
    %572 = vector.shape_cast %571 : vector<1x8x32xf32> to vector<8x32xf32>
    %573 = vector.shape_cast %533 : vector<8x32xf32> to vector<1x8x32xf32>
    tpu.vector_store %arg6[%c0_162, %c0_163, %c0_164], %573 {strides = array<i32>} : memref<2x8x32xf32, #tpu.memory_space<vmem>>, vector<1x8x32xf32>,
    %c1 = arith.constant 1 : index
    %c0_165 = arith.constant 0 : index
    %c0_166 = arith.constant 0 : index
    %574 = vector.load %arg6[%c1, %c0_165, %c0_166] : memref<2x8x32xf32, #tpu.memory_space<vmem>>, vector<1x8x32xf32>
    %575 = vector.shape_cast %574 : vector<1x8x32xf32> to vector<8x32xf32>
    %576 = vector.shape_cast %558 : vector<8x32xf32> to vector<1x8x32xf32>
    tpu.vector_store %arg6[%c1, %c0_165, %c0_166], %576 {strides = array<i32>} : memref<2x8x32xf32, #tpu.memory_space<vmem>>, vector<1x8x32xf32>,
    %c0_167 = arith.constant 0 : index
    %c0_168 = arith.constant 0 : index
    %c0_169 = arith.constant 0 : index
    %577 = vector.load %arg7[%c0_167, %c0_168, %c0_169] : memref<2x8x32xf32, #tpu.memory_space<vmem>>, vector<1x8x32xf32>
    %578 = vector.shape_cast %577 : vector<1x8x32xf32> to vector<8x32xf32>
    %579 = vector.shape_cast %531 : vector<8x32xf32> to vector<1x8x32xf32>
    tpu.vector_store %arg7[%c0_167, %c0_168, %c0_169], %579 {strides = array<i32>} : memref<2x8x32xf32, #tpu.memory_space<vmem>>, vector<1x8x32xf32>,
    %c1_170 = arith.constant 1 : index
    %c0_171 = arith.constant 0 : index
    %c0_172 = arith.constant 0 : index
    %580 = vector.load %arg7[%c1_170, %c0_171, %c0_172] : memref<2x8x32xf32, #tpu.memory_space<vmem>>, vector<1x8x32xf32>
    %581 = vector.shape_cast %580 : vector<1x8x32xf32> to vector<8x32xf32>
    %582 = vector.shape_cast %556 : vector<8x32xf32> to vector<1x8x32xf32>
    tpu.vector_store %arg7[%c1_170, %c0_171, %c0_172], %582 {strides = array<i32>} : memref<2x8x32xf32, #tpu.memory_space<vmem>>, vector<1x8x32xf32>,
    return
  }
}

</mosaic_0001>

<bundles_post_ra>
// kernel: encoder_forward.3
= control target key start
LH: loop header
LB: loop body
LE: loop exit
PB: predicated region body
PF: predicated region fallthrough
CT: control target
= control target key end

     0   :  { %13 = vsyncpa [#allocation7], 0  ;;  %s3310_s0 = inlined_call_operand.hbm [shape: f32[8,8,64], index: 0, kind: input, shape index: {}]   ;;  %s3311_s1 = inlined_call_operand.hbm [shape: f32[64,256], index: 1, kind: input, shape index: {}]   ;;  %s3312_s2 = inlined_call_operand.hbm [shape: f32[32,128], index: 2, kind: input, shape index: {}]   ;;  %s3313_s3 = inlined_call_operand.hbm [shape: f32[32,128], index: 3, kind: input, shape index: {}]   ;;  %s3314_s4 = inlined_call_operand.hbm [shape: f32[1,256], index: 4, kind: input, shape index: {}]   ;;  %s3315_s5 = inlined_call_operand.hbm [shape: f32[8,8,64], index: 5, kind: output, shape index: {0}]   ;;  %s3316_s6 = inlined_call_operand.hbm [shape: f32[2,8,32], index: 6, kind: output, shape index: {1}]   ;;  %s3317_s7 = inlined_call_operand.hbm [shape: f32[2,8,32], index: 7, kind: output, shape index: {2}]  }
   0x1   :  { %14 = vsyncpa [#allocation10], 0 }
   0x2   :  { %15 = vsyncpa [#allocation13], 0 }
   0x3   :  { %16 = vsyncpa [#allocation8], 0 }
   0x4   :  { %17 = vsyncpa [#allocation17], 0  ;;  %s2831_s24 = smov [#allocation9]   ;;  %s2645_s28 = scalar_lea.hbm %s3311_s1, 2048 }
   0x5   :  { %s35_s25 = sshll.u32 %s2831_s24, 4  ;;  %p2646_p0 = scmp.ne.s32.totalorder %s3311_s1, %s2645_s28  ;;  %s36_s25 = int_to_ptr.vmem [resolvable:$true] %s35_s25 }
   0x6   :  { %p2649_p1 = scmp.lt.u32.totalorder %s2645_s28, %s3311_s1 }
   0x8   :  { %p2651_p2 = pnand %p2649_p1, %p2646_p0 }
   0xa   :  { %2654 = shalt.err (!%p2651_p2)
}
   0xb   :  { %s2655_s10 = scalar_lea.vmem %s36_s25, 2048  ;;  %p2660_p4 = scmp.lt.s32.totalorder %s36_s25, %s36_s25 }
   0xc   :  { %p2656_p3 = scmp.ne.s32.totalorder %s36_s25, %s2655_s10  ;;  %p2661_p5 = scmp.lt.s32.totalorder %s2655_s10, %s2655_s10 }
   0xe   :  { %p2662_p6 = por %p2661_p5, %p2660_p4 }
  0x10   :  { %p2663_p7 = pnand %p2662_p6, %p2656_p3 }
  0x12   :  { %2666 = shalt.err (!%p2663_p7)
}
  0x13   :  { %s2832_s11 = smov 256   ;;  %s2833_s12 = smov 16  }
  0x14   :  { %41 = dma.hbm_to_vmem [thread:$0]  %s3311_s1, 2048, %s36_s25, [#allocation10], %s2832_s11, %s2832_s11, %s2833_s12  }
  0x15   :  { %s2834_s15 = smov [#allocation12]   ;;  %s2835_s17 = smov [#allocation6]  }
  0x16   :  { %s59_s16 = sshll.u32 %s2834_s15, 4  ;;  %s23_s18 = sshll.u32 %s2835_s17, 4  ;;  %s60_s16 = int_to_ptr.vmem [resolvable:$true] %s59_s16  ;;  %s24_s18 = int_to_ptr.vmem [resolvable:$true] %s23_s18 }
  0x17   :  { %s2667_s21 = scalar_lea.hbm %s3313_s3, 512 }
  0x18   :  { %p2668_p8 = scmp.ne.s32.totalorder %s3313_s3, %s2667_s21  ;;  %p2671_p9 = scmp.lt.u32.totalorder %s2667_s21, %s3313_s3 }
  0x1a   :  { %p2673_p10 = pnand %p2671_p9, %p2668_p8 }
  0x1c   :  { %2676 = shalt.err (!%p2673_p10)
}
  0x1d   :  { %s2677_s1 = scalar_lea.vmem %s60_s16, 512  ;;  %p2682_p12 = scmp.lt.s32.totalorder %s60_s16, %s60_s16 }
  0x1e   :  { %p2678_p11 = scmp.ne.s32.totalorder %s60_s16, %s2677_s1  ;;  %p2683_p13 = scmp.lt.s32.totalorder %s2677_s1, %s2677_s1 }
  0x20   :  { %p2684_p0 = por %p2683_p13, %p2682_p12 }
  0x22   :  { %p2685_p1 = pnand %p2684_p0, %p2678_p11 }
  0x24   :  { %2688 = shalt.err (!%p2685_p1)
}
  0x25   :  { %s2836_s25 = smov 128   ;;  %s2837_s27 = smov 8  }
  0x26   :  { %65 = dma.hbm_to_vmem [thread:$0]  %s3313_s3, 512, %s60_s16, [#allocation13], %s2836_s25, %s2836_s25, %s2837_s27  }
  0x27   :  { %s2689_s9 = scalar_lea.hbm %s3310_s0, 1024 }
  0x28   :  { %p2690_p2 = scmp.ne.s32.totalorder %s3310_s0, %s2689_s9  ;;  %p2693_p3 = scmp.lt.u32.totalorder %s2689_s9, %s3310_s0 }
  0x2a   :  { %p2695_p4 = pnand %p2693_p3, %p2690_p2 }
  0x2c   :  { %2698 = shalt.err (!%p2695_p4)
}
  0x2d   :  { %s2699_s14 = scalar_lea.vmem %s24_s18, 1024  ;;  %p2704_p6 = scmp.lt.s32.totalorder %s24_s18, %s24_s18 }
  0x2e   :  { %p2700_p5 = scmp.ne.s32.totalorder %s24_s18, %s2699_s14  ;;  %p2705_p7 = scmp.lt.s32.totalorder %s2699_s14, %s2699_s14 }
  0x30   :  { %p2706_p8 = por %p2705_p7, %p2704_p6 }
  0x32   :  { %p2707_p9 = pnand %p2706_p8, %p2700_p5 }
  0x34   :  { %2710 = shalt.err (!%p2707_p9)
}
  0x35   :  { %29 = dma.hbm_to_vmem [thread:$0]  %s3310_s0, 1024, %s24_s18, [#allocation7], %s2836_s25, %s2836_s25, %s2837_s27  }
  0x36   :  { %s2838_s16 = smov [#allocation11]   ;;  %s2839_s19 = smov [#allocation14]  }
  0x37   :  { %s47_s17 = sshll.u32 %s2838_s16, 4  ;;  %s72_s20 = sshll.u32 %s2839_s19, 4  ;;  %s48_s17 = int_to_ptr.vmem [resolvable:$true] %s47_s17  ;;  %s73_s20 = int_to_ptr.vmem [resolvable:$true] %s72_s20 }
  0x38   :  { %s2711_s23 = scalar_lea.hbm %s3312_s2, 512 }
  0x39   :  { %p2712_p10 = scmp.ne.s32.totalorder %s3312_s2, %s2711_s23  ;;  %p2715_p11 = scmp.lt.u32.totalorder %s2711_s23, %s3312_s2 }
  0x3b   :  { %p2717_p12 = pnand %p2715_p11, %p2712_p10 }
  0x3d   :  { %2720 = shalt.err (!%p2717_p12)
}
  0x3e   :  { %s2721_s0 = scalar_lea.vmem %s48_s17, 512  ;;  %p2726_p0 = scmp.lt.s32.totalorder %s48_s17, %s48_s17 }
  0x3f   :  { %p2722_p13 = scmp.ne.s32.totalorder %s48_s17, %s2721_s0  ;;  %p2727_p1 = scmp.lt.s32.totalorder %s2721_s0, %s2721_s0 }
  0x41   :  { %p2728_p2 = por %p2727_p1, %p2726_p0 }
  0x43   :  { %p2729_p3 = pnand %p2728_p2, %p2722_p13 }
  0x45   :  { %2732 = shalt.err (!%p2729_p3)
}
  0x46   :  { %53 = dma.hbm_to_vmem [thread:$0]  %s3312_s2, 512, %s48_s17, [#allocation10], %s2836_s25, %s2836_s25, %s2837_s27  }
  0x47   :  { %s2733_s9 = scalar_lea.hbm %s3314_s4, 32 }
  0x48   :  { %p2734_p4 = scmp.ne.s32.totalorder %s3314_s4, %s2733_s9  ;;  %p2737_p5 = scmp.lt.u32.totalorder %s2733_s9, %s3314_s4 }
  0x4a   :  { %p2739_p6 = pnand %p2737_p5, %p2734_p4 }
  0x4c   :  { %2742 = shalt.err (!%p2739_p6)
}
  0x4d   :  { %s2743_s14 = scalar_lea.vmem %s73_s20, 32  ;;  %p2748_p8 = scmp.lt.s32.totalorder %s73_s20, %s73_s20 }
  0x4e   :  { %p2744_p7 = scmp.ne.s32.totalorder %s73_s20, %s2743_s14  ;;  %p2749_p9 = scmp.lt.s32.totalorder %s2743_s14, %s2743_s14 }
  0x50   :  { %p2750_p10 = por %p2749_p9, %p2748_p8 }
  0x52   :  { %p2751_p11 = pnand %p2750_p10, %p2744_p7 }
  0x54   :  { %2754 = shalt.err (!%p2751_p11)
}
  0x55   :  { %75 = dma.hbm_to_vmem [thread:$0]  %s3314_s4, 32, %s73_s20, [#allocation13]  }
  0x56   :  { %2821 = dma.done.wait [#allocation7], 1024  }
  0x57   :  { %2822 = vsyncadd [#allocation7], 4294966272 }
  0x58   :  { %2823 = dma.done.wait [#allocation10], 2560  }
  0x59   :  { %2824 = vsyncadd [#allocation10], 4294964736 }
  0x5a   :  { %2825 = dma.done.wait [#allocation13], 544  }
  0x5b   :  { %2826 = vsyncadd [#allocation13], 4294966752  ;;  %v2840_v0 = vmov 0.0|0.0   ;;  %v2841_v1 = vmov 0.0   ;;  %vm2842_vm0 = vmmov 0   ;;  %v100_v2 = vld [vmem:[#allocation9 + $0x8] sm:$0xff]  ;;  %v117_v46 = vlaneseq }
  0x5c   :  { %2403 = vmatprep.subr.bf16.mxu1 %v2840_v0  ;;  %216 = vmatprep.mubr.f32.mxu0 %v2841_v1  ;;  %v102_v3 = vld [vmem:[#allocation9 + $0x18] sm:$0xff]  ;;  %v99_v4 = vld [vmem:[#allocation9] sm:$0xff]  ;;  %v101_v6 = vld [vmem:[#allocation9 + $0x10] sm:$0xff]  ;;  %vm127_vm1 = vcmask 523264   ;;  %s2843_s4 = smov 64   ;;  %s2844_s15 = smov 32  }
  0x5d   :  { %2219 = vmatprep.mubr.msk.f32.mxu1 %vm2842_vm0, %v2841_v1  ;;  %v2387_v5 = vpack.c.bf16 %v102_v3, %v100_v2  ;;  %v104_v7 = vld [vmem:[#allocation9 + $0x28] sm:$0xff]  ;;  %v106_v8 = vld [vmem:[#allocation9 + $0x38] sm:$0xff]  ;;  %v2389_v9 = vpack.c.bf16 %v101_v6, %v99_v4  ;;  %v103_v11 = vld [vmem:[#allocation9 + $0x20] sm:$0xff]  ;;  %v118_v47 = vshrl.u32 %v117_v46, 7  ;;  %vm290_vm2 = vcmask 261120   ;;  %s2845_s16 = smov 96  }
  0x5e   :  { %v2391_v10 = vpack.c.bf16 %v106_v8, %v104_v7  ;;  %v105_v12 = vld [vmem:[#allocation9 + $0x30] sm:$0xff]  ;;  %v108_v13 = vld [vmem:[#allocation9 + $0x48] sm:$0xff]  ;;  %v110_v14 = vld [vmem:[#allocation9 + $0x58] sm:$0xff]  ;;  %s2846_s17 = smov [#allocation16]  }
  0x5f   :  { %2388 = vmatprep.subr.bf16.mxu0 %v2387_v5  ;;  %v2393_v15 = vpack.c.bf16 %v105_v12, %v103_v11  ;;  %v281_v16 = vld [vmem:[#allocation11] sm:$0xff]  ;;  %v282_v17 = vld [vmem:[#allocation11 + $0x8] sm:$0xff]  ;;  %v2395_v18 = vpack.c.bf16 %v110_v14, %v108_v13  ;;  %v109_v20 = vld [vmem:[#allocation9 + $0x50] sm:$0xff]  ;;  %v119_v48 = vsub.s32 0, %v118_v47  ;;  %v123_v50 = vsub.s32 1, %v118_v47  ;;  %s2060_s19 = sshll.u32 %s2846_s17, 4  ;;  %s2061_s19 = int_to_ptr.vmem [resolvable:$true] %s2060_s19 }
  0x60   :  { %2390 = vmatpush1.bf16.msra.mxu0 %v2389_v9  ;;  %v107_v19 = vld [vmem:[#allocation9 + $0x40] sm:$0xff]  ;;  %v2962_v21 = vpack.c.bf16 %v282_v17, %v281_v16  ;;  %v112_v22 = vld [vmem:[#allocation9 + $0x68] sm:$0xff]  ;;  %v114_v23 = vld [vmem:[#allocation9 + $0x78] sm:$0xff]  ;;  %s2755_s20 = scalar_lea.vmem %s2061_s19, 256  ;;  %p2760_p13 = scmp.lt.s32.totalorder %s2061_s19, %s2061_s19 }
  0x61   :  { %2392 = vmatprep.subr.bf16.mxu0 %v2391_v10  ;;  %v283_v24 = vld [vmem:[#allocation11 + $0x10] sm:$0xff]  ;;  %v284_v25 = vld [vmem:[#allocation11 + $0x18] sm:$0xff]  ;;  %v2397_v27 = vpack.c.bf16 %v109_v20, %v107_v19  ;;  %v285_v28 = vld [vmem:[#allocation12] sm:$0xff]  ;;  %v2399_v29 = vpack.c.bf16 %v114_v23, %v112_v22  ;;  %p2756_p12 = scmp.ne.s32.totalorder %s2061_s19, %s2755_s20  ;;  %p2761_p0 = scmp.lt.s32.totalorder %s2755_s20, %s2755_s20 }
  0x62   :  { %2405 = vmatpush3.bf16.msra.mxu1 %v2962_v21  ;;  %v2965_v26 = vpack.c.bf16 %v284_v25, %v283_v24  ;;  %v111_v30 = vld [vmem:[#allocation9 + $0x60] sm:$0xff]  ;;  %v113_v31 = vld [vmem:[#allocation9 + $0x70] sm:$0xff]  ;;  %v286_v32 = vld [vmem:[#allocation12 + $0x8] sm:$0xff] }
  0x63   :  { %2406 = vmatprep.subr.bf16.mxu1 %v2840_v0  ;;  %v2969_v33 = vpack.c.bf16 %v286_v32, %v285_v28  ;;  %v2401_v34 = vpack.c.bf16 %v113_v31, %v111_v30  ;;  %v287_v35 = vld [vmem:[#allocation12 + $0x10] sm:$0xff]  ;;  %v288_v36 = vld [vmem:[#allocation12 + $0x18] sm:$0xff]  ;;  %v91_v38 = vld [vmem:[#allocation6] sm:$0xff]  ;;  %p2762_p1 = por %p2761_p0, %p2760_p13 }
  0x64   :  { %2394 = vmatpush1.bf16.msra.mxu0 %v2393_v15  ;;  %v2974_v37 = vpack.c.bf16 %v288_v36, %v287_v35  ;;  %v92_v39 = vld [vmem:[#allocation6 + $0x8] sm:$0xff]  ;;  %v93_v40 = vld [vmem:[#allocation6 + $0x10] sm:$0xff]  ;;  %v94_v41 = vld [vmem:[#allocation6 + $0x18] sm:$0xff] }
  0x65   :  { %2396 = vmatprep.subr.bf16.mxu0 %v2395_v18  ;;  %v95_v42 = vld [vmem:[#allocation6 + $0x20] sm:$0xff]  ;;  %v96_v43 = vld [vmem:[#allocation6 + $0x28] sm:$0xff]  ;;  %v97_v44 = vld [vmem:[#allocation6 + $0x30] sm:$0xff]  ;;  %p2763_p2 = pnand %p2762_p1, %p2756_p12 }
  0x66   :  { %2408 = vmatpush3.bf16.msra.mxu1 %v2965_v26  ;;  %v98_v45 = vld [vmem:[#allocation6 + $0x38] sm:$0xff]  ;;  %v115_v49 = vld [vmem:[#allocation14] sm:$0x3] }
  0x67   :  { %2409 = vmatprep.subr.bf16.mxu1 %v2840_v0  ;;  %v120_v53 = vrot.slane %v115_v49, %v119_v48  ;;  %v124_v54 = vrot.slane %v115_v49, %v123_v50 }
  0x68   :  { %2398 = vmatpush1.bf16.msra.mxu0 %v2397_v27 }
  0x69   :  { %2400 = vmatprep.subr.bf16.mxu0 %v2399_v29  ;;  %2220 = vmatmul.mubr.f32.vlgmr.msra.gmra.mrb[0].mxu1 %v2841_v1 }
  0x6a   :  { %2411 = vmatpush3.bf16.msra.mxu1 %v2969_v33  ;;  %2230 = vmatprep.mubr.msk.f32.mxu1 %vm2842_vm0, %v2841_v1 }
  0x6b   :  { %2412 = vmatprep.subr.bf16.mxu1 %v2840_v0 }
  0x6c   :  { %2402 = vmatpush1.bf16.msra.mxu0 %v2401_v34 }
  0x6d   :  { %2433 = vmatprep.subr.bf16.mxu0 %v2840_v0 }
  0x6e   :  { %2414 = vmatpush3.bf16.msra.mxu1 %v2974_v37 }
  0x6f   :  { %2093 = vmatmul.mubr.msk.f32.vlgmr.msra.gmra.mrb[0].mxu0 %vm127_vm1, %v91_v38  ;;  %2415 = vmatprep.subr.bf16.mxu1 %v2840_v0 }
  0x70   :  { %222 = vmatprep.mubr.f32.mxu0 %v2841_v1  ;;  %2435 = vmatpush3.bf16.msra.mxu0 %v2969_v33 }
  0x71   :  { %2231 = vmatmul.mubr.f32.vlgmr.msra.gmra.mrb[2].mxu1 %v2841_v1  ;;  %2436 = vmatprep.subr.bf16.mxu0 %v2840_v0 }
  0x72   :  { %2417 = vmatpush3.bf16.msra.mxu1 %v2962_v21  ;;  %2241 = vmatprep.mubr.msk.f32.mxu1 %vm2842_vm0, %v2841_v1 }
  0x73   :  { %2094 = vmatmul.mubr.msk.f32.gmra.mrb[2].mxu0 %vm127_vm1, %v92_v39  ;;  %2418 = vmatprep.subr.bf16.mxu1 %v2840_v0 }
  0x74   :  { %228 = vmatprep.mubr.f32.mxu0 %v2841_v1  ;;  %2438 = vmatpush3.bf16.msra.mxu0 %v2974_v37 }
  0x75   :  { %2445 = vmatprep.subr.bf16.mxu0 %v2840_v0 }
  0x76   :  { %2420 = vmatpush3.bf16.msra.mxu1 %v2965_v26 }
  0x77   :  { %2095 = vmatmul.mubr.msk.f32.gmra.mrb[4].mxu0 %vm127_vm1, %v93_v40  ;;  %2421 = vmatprep.subr.bf16.mxu1 %v2840_v0 }
  0x78   :  { %234 = vmatprep.mubr.f32.mxu0 %v2841_v1 }
  0x7b   :  { %2096 = vmatmul.mubr.msk.f32.gmra.mrb[6].mxu0 %vm127_vm1, %v94_v41 }
  0x7c   :  { %240 = vmatprep.mubr.f32.mxu0 %v2841_v1 }
  0x7f   :  { %2097 = vmatmul.mubr.msk.f32.gmra.mrb[8].mxu0 %vm127_vm1, %v95_v42 }
  0x80   :  { %246 = vmatprep.mubr.f32.mxu0 %v2841_v1 }
  0x83   :  { %2098 = vmatmul.mubr.msk.f32.gmra.mrb[10].mxu0 %vm127_vm1, %v96_v43 }
  0x84   :  { %252 = vmatprep.mubr.f32.mxu0 %v2841_v1 }
  0x87   :  { %2099 = vmatmul.mubr.msk.f32.gmra.mrb[12].mxu0 %vm127_vm1, %v97_v44 }
  0x88   :  { %258 = vmatprep.mubr.f32.mxu0 %v2841_v1 }
  0x8b   :  { %2100 = vmatmul.mubr.msk.f32.gmra.mrb[14].mxu0 %vm127_vm1, %v98_v45 }
  0x8c   :  { %2274 = vmatprep.mubr.msk.f32.mxu0 %vm2842_vm0, %v2841_v1 }
 0x13c   :  { %v360_v51 = vpop.f32.mrb[0].mxu1 }
 0x13d   :  { %v2221_v52 = vpop.f32.mrb[1].mxu1 }
 0x142   :  { %v218_v55 = vpop.f32.mrb[0].mxu0 }
 0x143   :  { %v219_v56 = vadd.f32 %v218_v55, %v120_v53  ;;  %v220_v57 = vpop.f32.mrb[1].mxu0 }
 0x144   :  { %v3010_v58 = vadd.f32 %v220_v57, %v124_v54  ;;  %v433_v60 = vpop.f32.mrb[2].mxu1 }
 0x145   :  { %v364_v59 = vadd.f32 %v360_v51, %v219_v56  ;;  %v2232_v62 = vpop.f32.mrb[3].mxu1 }
 0x146   :  { %v224_v61 = vpop.f32.mrb[2].mxu0 }
 0x147   :  { %2517 = vtanh.f32 %v364_v59  ;;  %v3012_v63 = vadd.f32 %v224_v61, %v120_v53  ;;  %v226_v2 = vpop.f32.mrb[3].mxu0  ;;  %v2101_v34 = vmul.f32 -1.442695, %v364_v59 }
 0x148   :  { %v3014_v3 = vadd.f32 %v226_v2, %v124_v54 }
 0x14a   :  { %v230_v4 = vpop.f32.mrb[4].mxu0 }
 0x14b   :  { %v3016_v5 = vadd.f32 %v230_v4, %v120_v53  ;;  %v232_v6 = vpop.f32.mrb[5].mxu0 }
 0x14c   :  { %v3018_v7 = vadd.f32 %v232_v6, %v124_v54 }
 0x14e   :  { %v236_v8 = vpop.f32.mrb[6].mxu0 }
 0x14f   :  { %v3020_v9 = vadd.f32 %v236_v8, %v120_v53  ;;  %v238_v10 = vpop.f32.mrb[7].mxu0 }
 0x150   :  { %v3022_v11 = vadd.f32 %v238_v10, %v124_v54 }
 0x151   :  { %v2518_v12 = vpop.eup %2517 }
 0x152   :  { %v242_v13 = vpop.f32.mrb[8].mxu0  ;;  %447 = vrot.lane.b32.xlu0 %v2518_v12, %s2843_s4 }
 0x153   :  { %v3025_v14 = vadd.f32 %v242_v13, %v120_v53  ;;  %v244_v15 = vpop.f32.mrb[9].mxu0 }
 0x154   :  { %v3027_v16 = vadd.f32 %v244_v15, %v124_v54 }
 0x156   :  { %v248_v17 = vpop.f32.mrb[10].mxu0 }
 0x157   :  { %v3029_v18 = vadd.f32 %v248_v17, %v120_v53  ;;  %v250_v19 = vpop.f32.mrb[11].mxu0 }
 0x158   :  { %v3031_v20 = vadd.f32 %v250_v19, %v124_v54 }
 0x15a   :  { %v254_v22 = vpop.f32.mrb[12].mxu0 }
 0x15b   :  { %v3033_v23 = vadd.f32 %v254_v22, %v120_v53  ;;  %v256_v24 = vpop.f32.mrb[13].mxu0 }
 0x15c   :  { %v3035_v25 = vadd.f32 %v256_v24, %v124_v54 }
 0x15e   :  { %v260_v27 = vpop.f32.mrb[14].mxu0 }
 0x15f   :  { %v3037_v28 = vadd.f32 %v260_v27, %v120_v53  ;;  %v262_v29 = vpop.f32.mrb[15].mxu0 }
 0x160   :  { %v263_v30 = vadd.f32 %v262_v29, %v124_v54 }
 0x162   :  { %v437_v31 = vadd.f32 %v433_v60, %v263_v30 }
 0x164   :  { %2519 = vtanh.f32 %v437_v31  ;;  %v2102_v38 = vmul.f32 -1.442695, %v437_v31 }
 0x165   :  { %2521 = vpow2.f32 %v2101_v34 }
 0x16e   :  { %v2520_v32 = vpop.eup %2519 }
 0x16f   :  { %471 = vrot.lane.b32.xlu0 %v2520_v32, %s2843_s4  ;;  %v2522_v35 = vpop.eup %2521 }
 0x170   :  { %v441_v36 = vadd.f32 1.0, %v2522_v35 }
 0x172   :  { %2523 = vrcp.f32 %v441_v36 }
 0x173   :  { %2525 = vpow2.f32 %v2102_v38 }
 0x17c   :  { %v2524_v39 = vpop.eup %2523 }
 0x17d   :  { %v2526_v42 = vpop.eup %2525  ;;  %v445_v47 = vmul.f32 0.0, %v2524_v39 }
 0x17e   :  { %v465_v43 = vadd.f32 1.0, %v2526_v42 }
 0x180   :  { %2527 = vrcp.f32 %v465_v43 }
 0x18a   :  { %v2528_v44 = vpop.eup %2527 }
 0x18b   :  { %v469_v51 = vmul.f32 0.0, %v2528_v44 }
 0x1c4   :  { %v448_v40 = vpop.permute.xlu0 %447 }
 0x1c5   :  { %v450_v41 = vmul.f32 %v2524_v39, %v448_v40 }
 0x1c7   :  { %452 = vrot.lane.b32.xlu1 %v450_v41, %s2844_s15 }
 0x1e1   :  { %v472_v45 = vpop.permute.xlu0 %471 }
 0x1e2   :  { %v474_v46 = vmul.f32 %v2528_v44, %v472_v45 }
 0x1e4   :  { %476 = vrot.lane.b32.xlu1 %v474_v46, %s2844_s15 }
 0x239   :  { %v453_v48 = vpop.permute.xlu1 %452 }
 0x23a   :  { %v3042_v49 = vadd.f32 %v453_v48, %v445_v47 }
 0x23c   :  { %2529 = vtanh.f32 %v3042_v49 }
 0x246   :  { %v2530_v50 = vpop.eup %2529 }
 0x247   :  { %458 = vrot.lane.b32.xlu0 %v2530_v50, %s2843_s4 }
 0x256   :  { %v477_v52 = vpop.permute.xlu1 %476 }
 0x257   :  { %v3046_v53 = vadd.f32 %v477_v52, %v469_v51 }
 0x259   :  { %2531 = vtanh.f32 %v3046_v53 }
 0x263   :  { %v2532_v54 = vpop.eup %2531 }
 0x264   :  { %482 = vrot.lane.b32.xlu1 %v2532_v54, %s2843_s4 }
 0x2b9   :  { %v459_v55 = vpop.permute.xlu0 %458 }
 0x2ba   :  { %v461_v56 = vmul.f32 %v2524_v39, %v459_v55 }
 0x2bc   :  { %487 = vrot.lane.b32.xlu0 %v461_v56, %s2844_s15 }
 0x2d6   :  { %v483_v57 = vpop.permute.xlu1 %482 }
 0x2d7   :  { %v485_v59 = vmul.f32 %v2528_v44, %v483_v57 }
 0x2d9   :  { %492 = vrot.lane.b32.xlu1 %v485_v59, %s2844_s15 }
 0x32e   :  { %v488_v60 = vpop.permute.xlu0 %487 }
 0x32f   :  { %490 = vst.msk [vmem:[#allocation4] sm:$0xff] %vm290_vm2, %v488_v60  ;;  %2242 = vmatmul.mubr.msk.f32.vlgmr.msra.gmra.mrb[4].mxu1 %vm290_vm2, %v488_v60 }
 0x330   :  { %2423 = vmatpush3.bf16.msra.mxu1 %v2969_v33  ;;  %2252 = vmatprep.mubr.msk.f32.mxu1 %vm2842_vm0, %v2841_v1 }
 0x331   :  { %2424 = vmatprep.subr.bf16.mxu1 %v2840_v0 }
 0x334   :  { %2426 = vmatpush3.bf16.msra.mxu1 %v2974_v37 }
 0x335   :  { %2427 = vmatprep.subr.bf16.mxu1 %v2840_v0 }
 0x34b   :  { %v493_v61 = vpop.permute.xlu1 %492 }
 0x34c   :  { %496 = vst.msk [vmem:[#allocation5 + $0x38] sm:$0xff] %vm290_vm2, %v493_v61  ;;  %2253 = vmatmul.mubr.msk.f32.vlgmr.msra.gmra.mrb[6].mxu1 %vm290_vm2, %v493_v61 }
 0x34d   :  { %2429 = vmatpush3.bf16.msra.mxu1 %v2962_v21  ;;  %2263 = vmatprep.mubr.msk.f32.mxu1 %vm2842_vm0, %v2841_v1 }
 0x34e   :  { %2430 = vmatprep.subr.bf16.mxu1 %v2840_v0 }
 0x351   :  { %2432 = vmatpush3.bf16.msra.mxu1 %v2965_v26 }
 0x352   :  { %2439 = vmatprep.subr.bf16.mxu1 %v2840_v0 }
 0x402   :  { %v567_v62 = vpop.f32.mrb[4].mxu1 }
 0x403   :  { %v571_v2 = vadd.f32 %v567_v62, %v3012_v63  ;;  %v2243_v4 = vpop.f32.mrb[5].mxu1 }
 0x405   :  { %2533 = vtanh.f32 %v571_v2  ;;  %v2105_v15 = vmul.f32 -1.442695, %v571_v2 }
 0x40f   :  { %v2534_v6 = vpop.eup %2533 }
 0x410   :  { %656 = vrot.lane.b32.xlu1 %v2534_v6, %s2843_s4 }
 0x41f   :  { %v642_v8 = vpop.f32.mrb[6].mxu1 }
 0x420   :  { %v646_v10 = vadd.f32 %v642_v8, %v3035_v25  ;;  %v2254_v12 = vpop.f32.mrb[7].mxu1 }
 0x422   :  { %2535 = vtanh.f32 %v646_v10  ;;  %v2106_v22 = vmul.f32 -1.442695, %v646_v10 }
 0x423   :  { %2537 = vpow2.f32 %v2105_v15 }
 0x42c   :  { %v2536_v13 = vpop.eup %2535 }
 0x42d   :  { %680 = vrot.lane.b32.xlu0 %v2536_v13, %s2843_s4  ;;  %v2538_v17 = vpop.eup %2537 }
 0x42e   :  { %v650_v19 = vadd.f32 1.0, %v2538_v17 }
 0x430   :  { %2539 = vrcp.f32 %v650_v19 }
 0x431   :  { %2541 = vpow2.f32 %v2106_v22 }
 0x43a   :  { %v2540_v63 = vpop.eup %2539 }
 0x43b   :  { %v2542_v29 = vpop.eup %2541  ;;  %v654_v34 = vmul.f32 %v2540_v63, %v3042_v49 }
 0x43c   :  { %v674_v30 = vadd.f32 1.0, %v2542_v29 }
 0x43e   :  { %2543 = vrcp.f32 %v674_v30 }
 0x448   :  { %v2544_v25 = vpop.eup %2543 }
 0x449   :  { %v678_v39 = vmul.f32 %v2544_v25, %v3046_v53 }
 0x482   :  { %v657_v24 = vpop.permute.xlu1 %656 }
 0x483   :  { %v659_v27 = vmul.f32 %v2540_v63, %v657_v24 }
 0x485   :  { %661 = vrot.lane.b32.xlu1 %v659_v27, %s2844_s15 }
 0x49f   :  { %v681_v31 = vpop.permute.xlu0 %680 }
 0x4a0   :  { %v683_v32 = vmul.f32 %v2544_v25, %v681_v31 }
 0x4a2   :  { %685 = vrot.lane.b32.xlu0 %v683_v32, %s2844_s15 }
 0x4f7   :  { %v662_v35 = vpop.permute.xlu1 %661 }
 0x4f8   :  { %v664_v36 = vadd.f32 %v662_v35, %v654_v34 }
 0x4fa   :  { %2545 = vtanh.f32 %v664_v36 }
 0x504   :  { %v2546_v38 = vpop.eup %2545 }
 0x505   :  { %667 = vrot.lane.b32.xlu1 %v2546_v38, %s2843_s4 }
 0x514   :  { %v686_v40 = vpop.permute.xlu0 %685 }
 0x515   :  { %v688_v41 = vadd.f32 %v686_v40, %v678_v39 }
 0x517   :  { %2547 = vtanh.f32 %v688_v41 }
 0x521   :  { %v2548_v42 = vpop.eup %2547 }
 0x522   :  { %691 = vrot.lane.b32.xlu0 %v2548_v42, %s2843_s4 }
 0x577   :  { %v668_v43 = vpop.permute.xlu1 %667 }
 0x578   :  { %v670_v44 = vmul.f32 %v2540_v63, %v668_v43 }
 0x57a   :  { %696 = vrot.lane.b32.xlu1 %v670_v44, %s2844_s15 }
 0x594   :  { %v692_v45 = vpop.permute.xlu0 %691 }
 0x595   :  { %v694_v46 = vmul.f32 %v2544_v25, %v692_v45 }
 0x597   :  { %702 = vrot.lane.b32.xlu0 %v694_v46, %s2844_s15 }
 0x5ec   :  { %v697_v47 = vpop.permute.xlu1 %696 }
 0x5ed   :  { %700 = vst.msk [vmem:[#allocation4 + $0x8] sm:$0xff] %vm290_vm2, %v697_v47  ;;  %2264 = vmatmul.mubr.msk.f32.vlgmr.msra.gmra.mrb[8].mxu1 %vm290_vm2, %v697_v47 }
 0x5ee   :  { %2441 = vmatpush3.bf16.msra.mxu1 %v2962_v21  ;;  %2285 = vmatprep.mubr.msk.f32.mxu1 %vm2842_vm0, %v2841_v1 }
 0x5ef   :  { %2442 = vmatprep.subr.bf16.mxu1 %v2840_v0 }
 0x5f2   :  { %2444 = vmatpush3.bf16.msra.mxu1 %v2965_v26 }
 0x5f3   :  { %2451 = vmatprep.subr.bf16.mxu1 %v2840_v0 }
 0x609   :  { %v703_v48 = vpop.permute.xlu0 %702 }
 0x60a   :  { %706 = vst.msk [vmem:[#allocation5 + $0x30] sm:$0xff] %vm290_vm2, %v703_v48  ;;  %2275 = vmatmul.mubr.msk.f32.vlgmr.msra.gmra.mrb[16].mxu0 %vm290_vm2, %v703_v48 }
 0x60b   :  { %2447 = vmatpush3.bf16.msra.mxu0 %v2969_v33  ;;  %2296 = vmatprep.mubr.msk.f32.mxu0 %vm2842_vm0, %v2841_v1 }
 0x60c   :  { %2448 = vmatprep.subr.bf16.mxu0 %v2840_v0 }
 0x60f   :  { %2450 = vmatpush3.bf16.msra.mxu0 %v2974_v37 }
 0x610   :  { %2457 = vmatprep.subr.bf16.mxu0 %v2840_v0 }
 0x6c0   :  { %v777_v49 = vpop.f32.mrb[8].mxu1 }
 0x6c1   :  { %v781_v50 = vadd.f32 %v777_v49, %v3016_v5  ;;  %v2265_v51 = vpop.f32.mrb[9].mxu1 }
 0x6c3   :  { %2549 = vtanh.f32 %v781_v50  ;;  %v2109_v57 = vmul.f32 -1.442695, %v781_v50 }
 0x6cd   :  { %v2550_v52 = vpop.eup %2549 }
 0x6ce   :  { %866 = vrot.lane.b32.xlu1 %v2550_v52, %s2843_s4 }
 0x6dd   :  { %v852_v53 = vpop.f32.mrb[16].mxu0 }
 0x6de   :  { %v856_v54 = vadd.f32 %v852_v53, %v3031_v20  ;;  %v2276_v55 = vpop.f32.mrb[17].mxu0 }
 0x6e0   :  { %2551 = vtanh.f32 %v856_v54  ;;  %v2110_v61 = vmul.f32 -1.442695, %v856_v54 }
 0x6e1   :  { %2553 = vpow2.f32 %v2109_v57 }
 0x6ea   :  { %v2552_v56 = vpop.eup %2551 }
 0x6eb   :  { %890 = vrot.lane.b32.xlu0 %v2552_v56, %s2843_s4  ;;  %v2554_v59 = vpop.eup %2553 }
 0x6ec   :  { %v860_v60 = vadd.f32 1.0, %v2554_v59 }
 0x6ee   :  { %2555 = vrcp.f32 %v860_v60 }
 0x6ef   :  { %2557 = vpow2.f32 %v2110_v61 }
 0x6f8   :  { %v2556_v5 = vpop.eup %2555 }
 0x6f9   :  { %v2558_v4 = vpop.eup %2557  ;;  %v864_v12 = vmul.f32 %v2556_v5, %v664_v36 }
 0x6fa   :  { %v884_v6 = vadd.f32 1.0, %v2558_v4 }
 0x6fc   :  { %2559 = vrcp.f32 %v884_v6 }
 0x706   :  { %v2560_v20 = vpop.eup %2559 }
 0x707   :  { %v888_v19 = vmul.f32 %v2560_v20, %v688_v41 }
 0x740   :  { %v867_v62 = vpop.permute.xlu1 %866 }
 0x741   :  { %v869_v2 = vmul.f32 %v2556_v5, %v867_v62 }
 0x743   :  { %871 = vrot.lane.b32.xlu1 %v869_v2, %s2844_s15 }
 0x75d   :  { %v891_v8 = vpop.permute.xlu0 %890 }
 0x75e   :  { %v893_v10 = vmul.f32 %v2560_v20, %v891_v8 }
 0x760   :  { %895 = vrot.lane.b32.xlu0 %v893_v10, %s2844_s15 }
 0x7b5   :  { %v872_v13 = vpop.permute.xlu1 %871 }
 0x7b6   :  { %v874_v15 = vadd.f32 %v872_v13, %v864_v12 }
 0x7b8   :  { %2561 = vtanh.f32 %v874_v15 }
 0x7c2   :  { %v2562_v17 = vpop.eup %2561 }
 0x7c3   :  { %877 = vrot.lane.b32.xlu1 %v2562_v17, %s2843_s4 }
 0x7d2   :  { %v896_v22 = vpop.permute.xlu0 %895 }
 0x7d3   :  { %v898_v63 = vadd.f32 %v896_v22, %v888_v19 }
 0x7d5   :  { %2563 = vtanh.f32 %v898_v63 }
 0x7df   :  { %v2564_v24 = vpop.eup %2563 }
 0x7e0   :  { %901 = vrot.lane.b32.xlu0 %v2564_v24, %s2843_s4 }
 0x835   :  { %v878_v27 = vpop.permute.xlu1 %877 }
 0x836   :  { %v880_v29 = vmul.f32 %v2556_v5, %v878_v27 }
 0x838   :  { %906 = vrot.lane.b32.xlu1 %v880_v29, %s2844_s15 }
 0x852   :  { %v902_v30 = vpop.permute.xlu0 %901 }
 0x853   :  { %v904_v25 = vmul.f32 %v2560_v20, %v902_v30 }
 0x855   :  { %912 = vrot.lane.b32.xlu0 %v904_v25, %s2844_s15 }
 0x8aa   :  { %v907_v31 = vpop.permute.xlu1 %906 }
 0x8ab   :  { %910 = vst.msk [vmem:[#allocation4 + $0x10] sm:$0xff] %vm290_vm2, %v907_v31  ;;  %2286 = vmatmul.mubr.msk.f32.vlgmr.msra.gmra.mrb[10].mxu1 %vm290_vm2, %v907_v31 }
 0x8ac   :  { %2453 = vmatpush3.bf16.msra.mxu1 %v2962_v21  ;;  %2307 = vmatprep.mubr.msk.f32.mxu1 %vm2842_vm0, %v2841_v1 }
 0x8ad   :  { %2454 = vmatprep.subr.bf16.mxu1 %v2840_v0 }
 0x8b0   :  { %2456 = vmatpush3.bf16.msra.mxu1 %v2965_v26 }
 0x8b1   :  { %2463 = vmatprep.subr.bf16.mxu1 %v2840_v0 }
 0x8c7   :  { %v913_v32 = vpop.permute.xlu0 %912 }
 0x8c8   :  { %916 = vst.msk [vmem:[#allocation5 + $0x28] sm:$0xff] %vm290_vm2, %v913_v32  ;;  %2297 = vmatmul.mubr.msk.f32.vlgmr.msra.gmra.mrb[18].mxu0 %vm290_vm2, %v913_v32 }
 0x8c9   :  { %2459 = vmatpush3.bf16.msra.mxu0 %v2969_v33  ;;  %2318 = vmatprep.mubr.msk.f32.mxu0 %vm2842_vm0, %v2841_v1 }
 0x8ca   :  { %2460 = vmatprep.subr.bf16.mxu0 %v2840_v0 }
 0x8cd   :  { %2462 = vmatpush3.bf16.msra.mxu0 %v2974_v37 }
 0x8ce   :  { %2469 = vmatprep.subr.bf16.mxu0 %v2840_v0 }
 0x97e   :  { %v987_v34 = vpop.f32.mrb[10].mxu1 }
 0x97f   :  { %v991_v35 = vadd.f32 %v987_v34, %v3020_v9  ;;  %v2287_v36 = vpop.f32.mrb[11].mxu1 }
 0x981   :  { %2565 = vtanh.f32 %v991_v35  ;;  %v2113_v43 = vmul.f32 -1.442695, %v991_v35 }
 0x98b   :  { %v2566_v38 = vpop.eup %2565 }
 0x98c   :  { %1076 = vrot.lane.b32.xlu1 %v2566_v38, %s2843_s4 }
 0x99b   :  { %v1062_v39 = vpop.f32.mrb[18].mxu0 }
 0x99c   :  { %v1066_v40 = vadd.f32 %v1062_v39, %v3027_v16  ;;  %v2298_v41 = vpop.f32.mrb[19].mxu0 }
 0x99e   :  { %2567 = vtanh.f32 %v1066_v40  ;;  %v2114_v46 = vmul.f32 -1.442695, %v1066_v40 }
 0x99f   :  { %2569 = vpow2.f32 %v2113_v43 }
 0x9a8   :  { %v2568_v42 = vpop.eup %2567 }
 0x9a9   :  { %1100 = vrot.lane.b32.xlu0 %v2568_v42, %s2843_s4  ;;  %v2570_v44 = vpop.eup %2569 }
 0x9aa   :  { %v1070_v45 = vadd.f32 1.0, %v2570_v44 }
 0x9ac   :  { %2571 = vrcp.f32 %v1070_v45 }
 0x9ad   :  { %2573 = vpow2.f32 %v2114_v46 }
 0x9b6   :  { %v2572_v9 = vpop.eup %2571 }
 0x9b7   :  { %v2574_v49 = vpop.eup %2573  ;;  %v1074_v53 = vmul.f32 %v2572_v9, %v874_v15 }
 0x9b8   :  { %v1094_v50 = vadd.f32 1.0, %v2574_v49 }
 0x9ba   :  { %2575 = vrcp.f32 %v1094_v50 }
 0x9c4   :  { %v2576_v16 = vpop.eup %2575 }
 0x9c5   :  { %v1098_v57 = vmul.f32 %v2576_v16, %v898_v63 }
 0x9fe   :  { %v1077_v47 = vpop.permute.xlu1 %1076 }
 0x9ff   :  { %v1079_v48 = vmul.f32 %v2572_v9, %v1077_v47 }
 0xa01   :  { %1081 = vrot.lane.b32.xlu1 %v1079_v48, %s2844_s15 }
 0xa1b   :  { %v1101_v51 = vpop.permute.xlu0 %1100 }
 0xa1c   :  { %v1103_v52 = vmul.f32 %v2576_v16, %v1101_v51 }
 0xa1e   :  { %1105 = vrot.lane.b32.xlu0 %v1103_v52, %s2844_s15 }
 0xa73   :  { %v1082_v54 = vpop.permute.xlu1 %1081 }
 0xa74   :  { %v1084_v55 = vadd.f32 %v1082_v54, %v1074_v53 }
 0xa76   :  { %2577 = vtanh.f32 %v1084_v55 }
 0xa80   :  { %v2578_v56 = vpop.eup %2577 }
 0xa81   :  { %1087 = vrot.lane.b32.xlu1 %v2578_v56, %s2843_s4 }
 0xa90   :  { %v1106_v59 = vpop.permute.xlu0 %1105 }
 0xa91   :  { %v1108_v60 = vadd.f32 %v1106_v59, %v1098_v57 }
 0xa93   :  { %2579 = vtanh.f32 %v1108_v60 }
 0xa9d   :  { %v2580_v61 = vpop.eup %2579 }
 0xa9e   :  { %1111 = vrot.lane.b32.xlu0 %v2580_v61, %s2843_s4 }
 0xaf3   :  { %v1088_v5 = vpop.permute.xlu1 %1087 }
 0xaf4   :  { %v1090_v62 = vmul.f32 %v2572_v9, %v1088_v5 }
 0xaf6   :  { %1116 = vrot.lane.b32.xlu1 %v1090_v62, %s2844_s15 }
 0xb10   :  { %v1112_v2 = vpop.permute.xlu0 %1111 }
 0xb11   :  { %v1114_v4 = vmul.f32 %v2576_v16, %v1112_v2 }
 0xb13   :  { %1122 = vrot.lane.b32.xlu0 %v1114_v4, %s2844_s15 }
 0xb68   :  { %v1117_v6 = vpop.permute.xlu1 %1116 }
 0xb69   :  { %1120 = vst.msk [vmem:[#allocation4 + $0x18] sm:$0xff] %vm290_vm2, %v1117_v6  ;;  %2308 = vmatmul.mubr.msk.f32.vlgmr.msra.gmra.mrb[12].mxu1 %vm290_vm2, %v1117_v6 }
 0xb6a   :  { %2465 = vmatpush3.bf16.msra.mxu1 %v2962_v21  ;;  %2329 = vmatprep.mubr.msk.f32.mxu1 %vm2842_vm0, %v2841_v1 }
 0xb6b   :  { %2466 = vmatprep.subr.bf16.mxu1 %v2840_v0 }
 0xb6e   :  { %2468 = vmatpush3.bf16.msra.mxu1 %v2965_v26 }
 0xb6f   :  { %2475 = vmatprep.subr.bf16.mxu1 %v2840_v0 }
 0xb85   :  { %v1123_v20 = vpop.permute.xlu0 %1122 }
 0xb86   :  { %1126 = vst.msk [vmem:[#allocation5 + $0x20] sm:$0xff] %vm290_vm2, %v1123_v20  ;;  %2319 = vmatmul.mubr.msk.f32.vlgmr.msra.gmra.mrb[20].mxu0 %vm290_vm2, %v1123_v20 }
 0xb87   :  { %2471 = vmatpush3.bf16.msra.mxu0 %v2969_v33  ;;  %2340 = vmatprep.mubr.msk.f32.mxu0 %vm2842_vm0, %v2841_v1 }
 0xb88   :  { %2472 = vmatprep.subr.bf16.mxu0 %v2840_v0 }
 0xb8b   :  { %2474 = vmatpush3.bf16.msra.mxu0 %v2974_v37 }
 0xb8c   :  { %2481 = vmatprep.subr.bf16.mxu0 %v2840_v0 }
 0xc3c   :  { %v1197_v8 = vpop.f32.mrb[12].mxu1 }
 0xc3d   :  { %v1201_v10 = vadd.f32 %v1197_v8, %v3025_v14  ;;  %v2309_v12 = vpop.f32.mrb[13].mxu1 }
 0xc3f   :  { %2581 = vtanh.f32 %v1201_v10  ;;  %v2117_v63 = vmul.f32 -1.442695, %v1201_v10 }
 0xc49   :  { %v2582_v13 = vpop.eup %2581 }
 0xc4a   :  { %1286 = vrot.lane.b32.xlu1 %v2582_v13, %s2843_s4 }
 0xc59   :  { %v1272_v15 = vpop.f32.mrb[20].mxu0 }
 0xc5a   :  { %v1276_v17 = vadd.f32 %v1272_v15, %v3022_v11  ;;  %v2320_v19 = vpop.f32.mrb[21].mxu0 }
 0xc5c   :  { %2583 = vtanh.f32 %v1276_v17  ;;  %v2118_v29 = vmul.f32 -1.442695, %v1276_v17 }
 0xc5d   :  { %2585 = vpow2.f32 %v2117_v63 }
 0xc66   :  { %v2584_v22 = vpop.eup %2583 }
 0xc67   :  { %1310 = vrot.lane.b32.xlu0 %v2584_v22, %s2843_s4  ;;  %v2586_v24 = vpop.eup %2585 }
 0xc68   :  { %v1280_v27 = vadd.f32 1.0, %v2586_v24 }
 0xc6a   :  { %2587 = vrcp.f32 %v1280_v27 }
 0xc6b   :  { %2589 = vpow2.f32 %v2118_v29 }
 0xc74   :  { %v2588_v14 = vpop.eup %2587 }
 0xc75   :  { %v2590_v31 = vpop.eup %2589  ;;  %v1284_v36 = vmul.f32 %v2588_v14, %v1084_v55 }
 0xc76   :  { %v1304_v32 = vadd.f32 1.0, %v2590_v31 }
 0xc78   :  { %2591 = vrcp.f32 %v1304_v32 }
 0xc82   :  { %v2592_v11 = vpop.eup %2591 }
 0xc83   :  { %v1308_v41 = vmul.f32 %v2592_v11, %v1108_v60 }
 0xcbc   :  { %v1287_v30 = vpop.permute.xlu1 %1286 }
 0xcbd   :  { %v1289_v25 = vmul.f32 %v2588_v14, %v1287_v30 }
 0xcbf   :  { %1291 = vrot.lane.b32.xlu1 %v1289_v25, %s2844_s15 }
 0xcd9   :  { %v1311_v34 = vpop.permute.xlu0 %1310 }
 0xcda   :  { %v1313_v35 = vmul.f32 %v2592_v11, %v1311_v34 }
 0xcdc   :  { %1315 = vrot.lane.b32.xlu0 %v1313_v35, %s2844_s15 }
 0xd31   :  { %v1292_v38 = vpop.permute.xlu1 %1291 }
 0xd32   :  { %v1294_v39 = vadd.f32 %v1292_v38, %v1284_v36 }
 0xd34   :  { %2593 = vtanh.f32 %v1294_v39 }
 0xd3e   :  { %v2594_v40 = vpop.eup %2593 }
 0xd3f   :  { %1297 = vrot.lane.b32.xlu1 %v2594_v40, %s2843_s4 }
 0xd4e   :  { %v1316_v42 = vpop.permute.xlu0 %1315 }
 0xd4f   :  { %v1318_v43 = vadd.f32 %v1316_v42, %v1308_v41 }
 0xd51   :  { %2595 = vtanh.f32 %v1318_v43 }
 0xd5b   :  { %v2596_v44 = vpop.eup %2595 }
 0xd5c   :  { %1321 = vrot.lane.b32.xlu0 %v2596_v44, %s2843_s4 }
 0xdb1   :  { %v1298_v45 = vpop.permute.xlu1 %1297 }
 0xdb2   :  { %v1300_v46 = vmul.f32 %v2588_v14, %v1298_v45 }
 0xdb4   :  { %1326 = vrot.lane.b32.xlu1 %v1300_v46, %s2844_s15 }
 0xdce   :  { %v1322_v9 = vpop.permute.xlu0 %1321 }
 0xdcf   :  { %v1324_v47 = vmul.f32 %v2592_v11, %v1322_v9 }
 0xdd1   :  { %1332 = vrot.lane.b32.xlu0 %v1324_v47, %s2844_s15 }
 0xe26   :  { %v1327_v48 = vpop.permute.xlu1 %1326 }
 0xe27   :  { %1330 = vst.msk [vmem:[#allocation4 + $0x20] sm:$0xff] %vm290_vm2, %v1327_v48  ;;  %2330 = vmatmul.mubr.msk.f32.vlgmr.msra.gmra.mrb[14].mxu1 %vm290_vm2, %v1327_v48 }
 0xe28   :  { %2477 = vmatpush3.bf16.msra.mxu1 %v2962_v21  ;;  %2351 = vmatprep.mubr.msk.f32.mxu1 %vm2842_vm0, %v2841_v1 }
 0xe29   :  { %2478 = vmatprep.subr.bf16.mxu1 %v2840_v0 }
 0xe2c   :  { %2480 = vmatpush3.bf16.msra.mxu1 %v2965_v26 }
 0xe2d   :  { %2487 = vmatprep.subr.bf16.mxu1 %v2840_v0 }
 0xe43   :  { %v1333_v49 = vpop.permute.xlu0 %1332 }
 0xe44   :  { %1336 = vst.msk [vmem:[#allocation5 + $0x18] sm:$0xff] %vm290_vm2, %v1333_v49  ;;  %2341 = vmatmul.mubr.msk.f32.vlgmr.msra.gmra.mrb[22].mxu0 %vm290_vm2, %v1333_v49 }
 0xe45   :  { %2483 = vmatpush3.bf16.msra.mxu0 %v2969_v33  ;;  %2362 = vmatprep.mubr.msk.f32.mxu0 %vm2842_vm0, %v2841_v1 }
 0xe46   :  { %2484 = vmatprep.subr.bf16.mxu0 %v2840_v0 }
 0xe49   :  { %2486 = vmatpush3.bf16.msra.mxu0 %v2974_v37 }
 0xe4a   :  { %2493 = vmatprep.subr.bf16.mxu0 %v2840_v0 }
 0xefa   :  { %v1407_v50 = vpop.f32.mrb[14].mxu1 }
 0xefb   :  { %v1411_v16 = vadd.f32 %v1407_v50, %v3029_v18  ;;  %v2331_v51 = vpop.f32.mrb[15].mxu1 }
 0xefd   :  { %2597 = vtanh.f32 %v1411_v16  ;;  %v2121_v57 = vmul.f32 -1.442695, %v1411_v16 }
 0xf07   :  { %v2598_v52 = vpop.eup %2597 }
 0xf08   :  { %1496 = vrot.lane.b32.xlu1 %v2598_v52, %s2843_s4 }
 0xf17   :  { %v1482_v53 = vpop.f32.mrb[22].mxu0 }
 0xf18   :  { %v1486_v54 = vadd.f32 %v1482_v53, %v3018_v7  ;;  %v2342_v55 = vpop.f32.mrb[23].mxu0 }
 0xf1a   :  { %2599 = vtanh.f32 %v1486_v54  ;;  %v2122_v61 = vmul.f32 -1.442695, %v1486_v54 }
 0xf1b   :  { %2601 = vpow2.f32 %v2121_v57 }
 0xf24   :  { %v2600_v56 = vpop.eup %2599 }
 0xf25   :  { %1520 = vrot.lane.b32.xlu0 %v2600_v56, %s2843_s4  ;;  %v2602_v59 = vpop.eup %2601 }
 0xf26   :  { %v1490_v60 = vadd.f32 1.0, %v2602_v59 }
 0xf28   :  { %2603 = vrcp.f32 %v1490_v60 }
 0xf29   :  { %2605 = vpow2.f32 %v2122_v61 }
 0xf32   :  { %v2604_v18 = vpop.eup %2603 }
 0xf33   :  { %v2606_v2 = vpop.eup %2605  ;;  %v1494_v8 = vmul.f32 %v2604_v18, %v1294_v39 }
 0xf34   :  { %v1514_v4 = vadd.f32 1.0, %v2606_v2 }
 0xf36   :  { %2607 = vrcp.f32 %v1514_v4 }
 0xf40   :  { %v2608_v7 = vpop.eup %2607 }
 0xf41   :  { %v1518_v15 = vmul.f32 %v2608_v7, %v1318_v43 }
 0xf7a   :  { %v1497_v5 = vpop.permute.xlu1 %1496 }
 0xf7b   :  { %v1499_v62 = vmul.f32 %v2604_v18, %v1497_v5 }
 0xf7d   :  { %1501 = vrot.lane.b32.xlu1 %v1499_v62, %s2844_s15 }
 0xf97   :  { %v1521_v6 = vpop.permute.xlu0 %1520 }
 0xf98   :  { %v1523_v20 = vmul.f32 %v2608_v7, %v1521_v6 }
 0xf9a   :  { %1525 = vrot.lane.b32.xlu0 %v1523_v20, %s2844_s15 }
 0xfef   :  { %v1502_v10 = vpop.permute.xlu1 %1501 }
 0xff0   :  { %v1504_v12 = vadd.f32 %v1502_v10, %v1494_v8 }
 0xff2   :  { %2609 = vtanh.f32 %v1504_v12 }
 0xffc   :  { %v2610_v13 = vpop.eup %2609 }
 0xffd   :  { %1507 = vrot.lane.b32.xlu1 %v2610_v13, %s2843_s4 }
0x100c   :  { %v1526_v17 = vpop.permute.xlu0 %1525 }
0x100d   :  { %v1528_v19 = vadd.f32 %v1526_v17, %v1518_v15 }
0x100f   :  { %2611 = vtanh.f32 %v1528_v19 }
0x1019   :  { %v2612_v22 = vpop.eup %2611 }
0x101a   :  { %1531 = vrot.lane.b32.xlu0 %v2612_v22, %s2843_s4 }
0x106f   :  { %v1508_v63 = vpop.permute.xlu1 %1507 }
0x1070   :  { %v1510_v24 = vmul.f32 %v2604_v18, %v1508_v63 }
0x1072   :  { %1536 = vrot.lane.b32.xlu1 %v1510_v24, %s2844_s15 }
0x108c   :  { %v1532_v27 = vpop.permute.xlu0 %1531 }
0x108d   :  { %v1534_v29 = vmul.f32 %v2608_v7, %v1532_v27 }
0x108f   :  { %1542 = vrot.lane.b32.xlu0 %v1534_v29, %s2844_s15 }
0x10e4   :  { %v1537_v14 = vpop.permute.xlu1 %1536 }
0x10e5   :  { %1540 = vst.msk [vmem:[#allocation4 + $0x28] sm:$0xff] %vm290_vm2, %v1537_v14  ;;  %2352 = vmatmul.mubr.msk.f32.vlgmr.msra.gmra.mrb[16].mxu1 %vm290_vm2, %v1537_v14 }
0x10e6   :  { %2489 = vmatpush3.bf16.msra.mxu1 %v2962_v21  ;;  %2373 = vmatprep.mubr.msk.f32.mxu1 %vm2842_vm0, %v2841_v1 }
0x10e7   :  { %2490 = vmatprep.subr.bf16.mxu1 %v2840_v0 }
0x10ea   :  { %2492 = vmatpush3.bf16.msra.mxu1 %v2965_v26 }
0x1101   :  { %v1543_v30 = vpop.permute.xlu0 %1542 }
0x1102   :  { %1546 = vst.msk [vmem:[#allocation5 + $0x10] sm:$0xff] %vm290_vm2, %v1543_v30  ;;  %2363 = vmatmul.mubr.msk.f32.vlgmr.msra.gmra.mrb[24].mxu0 %vm290_vm2, %v1543_v30 }
0x1103   :  { %2495 = vmatpush3.bf16.msra.mxu0 %v2969_v33  ;;  %2384 = vmatprep.mubr.msk.f32.mxu0 %vm2842_vm0, %v2841_v1 }
0x1104   :  { %2496 = vmatprep.subr.bf16.mxu0 %v2840_v0 }
0x1107   :  { %2498 = vmatpush3.bf16.msra.mxu0 %v2974_v37 }
0x11b8   :  { %v1617_v21 = vpop.f32.mrb[16].mxu1 }
0x11b9   :  { %v1621_v25 = vadd.f32 %v1617_v21, %v3033_v23  ;;  %v2353_v31 = vpop.f32.mrb[17].mxu1 }
0x11ba   :  { %v1978_v31 = vld [vmem:[#allocation5 + $0x28] sm:$0xff] }
0x11bb   :  { %2613 = vtanh.f32 %v1621_v25  ;;  %v2125_v1 = vmul.f32 -1.442695, %v1621_v25  ;;  %v1976_v25 = vld [vmem:[#allocation5 + $0x18] sm:$0xff] }
0x11c5   :  { %v2614_v26 = vpop.eup %2613 }
0x11c6   :  { %1706 = vrot.lane.b32.xlu1 %v2614_v26, %s2843_s4  ;;  %v1980_v26 = vld [vmem:[#allocation5 + $0x38] sm:$0xff] }
0x11d5   :  { %v1692_v32 = vpop.f32.mrb[24].mxu0 }
0x11d6   :  { %v1696_v11 = vadd.f32 %v1692_v32, %v3014_v3  ;;  %v2364_v34 = vpop.f32.mrb[25].mxu0 }
0x11d7   :  { %v1975_v34 = vld [vmem:[#allocation5 + $0x10] sm:$0xff] }
0x11d8   :  { %2615 = vtanh.f32 %v1696_v11  ;;  %v2126_v35 = vmul.f32 -1.442695, %v1696_v11 }
0x11d9   :  { %2617 = vpow2.f32 %v2125_v1  ;;  %v1979_v1 = vld [vmem:[#allocation5 + $0x30] sm:$0xff] }
0x11e2   :  { %v2616_v33 = vpop.eup %2615 }
0x11e3   :  { %1730 = vrot.lane.b32.xlu0 %v2616_v33, %s2843_s4  ;;  %v2618_v0 = vpop.eup %2617  ;;  %v1977_v33 = vld [vmem:[#allocation5 + $0x20] sm:$0xff] }
0x11e4   :  { %v1700_v37 = vadd.f32 1.0, %v2618_v0 }
0x11e6   :  { %2619 = vrcp.f32 %v1700_v37  ;;  %v1966_v37 = vld [vmem:[#allocation4 + $0x8] sm:$0xff] }
0x11e7   :  { %2621 = vpow2.f32 %v2126_v35 }
0x11f0   :  { %v2620_v23 = vpop.eup %2619 }
0x11f1   :  { %v2622_v39 = vpop.eup %2621  ;;  %v1704_v43 = vmul.f32 %v2620_v23, %v1504_v12 }
0x11f2   :  { %v1724_v40 = vadd.f32 1.0, %v2622_v39 }
0x11f4   :  { %2623 = vrcp.f32 %v1724_v40  ;;  %v1970_v40 = vld [vmem:[#allocation4 + $0x28] sm:$0xff] }
0x11fe   :  { %v2624_v3 = vpop.eup %2623 }
0x11ff   :  { %v1728_v9 = vmul.f32 %v2624_v3, %v1528_v19 }
0x1238   :  { %v1707_v36 = vpop.permute.xlu1 %1706 }
0x1239   :  { %v1709_v38 = vmul.f32 %v2620_v23, %v1707_v36  ;;  %v1968_v36 = vld [vmem:[#allocation4 + $0x18] sm:$0xff] }
0x123b   :  { %1711 = vrot.lane.b32.xlu1 %v1709_v38, %s2844_s15 }
0x1255   :  { %v1731_v41 = vpop.permute.xlu0 %1730 }
0x1256   :  { %v1733_v42 = vmul.f32 %v2624_v3, %v1731_v41 }
0x1258   :  { %1735 = vrot.lane.b32.xlu0 %v1733_v42, %s2844_s15 }
0x12ad   :  { %v1712_v44 = vpop.permute.xlu1 %1711 }
0x12ae   :  { %v1714_v45 = vadd.f32 %v1712_v44, %v1704_v43 }
0x12b0   :  { %2625 = vtanh.f32 %v1714_v45 }
0x12ba   :  { %v2626_v46 = vpop.eup %2625 }
0x12bb   :  { %1717 = vrot.lane.b32.xlu1 %v2626_v46, %s2843_s4 }
0x12ca   :  { %v1736_v47 = vpop.permute.xlu0 %1735 }
0x12cb   :  { %v1738_v48 = vadd.f32 %v1736_v47, %v1728_v9 }
0x12cd   :  { %2627 = vtanh.f32 %v1738_v48 }
0x12d7   :  { %v2628_v49 = vpop.eup %2627 }
0x12d8   :  { %1741 = vrot.lane.b32.xlu0 %v2628_v49, %s2843_s4 }
0x132d   :  { %v1718_v50 = vpop.permute.xlu1 %1717 }
0x132e   :  { %v1720_v16 = vmul.f32 %v2620_v23, %v1718_v50 }
0x1330   :  { %1746 = vrot.lane.b32.xlu1 %v1720_v16, %s2844_s15 }
0x134a   :  { %v1742_v51 = vpop.permute.xlu0 %1741 }
0x134b   :  { %v1744_v52 = vmul.f32 %v2624_v3, %v1742_v51 }
0x134d   :  { %1752 = vrot.lane.b32.xlu0 %v1744_v52, %s2844_s15 }
0x13a2   :  { %v1747_v53 = vpop.permute.xlu1 %1746 }
0x13a3   :  { %1750 = vst.msk [vmem:[#allocation4 + $0x30] sm:$0xff] %vm290_vm2, %v1747_v53  ;;  %2374 = vmatmul.mubr.msk.f32.vlgmr.msra.gmra.mrb[18].mxu1 %vm290_vm2, %v1747_v53 }
0x13bf   :  { %v1753_v54 = vpop.permute.xlu0 %1752 }
0x13c0   :  { %1756 = vst.msk [vmem:[#allocation5 + $0x8] sm:$0xff] %vm290_vm2, %v1753_v54  ;;  %2385 = vmatmul.mubr.msk.f32.vlgmr.msra.gmra.mrb[26].mxu0 %vm290_vm2, %v1753_v54 }
0x13c7   :  { %v1974_v21 = vld [vmem:[#allocation5 + $0x8] sm:$0xff] }
0x1476   :  { %v1827_v55 = vpop.f32.mrb[18].mxu1 }
0x1477   :  { %v1831_v56 = vadd.f32 %v1827_v55, %v3037_v28  ;;  %v2375_v57 = vpop.f32.mrb[19].mxu1 }
0x1479   :  { %2629 = vtanh.f32 %v1831_v56  ;;  %v2129_v62 = vmul.f32 -1.442695, %v1831_v56 }
0x1483   :  { %v2630_v59 = vpop.eup %2629 }
0x1484   :  { %1915 = vrot.lane.b32.xlu1 %v2630_v59, %s2843_s4 }
0x1493   :  { %v1901_v60 = vpop.f32.mrb[26].mxu0 }
0x1494   :  { %v1905_v61 = vadd.f32 %v1901_v60, %v3010_v58  ;;  %v2386_v18 = vpop.f32.mrb[27].mxu0 }
0x1496   :  { %2631 = vtanh.f32 %v1905_v61  ;;  %v2130_v7 = vmul.f32 -1.442695, %v1905_v61 }
0x1497   :  { %2633 = vpow2.f32 %v2129_v62 }
0x14a0   :  { %v2632_v5 = vpop.eup %2631 }
0x14a1   :  { %1939 = vrot.lane.b32.xlu0 %v2632_v5, %s2843_s4  ;;  %v2634_v2 = vpop.eup %2633 }
0x14a2   :  { %v1909_v4 = vadd.f32 1.0, %v2634_v2 }
0x14a4   :  { %2635 = vrcp.f32 %v1909_v4 }
0x14a5   :  { %2637 = vpow2.f32 %v2130_v7 }
0x14ae   :  { %v2636_v28 = vpop.eup %2635 }
0x14af   :  { %v2638_v8 = vpop.eup %2637  ;;  %v1913_v15 = vmul.f32 %v2636_v28, %v1714_v45 }
0x14b0   :  { %v1933_v10 = vadd.f32 1.0, %v2638_v8 }
0x14b2   :  { %2639 = vrcp.f32 %v1933_v10 }
0x14bc   :  { %v2640_v58 = vpop.eup %2639 }
0x14bd   :  { %v1937_v63 = vmul.f32 %v2640_v58, %v1738_v48 }
0x14f6   :  { %v1916_v6 = vpop.permute.xlu1 %1915 }
0x14f7   :  { %v1918_v20 = vmul.f32 %v2636_v28, %v1916_v6 }
0x14f9   :  { %1920 = vrot.lane.b32.xlu1 %v1918_v20, %s2844_s15 }
0x1513   :  { %v1940_v12 = vpop.permute.xlu0 %1939 }
0x1514   :  { %v1942_v13 = vmul.f32 %v2640_v58, %v1940_v12 }
0x1516   :  { %1944 = vrot.lane.b32.xlu0 %v1942_v13, %s2844_s15 }
0x156b   :  { %v1921_v17 = vpop.permute.xlu1 %1920 }
0x156c   :  { %v3218_v19 = vadd.f32 %v1921_v17, %v1913_v15 }
0x156e   :  { %2641 = vtanh.f32 %v3218_v19 }
0x1578   :  { %v2642_v22 = vpop.eup %2641 }
0x1579   :  { %1926 = vrot.lane.b32.xlu1 %v2642_v22, %s2843_s4 }
0x1588   :  { %v1945_v24 = vpop.permute.xlu0 %1944 }
0x1589   :  { %v1947_v27 = vadd.f32 %v1945_v24, %v1937_v63 }
0x158b   :  { %2643 = vtanh.f32 %v1947_v27 }
0x1595   :  { %v2644_v29 = vpop.eup %2643 }
0x1596   :  { %1950 = vrot.lane.b32.xlu0 %v2644_v29, %s2843_s4 }
0x15eb   :  { %v1927_v14 = vpop.permute.xlu1 %1926 }
0x15ec   :  { %v1929_v30 = vmul.f32 %v2636_v28, %v1927_v14 }
0x15ee   :  { %1955 = vrot.lane.b32.xlu1 %v1929_v30, %s2844_s15 }
0x15f2   :  { %1991 = vrot.lane.b32.xlu1 %v1974_v21, %s2844_s15 }
0x15f6   :  { %1995 = vrot.lane.b32.xlu1 %v1976_v25, %s2844_s15 }
0x15fa   :  { %1999 = vrot.lane.b32.xlu1 %v1978_v31, %s2844_s15 }
0x15fe   :  { %2003 = vrot.lane.b32.xlu1 %v1980_v26, %s2844_s15 }
0x1602   :  { %2038 = vrot.lane.b32.xlu1 %v1947_v27, %s2845_s16 }
0x1608   :  { %v1951_v32 = vpop.permute.xlu0 %1950 }
0x1609   :  { %v1953_v11 = vmul.f32 %v2640_v58, %v1951_v32 }
0x160b   :  { %1961 = vrot.lane.b32.xlu0 %v1953_v11, %s2844_s15 }
0x160f   :  { %1993 = vrot.lane.b32.xlu0 %v1975_v34, %s2844_s15 }
0x1613   :  { %1997 = vrot.lane.b32.xlu0 %v1977_v33, %s2844_s15 }
0x1617   :  { %2001 = vrot.lane.b32.xlu0 %v1979_v1, %s2844_s15 }
0x1660   :  { %v1956_v0 = vpop.permute.xlu1 %1955 }
0x1661   :  { %1959 = vst.msk [vmem:[#allocation4 + $0x38] sm:$0xff] %vm290_vm2, %v1956_v0  ;;  %2029 = vst.msk [vmem:[#allocation16] sm:$0xff] %vm290_vm2, %v1956_v0 }
0x1664   :  { %v1992_v35 = vpop.permute.xlu1 %1991 }
0x1665   :  { %v2014_v23 = vsel %vm290_vm2, %v1966_v37, %v1992_v35 }
0x1666   :  { %2022 = vst.msk [vmem:[#allocation15 + $0x8] sm:$0xff] %vm127_vm1, %v2014_v23 }
0x1668   :  { %v1996_v38 = vpop.permute.xlu1 %1995  ;;  %v1972_v42 = vld [vmem:[#allocation4 + $0x38] sm:$0xff] }
0x1669   :  { %v2016_v39 = vsel %vm290_vm2, %v1968_v36, %v1996_v38 }
0x166a   :  { %2024 = vst.msk [vmem:[#allocation15 + $0x18] sm:$0xff] %vm127_vm1, %v2016_v39 }
0x166c   :  { %v2000_v3 = vpop.permute.xlu1 %1999 }
0x166d   :  { %v2018_v41 = vsel %vm290_vm2, %v1970_v40, %v2000_v3 }
0x166e   :  { %2026 = vst.msk [vmem:[#allocation15 + $0x28] sm:$0xff] %vm127_vm1, %v2018_v41 }
0x1670   :  { %v2004_v43 = vpop.permute.xlu1 %2003 }
0x1671   :  { %v2020_v44 = vsel %vm290_vm2, %v1972_v42, %v2004_v43 }
0x1672   :  { %2028 = vst.msk [vmem:[#allocation15 + $0x38] sm:$0xff] %vm127_vm1, %v2020_v44 }
0x1674   :  { %v2039_v45 = vpop.permute.xlu1 %2038 }
0x1675   :  { %2042 = vst.msk [vmem:[#allocation18 + $0x8] sm:$0xff] %vm290_vm2, %v2039_v45 }
0x167d   :  { %v1962_v46 = vpop.permute.xlu0 %1961 }
0x167e   :  { %1964 = vst.msk [vmem:[#allocation5] sm:$0xff] %vm290_vm2, %v1962_v46  ;;  %2031 = vst.msk [vmem:[#allocation16 + $0x8] sm:$0xff] %vm290_vm2, %v1962_v46 }
0x167f   :  { %2766 = shalt.err (!%p2763_p2)
}
0x1680   :  { %s2767_s23 = scalar_lea.hbm %s3316_s6, 256 }
0x1681   :  { %p2768_p3 = scmp.ne.s32.totalorder %s3316_s6, %s2767_s23  ;;  %p2771_p4 = scmp.lt.u32.totalorder %s2767_s23, %s3316_s6 }
0x1683   :  { %p2773_p5 = pnand %p2771_p4, %p2768_p3 }
0x1685   :  { %2776 = shalt.err (!%p2773_p5)
}
0x1686   :  { %2066 = dma.vmem_to_hbm [thread:$0]  %s2061_s19, 256, %s3316_s6, [#allocation17], %s2836_s25, %s2836_s25, %s2837_s27   ;;  %v1994_v9 = vpop.permute.xlu0 %1993  ;;  %v1967_v47 = vld [vmem:[#allocation4 + $0x10] sm:$0xff]  ;;  %v1969_v50 = vld [vmem:[#allocation4 + $0x20] sm:$0xff] }
0x1687   :  { %v2015_v48 = vsel %vm290_vm2, %v1967_v47, %v1994_v9  ;;  %v1973_v16 = vld [vmem:[#allocation5] sm:$0xff]  ;;  %v1971_v53 = vld [vmem:[#allocation4 + $0x30] sm:$0xff]  ;;  %s2847_s6 = smov [#allocation15]   ;;  %s2848_s30 = smov [#allocation18]  }
0x1688   :  { %2023 = vst.msk [vmem:[#allocation15 + $0x10] sm:$0xff] %vm127_vm1, %v2015_v48  ;;  %1989 = vrot.lane.b32.xlu0 %v1973_v16, %s2844_s15  ;;  %s2048_s29 = sshll.u32 %s2847_s6, 4  ;;  %s2072_s8 = sshll.u32 %s2848_s30, 4  ;;  %v1965_v56 = vld [vmem:[#allocation4] sm:$0xff]  ;;  %s2049_s29 = int_to_ptr.vmem [resolvable:$true] %s2048_s29  ;;  %s3272_s8 = int_to_ptr.vmem [resolvable:$true] %s2072_s8 }
0x1689   :  { %s2777_s9 = scalar_lea.vmem %s2049_s29, 1024  ;;  %p2782_p7 = scmp.lt.s32.totalorder %s2049_s29, %s2049_s29 }
0x168a   :  { %v1998_v49 = vpop.permute.xlu0 %1997  ;;  %p2778_p6 = scmp.ne.s32.totalorder %s2049_s29, %s2777_s9  ;;  %p2783_p8 = scmp.lt.s32.totalorder %s2777_s9, %s2777_s9 }
0x168b   :  { %v2017_v51 = vsel %vm290_vm2, %v1969_v50, %v1998_v49 }
0x168c   :  { %2025 = vst.msk [vmem:[#allocation15 + $0x20] sm:$0xff] %vm127_vm1, %v2017_v51  ;;  %2033 = vrot.lane.b32.xlu0 %v3218_v19, %s2845_s16  ;;  %p2784_p9 = por %p2783_p8, %p2782_p7 }
0x168e   :  { %v2002_v52 = vpop.permute.xlu0 %2001  ;;  %p2785_p10 = pnand %p2784_p9, %p2778_p6 }
0x168f   :  { %v2019_v54 = vsel %vm290_vm2, %v1971_v53, %v2002_v52 }
0x1690   :  { %2027 = vst.msk [vmem:[#allocation15 + $0x30] sm:$0xff] %vm127_vm1, %v2019_v54 }
0x16fa   :  { %v1990_v55 = vpop.permute.xlu0 %1989 }
0x16fb   :  { %v2013_v57 = vsel %vm290_vm2, %v1965_v56, %v1990_v55 }
0x16fc   :  { %2021 = vst.msk [vmem:[#allocation15] sm:$0xff] %vm127_vm1, %v2013_v57 }
0x16fd   :  { %2788 = shalt.err (!%p2785_p10)
}
0x16fe   :  { %s2789_s12 = scalar_lea.hbm %s3315_s5, 1024 }
0x16ff   :  { %p2790_p11 = scmp.ne.s32.totalorder %s3315_s5, %s2789_s12  ;;  %p2793_p12 = scmp.lt.u32.totalorder %s2789_s12, %s3315_s5 }
0x1701   :  { %p2795_p13 = pnand %p2793_p12, %p2790_p11 }
0x1703   :  { %2798 = shalt.err (!%p2795_p13)
}
0x1704   :  { %2054 = dma.vmem_to_hbm [thread:$0]  %s2049_s29, 1024, %s3315_s5, [#allocation8], %s2836_s25, %s2836_s25, %s2837_s27   ;;  %v2034_v59 = vpop.permute.xlu0 %2033 }
0x1705   :  { %2036 = vst.msk [vmem:[#allocation18] sm:$0xff] %vm290_vm2, %v2034_v59  ;;  %s2799_s16 = scalar_lea.vmem %s3272_s8, 256  ;;  %p2804_p1 = scmp.lt.s32.totalorder %s3272_s8, %s3272_s8 }
0x1706   :  { %p2800_p0 = scmp.ne.s32.totalorder %s3272_s8, %s2799_s16  ;;  %p2805_p2 = scmp.lt.s32.totalorder %s2799_s16, %s2799_s16 }
0x1708   :  { %p2806_p3 = por %p2805_p2, %p2804_p1 }
0x170a   :  { %p2807_p4 = pnand %p2806_p3, %p2800_p0 }
0x170c   :  { %2810 = shalt.err (!%p2807_p4)
}
0x170d   :  { %s2811_s20 = scalar_lea.hbm %s3317_s7, 256 }
0x170e   :  { %p2812_p5 = scmp.ne.s32.totalorder %s3317_s7, %s2811_s20  ;;  %p2815_p6 = scmp.lt.u32.totalorder %s2811_s20, %s3317_s7 }
0x1710   :  { %p2817_p7 = pnand %p2815_p6, %p2812_p5 }
0x1712   :  { %2820 = shalt.err (!%p2817_p7)
}
0x1713   :  { %2078 = dma.vmem_to_hbm [thread:$0]  %s3272_s8, 256, %s3317_s7, [#allocation17], %s2836_s25, %s2836_s25, %s2837_s27  }
0x1714   :  { %2827 = dma.done.wait [#allocation8], 1024  }
0x1715   :  { %2828 = vsyncadd [#allocation8], 4294966272 }
0x1716   :  { %2829 = dma.done.wait [#allocation17], 512  }
0x1717   :  { %2830 = vsyncadd [#allocation17], 4294966784 }
0x1718   :  { %2088 = vsyncpa [#allocation7], 1 }
0x1719   :  { %2089 = vsyncpa [#allocation10], 1 }
0x171a   :  { %2090 = vsyncpa [#allocation13], 1 }
0x171b   :  { %2091 = vsyncpa [#allocation8], 1 }
0x171c   :  { %2092 = vsyncpa [#allocation17], 1 }

// kernel: encoder_forward.2
= control target key start
LH: loop header
LB: loop body
LE: loop exit
PB: predicated region body
PF: predicated region fallthrough
CT: control target
= control target key end

     0   :  { %13 = vsyncpa [#allocation7], 0  ;;  %s3287_s0 = inlined_call_operand.hbm [shape: f32[8,8,16], index: 0, kind: input, shape index: {}]   ;;  %s3288_s1 = inlined_call_operand.hbm [shape: f32[16,256], index: 1, kind: input, shape index: {}]   ;;  %s3289_s2 = inlined_call_operand.hbm [shape: f32[32,128], index: 2, kind: input, shape index: {}]   ;;  %s3290_s3 = inlined_call_operand.hbm [shape: f32[32,128], index: 3, kind: input, shape index: {}]   ;;  %s3291_s4 = inlined_call_operand.hbm [shape: f32[1,256], index: 4, kind: input, shape index: {}]   ;;  %s3292_s5 = inlined_call_operand.hbm [shape: f32[8,8,64], index: 5, kind: output, shape index: {0}]   ;;  %s3293_s6 = inlined_call_operand.hbm [shape: f32[2,8,32], index: 6, kind: output, shape index: {1}]   ;;  %s3294_s7 = inlined_call_operand.hbm [shape: f32[2,8,32], index: 7, kind: output, shape index: {2}]  }
   0x1   :  { %14 = vsyncpa [#allocation10], 0 }
   0x2   :  { %15 = vsyncpa [#allocation13], 0 }
   0x3   :  { %16 = vsyncpa [#allocation8], 0 }
   0x4   :  { %17 = vsyncpa [#allocation17], 0  ;;  %s2808_s24 = smov [#allocation9]   ;;  %s2622_s28 = scalar_lea.hbm %s3288_s1, 512 }
   0x5   :  { %s35_s25 = sshll.u32 %s2808_s24, 4  ;;  %p2623_p0 = scmp.ne.s32.totalorder %s3288_s1, %s2622_s28  ;;  %s36_s25 = int_to_ptr.vmem [resolvable:$true] %s35_s25 }
   0x6   :  { %p2626_p1 = scmp.lt.u32.totalorder %s2622_s28, %s3288_s1 }
   0x8   :  { %p2628_p2 = pnand %p2626_p1, %p2623_p0 }
   0xa   :  { %2631 = shalt.err (!%p2628_p2)
}
   0xb   :  { %s2632_s10 = scalar_lea.vmem %s36_s25, 512  ;;  %p2637_p4 = scmp.lt.s32.totalorder %s36_s25, %s36_s25 }
   0xc   :  { %p2633_p3 = scmp.ne.s32.totalorder %s36_s25, %s2632_s10  ;;  %p2638_p5 = scmp.lt.s32.totalorder %s2632_s10, %s2632_s10 }
   0xe   :  { %p2639_p6 = por %p2638_p5, %p2637_p4 }
  0x10   :  { %p2640_p7 = pnand %p2639_p6, %p2633_p3 }
  0x12   :  { %2643 = shalt.err (!%p2640_p7)
}
  0x13   :  { %s2809_s11 = smov 256   ;;  %s2810_s12 = smov 16  }
  0x14   :  { %41 = dma.hbm_to_vmem [thread:$0]  %s3288_s1, 512, %s36_s25, [#allocation10], %s2809_s11, %s2809_s11, %s2810_s12  }
  0x15   :  { %s2811_s15 = smov [#allocation12]   ;;  %s2812_s17 = smov [#allocation6]  }
  0x16   :  { %s59_s16 = sshll.u32 %s2811_s15, 4  ;;  %s23_s18 = sshll.u32 %s2812_s17, 4  ;;  %s60_s16 = int_to_ptr.vmem [resolvable:$true] %s59_s16  ;;  %s24_s18 = int_to_ptr.vmem [resolvable:$true] %s23_s18 }
  0x17   :  { %s2644_s21 = scalar_lea.hbm %s3290_s3, 512 }
  0x18   :  { %p2645_p8 = scmp.ne.s32.totalorder %s3290_s3, %s2644_s21  ;;  %p2648_p9 = scmp.lt.u32.totalorder %s2644_s21, %s3290_s3 }
  0x1a   :  { %p2650_p10 = pnand %p2648_p9, %p2645_p8 }
  0x1c   :  { %2653 = shalt.err (!%p2650_p10)
}
  0x1d   :  { %s2654_s1 = scalar_lea.vmem %s60_s16, 512  ;;  %p2659_p12 = scmp.lt.s32.totalorder %s60_s16, %s60_s16 }
  0x1e   :  { %p2655_p11 = scmp.ne.s32.totalorder %s60_s16, %s2654_s1  ;;  %p2660_p13 = scmp.lt.s32.totalorder %s2654_s1, %s2654_s1 }
  0x20   :  { %p2661_p0 = por %p2660_p13, %p2659_p12 }
  0x22   :  { %p2662_p1 = pnand %p2661_p0, %p2655_p11 }
  0x24   :  { %2665 = shalt.err (!%p2662_p1)
}
  0x25   :  { %s2813_s25 = smov 128   ;;  %s2814_s27 = smov 8  }
  0x26   :  { %65 = dma.hbm_to_vmem [thread:$0]  %s3290_s3, 512, %s60_s16, [#allocation13], %s2813_s25, %s2813_s25, %s2814_s27  }
  0x27   :  { %s2666_s9 = scalar_lea.hbm %s3287_s0, 1024 }
  0x28   :  { %p2667_p2 = scmp.ne.s32.totalorder %s3287_s0, %s2666_s9  ;;  %p2670_p3 = scmp.lt.u32.totalorder %s2666_s9, %s3287_s0 }
  0x2a   :  { %p2672_p4 = pnand %p2670_p3, %p2667_p2 }
  0x2c   :  { %2675 = shalt.err (!%p2672_p4)
}
  0x2d   :  { %s2676_s14 = scalar_lea.vmem %s24_s18, 1024  ;;  %p2681_p6 = scmp.lt.s32.totalorder %s24_s18, %s24_s18 }
  0x2e   :  { %p2677_p5 = scmp.ne.s32.totalorder %s24_s18, %s2676_s14  ;;  %p2682_p7 = scmp.lt.s32.totalorder %s2676_s14, %s2676_s14 }
  0x30   :  { %p2683_p8 = por %p2682_p7, %p2681_p6 }
  0x32   :  { %p2684_p9 = pnand %p2683_p8, %p2677_p5 }
  0x34   :  { %2687 = shalt.err (!%p2684_p9)
}
  0x35   :  { %29 = dma.hbm_to_vmem [thread:$0]  %s3287_s0, 1024, %s24_s18, [#allocation7], %s2813_s25, %s2813_s25, %s2814_s27  }
  0x36   :  { %s2815_s16 = smov [#allocation11]   ;;  %s2816_s19 = smov [#allocation14]  }
  0x37   :  { %s47_s17 = sshll.u32 %s2815_s16, 4  ;;  %s72_s20 = sshll.u32 %s2816_s19, 4  ;;  %s48_s17 = int_to_ptr.vmem [resolvable:$true] %s47_s17  ;;  %s73_s20 = int_to_ptr.vmem [resolvable:$true] %s72_s20 }
  0x38   :  { %s2688_s23 = scalar_lea.hbm %s3289_s2, 512 }
  0x39   :  { %p2689_p10 = scmp.ne.s32.totalorder %s3289_s2, %s2688_s23  ;;  %p2692_p11 = scmp.lt.u32.totalorder %s2688_s23, %s3289_s2 }
  0x3b   :  { %p2694_p12 = pnand %p2692_p11, %p2689_p10 }
  0x3d   :  { %2697 = shalt.err (!%p2694_p12)
}
  0x3e   :  { %s2698_s0 = scalar_lea.vmem %s48_s17, 512  ;;  %p2703_p0 = scmp.lt.s32.totalorder %s48_s17, %s48_s17 }
  0x3f   :  { %p2699_p13 = scmp.ne.s32.totalorder %s48_s17, %s2698_s0  ;;  %p2704_p1 = scmp.lt.s32.totalorder %s2698_s0, %s2698_s0 }
  0x41   :  { %p2705_p2 = por %p2704_p1, %p2703_p0 }
  0x43   :  { %p2706_p3 = pnand %p2705_p2, %p2699_p13 }
  0x45   :  { %2709 = shalt.err (!%p2706_p3)
}
  0x46   :  { %53 = dma.hbm_to_vmem [thread:$0]  %s3289_s2, 512, %s48_s17, [#allocation10], %s2813_s25, %s2813_s25, %s2814_s27  }
  0x47   :  { %s2710_s9 = scalar_lea.hbm %s3291_s4, 32 }
  0x48   :  { %p2711_p4 = scmp.ne.s32.totalorder %s3291_s4, %s2710_s9  ;;  %p2714_p5 = scmp.lt.u32.totalorder %s2710_s9, %s3291_s4 }
  0x4a   :  { %p2716_p6 = pnand %p2714_p5, %p2711_p4 }
  0x4c   :  { %2719 = shalt.err (!%p2716_p6)
}
  0x4d   :  { %s2720_s14 = scalar_lea.vmem %s73_s20, 32  ;;  %p2725_p8 = scmp.lt.s32.totalorder %s73_s20, %s73_s20 }
  0x4e   :  { %p2721_p7 = scmp.ne.s32.totalorder %s73_s20, %s2720_s14  ;;  %p2726_p9 = scmp.lt.s32.totalorder %s2720_s14, %s2720_s14 }
  0x50   :  { %p2727_p10 = por %p2726_p9, %p2725_p8 }
  0x52   :  { %p2728_p11 = pnand %p2727_p10, %p2721_p7 }
  0x54   :  { %2731 = shalt.err (!%p2728_p11)
}
  0x55   :  { %75 = dma.hbm_to_vmem [thread:$0]  %s3291_s4, 32, %s73_s20, [#allocation13]  }
  0x56   :  { %2798 = dma.done.wait [#allocation7], 1024  }
  0x57   :  { %2799 = vsyncadd [#allocation7], 4294966272 }
  0x58   :  { %2800 = dma.done.wait [#allocation10], 1024  }
  0x59   :  { %2801 = vsyncadd [#allocation10], 4294966272 }
  0x5a   :  { %2802 = dma.done.wait [#allocation13], 544  }
  0x5b   :  { %2803 = vsyncadd [#allocation13], 4294966752  ;;  %v2817_v0 = vmov 0.0|0.0   ;;  %v2818_v1 = vmov 0.0   ;;  %vm2819_vm0 = vmmov 0   ;;  %v100_v2 = vld [vmem:[#allocation9 + $0x8] sm:$0xff]  ;;  %v105_v28 = vlaneseq }
  0x5c   :  { %2380 = vmatprep.subr.bf16.mxu1 %v2817_v0  ;;  %204 = vmatprep.mubr.f32.mxu0 %v2818_v1  ;;  %v102_v3 = vld [vmem:[#allocation9 + $0x18] sm:$0xff]  ;;  %v269_v4 = vld [vmem:[#allocation11] sm:$0xff]  ;;  %v270_v6 = vld [vmem:[#allocation11 + $0x8] sm:$0xff]  ;;  %vm115_vm1 = vcmask 130048   ;;  %s2820_s4 = smov 64   ;;  %s2821_s15 = smov 32  }
  0x5d   :  { %2208 = vmatprep.mubr.msk.f32.mxu1 %vm2819_vm0, %v2818_v1  ;;  %v2376_v5 = vpack.c.bf16 %v102_v3, %v100_v2  ;;  %v99_v7 = vld [vmem:[#allocation9] sm:$0xff]  ;;  %v101_v8 = vld [vmem:[#allocation9 + $0x10] sm:$0xff]  ;;  %v2939_v9 = vpack.c.bf16 %v270_v6, %v269_v4  ;;  %v272_v12 = vld [vmem:[#allocation11 + $0x18] sm:$0xff]  ;;  %v106_v29 = vshrl.u32 %v105_v28, 7  ;;  %vm278_vm2 = vcmask 261120   ;;  %s2822_s16 = smov 96  }
  0x5e   :  { %v2378_v10 = vpack.c.bf16 %v101_v8, %v99_v7  ;;  %v271_v11 = vld [vmem:[#allocation11 + $0x10] sm:$0xff]  ;;  %v91_v13 = vld [vmem:[#allocation6] sm:$0xff]  ;;  %v274_v16 = vld [vmem:[#allocation12 + $0x8] sm:$0xff]  ;;  %vm2009_vm3 = vcmask 523264   ;;  %s2823_s17 = smov [#allocation16]  }
  0x5f   :  { %2377 = vmatprep.subr.bf16.mxu0 %v2376_v5  ;;  %2382 = vmatpush3.bf16.msra.mxu1 %v2939_v9  ;;  %v2942_v14 = vpack.c.bf16 %v272_v12, %v271_v11  ;;  %v273_v15 = vld [vmem:[#allocation12] sm:$0xff]  ;;  %v92_v17 = vld [vmem:[#allocation6 + $0x8] sm:$0xff]  ;;  %v275_v19 = vld [vmem:[#allocation12 + $0x10] sm:$0xff]  ;;  %v107_v30 = vsub.s32 0, %v106_v29  ;;  %v111_v32 = vsub.s32 1, %v106_v29  ;;  %s2049_s19 = sshll.u32 %s2823_s17, 4  ;;  %s2050_s19 = int_to_ptr.vmem [resolvable:$true] %s2049_s19 }
  0x60   :  { %2379 = vmatpush1.bf16.msra.mxu0 %v2378_v10  ;;  %2383 = vmatprep.subr.bf16.mxu1 %v2817_v0  ;;  %v2949_v18 = vpack.c.bf16 %v274_v16, %v273_v15  ;;  %v276_v20 = vld [vmem:[#allocation12 + $0x18] sm:$0xff]  ;;  %v93_v21 = vld [vmem:[#allocation6 + $0x10] sm:$0xff]  ;;  %v95_v24 = vld [vmem:[#allocation6 + $0x20] sm:$0xff]  ;;  %s2732_s20 = scalar_lea.vmem %s2050_s19, 256  ;;  %p2737_p13 = scmp.lt.s32.totalorder %s2050_s19, %s2050_s19 }
  0x61   :  { %2404 = vmatprep.subr.bf16.mxu0 %v2817_v0  ;;  %v2958_v22 = vpack.c.bf16 %v276_v20, %v275_v19  ;;  %v94_v23 = vld [vmem:[#allocation6 + $0x18] sm:$0xff]  ;;  %v96_v25 = vld [vmem:[#allocation6 + $0x28] sm:$0xff]  ;;  %v97_v26 = vld [vmem:[#allocation6 + $0x30] sm:$0xff]  ;;  %p2733_p12 = scmp.ne.s32.totalorder %s2050_s19, %s2732_s20  ;;  %p2738_p0 = scmp.lt.s32.totalorder %s2732_s20, %s2732_s20 }
  0x62   :  { %v98_v27 = vld [vmem:[#allocation6 + $0x38] sm:$0xff]  ;;  %v103_v31 = vld [vmem:[#allocation14] sm:$0x3] }
  0x63   :  { %2082 = vmatmul.mubr.msk.f32.vlgmr.msra.gmra.mrb[0].mxu0 %vm115_vm1, %v91_v13  ;;  %2385 = vmatpush3.bf16.msra.mxu1 %v2942_v14  ;;  %v108_v33 = vrot.slane %v103_v31, %v107_v30  ;;  %v112_v34 = vrot.slane %v103_v31, %v111_v32  ;;  %p2739_p1 = por %p2738_p0, %p2737_p13 }
  0x64   :  { %210 = vmatprep.mubr.f32.mxu0 %v2818_v1  ;;  %2386 = vmatprep.subr.bf16.mxu1 %v2817_v0 }
  0x65   :  { %2406 = vmatpush3.bf16.msra.mxu0 %v2939_v9  ;;  %p2740_p2 = pnand %p2739_p1, %p2733_p12 }
  0x66   :  { %2407 = vmatprep.subr.bf16.mxu0 %v2817_v0  ;;  %2209 = vmatmul.mubr.f32.vlgmr.msra.gmra.mrb[0].mxu1 %v2818_v1 }
  0x67   :  { %2083 = vmatmul.mubr.msk.f32.gmra.mrb[2].mxu0 %vm115_vm1, %v92_v17  ;;  %2388 = vmatpush3.bf16.msra.mxu1 %v2949_v18 }
  0x68   :  { %216 = vmatprep.mubr.f32.mxu0 %v2818_v1  ;;  %2389 = vmatprep.subr.bf16.mxu1 %v2817_v0 }
  0x69   :  { %2219 = vmatprep.mubr.msk.f32.mxu1 %vm2819_vm0, %v2818_v1  ;;  %2409 = vmatpush3.bf16.msra.mxu0 %v2942_v14 }
  0x6a   :  { %2416 = vmatprep.subr.bf16.mxu0 %v2817_v0 }
  0x6b   :  { %2084 = vmatmul.mubr.msk.f32.gmra.mrb[4].mxu0 %vm115_vm1, %v93_v21  ;;  %2391 = vmatpush3.bf16.msra.mxu1 %v2958_v22 }
  0x6c   :  { %222 = vmatprep.mubr.f32.mxu0 %v2818_v1  ;;  %2392 = vmatprep.subr.bf16.mxu1 %v2817_v0 }
  0x6e   :  { %2220 = vmatmul.mubr.f32.vlgmr.msra.gmra.mrb[2].mxu1 %v2818_v1 }
  0x6f   :  { %2085 = vmatmul.mubr.msk.f32.gmra.mrb[6].mxu0 %vm115_vm1, %v94_v23  ;;  %2394 = vmatpush3.bf16.msra.mxu1 %v2939_v9 }
  0x70   :  { %228 = vmatprep.mubr.f32.mxu0 %v2818_v1  ;;  %2395 = vmatprep.subr.bf16.mxu1 %v2817_v0 }
  0x71   :  { %2230 = vmatprep.mubr.msk.f32.mxu1 %vm2819_vm0, %v2818_v1 }
  0x73   :  { %2086 = vmatmul.mubr.msk.f32.gmra.mrb[8].mxu0 %vm115_vm1, %v95_v24  ;;  %2397 = vmatpush3.bf16.msra.mxu1 %v2942_v14 }
  0x74   :  { %234 = vmatprep.mubr.f32.mxu0 %v2818_v1  ;;  %2398 = vmatprep.subr.bf16.mxu1 %v2817_v0 }
  0x77   :  { %2087 = vmatmul.mubr.msk.f32.gmra.mrb[10].mxu0 %vm115_vm1, %v96_v25 }
  0x78   :  { %240 = vmatprep.mubr.f32.mxu0 %v2818_v1 }
  0x7b   :  { %2088 = vmatmul.mubr.msk.f32.gmra.mrb[12].mxu0 %vm115_vm1, %v97_v26 }
  0x7c   :  { %246 = vmatprep.mubr.f32.mxu0 %v2818_v1 }
  0x7f   :  { %2089 = vmatmul.mubr.msk.f32.gmra.mrb[14].mxu0 %vm115_vm1, %v98_v27 }
  0x80   :  { %2252 = vmatprep.mubr.msk.f32.mxu0 %vm2819_vm0, %v2818_v1 }
 0x136   :  { %v206_v35 = vpop.f32.mrb[0].mxu0 }
 0x137   :  { %v207_v36 = vadd.f32 %v206_v35, %v108_v33  ;;  %v208_v37 = vpop.f32.mrb[1].mxu0 }
 0x138   :  { %v2987_v38 = vadd.f32 %v208_v37, %v112_v34 }
 0x139   :  { %v348_v39 = vpop.f32.mrb[0].mxu1 }
 0x13a   :  { %v212_v40 = vpop.f32.mrb[2].mxu0  ;;  %v352_v41 = vadd.f32 %v348_v39, %v207_v36  ;;  %v2210_v44 = vpop.f32.mrb[1].mxu1 }
 0x13b   :  { %v2989_v42 = vadd.f32 %v212_v40, %v108_v33  ;;  %v214_v43 = vpop.f32.mrb[3].mxu0 }
 0x13c   :  { %v2991_v45 = vadd.f32 %v214_v43, %v112_v34  ;;  %2494 = vtanh.f32 %v352_v41  ;;  %v2090_v15 = vmul.f32 -1.442695, %v352_v41 }
 0x13e   :  { %v218_v46 = vpop.f32.mrb[4].mxu0 }
 0x13f   :  { %v2993_v47 = vadd.f32 %v218_v46, %v108_v33  ;;  %v220_v48 = vpop.f32.mrb[5].mxu0 }
 0x140   :  { %v2995_v49 = vadd.f32 %v220_v48, %v112_v34 }
 0x141   :  { %v421_v51 = vpop.f32.mrb[2].mxu1 }
 0x142   :  { %v224_v50 = vpop.f32.mrb[6].mxu0  ;;  %v2221_v54 = vpop.f32.mrb[3].mxu1 }
 0x143   :  { %v2997_v52 = vadd.f32 %v224_v50, %v108_v33  ;;  %v226_v53 = vpop.f32.mrb[7].mxu0 }
 0x144   :  { %v2999_v55 = vadd.f32 %v226_v53, %v112_v34 }
 0x146   :  { %v230_v56 = vpop.f32.mrb[8].mxu0  ;;  %v2495_v57 = vpop.eup %2494 }
 0x147   :  { %v3001_v58 = vadd.f32 %v230_v56, %v108_v33  ;;  %v232_v59 = vpop.f32.mrb[9].mxu0  ;;  %435 = vrot.lane.b32.xlu0 %v2495_v57, %s2820_s4 }
 0x148   :  { %v3003_v60 = vadd.f32 %v232_v59, %v112_v34 }
 0x14a   :  { %v236_v61 = vpop.f32.mrb[10].mxu0 }
 0x14b   :  { %v3006_v62 = vadd.f32 %v236_v61, %v108_v33  ;;  %v238_v63 = vpop.f32.mrb[11].mxu0 }
 0x14c   :  { %v3008_v2 = vadd.f32 %v238_v63, %v112_v34 }
 0x14e   :  { %v242_v3 = vpop.f32.mrb[12].mxu0 }
 0x14f   :  { %v3010_v4 = vadd.f32 %v242_v3, %v108_v33  ;;  %v244_v5 = vpop.f32.mrb[13].mxu0 }
 0x150   :  { %v3012_v6 = vadd.f32 %v244_v5, %v112_v34 }
 0x152   :  { %v248_v7 = vpop.f32.mrb[14].mxu0 }
 0x153   :  { %v3014_v8 = vadd.f32 %v248_v7, %v108_v33  ;;  %v250_v10 = vpop.f32.mrb[15].mxu0 }
 0x154   :  { %v251_v11 = vadd.f32 %v250_v10, %v112_v34 }
 0x156   :  { %v425_v12 = vadd.f32 %v421_v51, %v251_v11 }
 0x158   :  { %2496 = vtanh.f32 %v425_v12  ;;  %v2091_v19 = vmul.f32 -1.442695, %v425_v12 }
 0x159   :  { %2498 = vpow2.f32 %v2090_v15 }
 0x162   :  { %v2497_v13 = vpop.eup %2496 }
 0x163   :  { %459 = vrot.lane.b32.xlu0 %v2497_v13, %s2820_s4  ;;  %v2499_v16 = vpop.eup %2498 }
 0x164   :  { %v429_v17 = vadd.f32 1.0, %v2499_v16 }
 0x166   :  { %2500 = vrcp.f32 %v429_v17 }
 0x167   :  { %2502 = vpow2.f32 %v2091_v19 }
 0x170   :  { %v2501_v20 = vpop.eup %2500 }
 0x171   :  { %v2503_v24 = vpop.eup %2502  ;;  %v433_v29 = vmul.f32 0.0, %v2501_v20 }
 0x172   :  { %v453_v25 = vadd.f32 1.0, %v2503_v24 }
 0x174   :  { %2504 = vrcp.f32 %v453_v25 }
 0x17e   :  { %v2505_v26 = vpop.eup %2504 }
 0x17f   :  { %v457_v33 = vmul.f32 0.0, %v2505_v26 }
 0x1b9   :  { %v436_v21 = vpop.permute.xlu0 %435 }
 0x1ba   :  { %v438_v23 = vmul.f32 %v2501_v20, %v436_v21 }
 0x1bc   :  { %440 = vrot.lane.b32.xlu1 %v438_v23, %s2821_s15 }
 0x1d5   :  { %v460_v27 = vpop.permute.xlu0 %459 }
 0x1d6   :  { %v462_v28 = vmul.f32 %v2505_v26, %v460_v27 }
 0x1d8   :  { %464 = vrot.lane.b32.xlu1 %v462_v28, %s2821_s15 }
 0x22e   :  { %v441_v30 = vpop.permute.xlu1 %440 }
 0x22f   :  { %v3019_v31 = vadd.f32 %v441_v30, %v433_v29 }
 0x231   :  { %2506 = vtanh.f32 %v3019_v31 }
 0x23b   :  { %v2507_v32 = vpop.eup %2506 }
 0x23c   :  { %446 = vrot.lane.b32.xlu0 %v2507_v32, %s2820_s4 }
 0x24a   :  { %v465_v34 = vpop.permute.xlu1 %464 }
 0x24b   :  { %v3023_v35 = vadd.f32 %v465_v34, %v457_v33 }
 0x24d   :  { %2508 = vtanh.f32 %v3023_v35 }
 0x257   :  { %v2509_v36 = vpop.eup %2508 }
 0x258   :  { %470 = vrot.lane.b32.xlu1 %v2509_v36, %s2820_s4 }
 0x2ae   :  { %v447_v37 = vpop.permute.xlu0 %446 }
 0x2af   :  { %v449_v39 = vmul.f32 %v2501_v20, %v447_v37 }
 0x2b1   :  { %475 = vrot.lane.b32.xlu0 %v449_v39, %s2821_s15 }
 0x2ca   :  { %v471_v40 = vpop.permute.xlu1 %470 }
 0x2cb   :  { %v473_v41 = vmul.f32 %v2505_v26, %v471_v40 }
 0x2cd   :  { %480 = vrot.lane.b32.xlu1 %v473_v41, %s2821_s15 }
 0x323   :  { %v476_v43 = vpop.permute.xlu0 %475 }
 0x324   :  { %478 = vst.msk [vmem:[#allocation4] sm:$0xff] %vm278_vm2, %v476_v43  ;;  %2231 = vmatmul.mubr.msk.f32.vlgmr.msra.gmra.mrb[4].mxu1 %vm278_vm2, %v476_v43 }
 0x325   :  { %2400 = vmatpush3.bf16.msra.mxu1 %v2949_v18  ;;  %2241 = vmatprep.mubr.msk.f32.mxu1 %vm2819_vm0, %v2818_v1 }
 0x326   :  { %2401 = vmatprep.subr.bf16.mxu1 %v2817_v0 }
 0x329   :  { %2403 = vmatpush3.bf16.msra.mxu1 %v2958_v22 }
 0x32a   :  { %2410 = vmatprep.subr.bf16.mxu1 %v2817_v0 }
 0x33f   :  { %v481_v44 = vpop.permute.xlu1 %480 }
 0x340   :  { %484 = vst.msk [vmem:[#allocation5 + $0x38] sm:$0xff] %vm278_vm2, %v481_v44  ;;  %2242 = vmatmul.mubr.msk.f32.vlgmr.msra.gmra.mrb[6].mxu1 %vm278_vm2, %v481_v44 }
 0x341   :  { %2412 = vmatpush3.bf16.msra.mxu1 %v2949_v18  ;;  %2263 = vmatprep.mubr.msk.f32.mxu1 %vm2819_vm0, %v2818_v1 }
 0x342   :  { %2413 = vmatprep.subr.bf16.mxu1 %v2817_v0 }
 0x345   :  { %2415 = vmatpush3.bf16.msra.mxu1 %v2958_v22 }
 0x346   :  { %2422 = vmatprep.subr.bf16.mxu1 %v2817_v0 }
 0x3f7   :  { %v555_v46 = vpop.f32.mrb[4].mxu1 }
 0x3f8   :  { %v559_v48 = vadd.f32 %v555_v46, %v2989_v42  ;;  %v2232_v50 = vpop.f32.mrb[5].mxu1 }
 0x3fa   :  { %2510 = vtanh.f32 %v559_v48  ;;  %v2094_v59 = vmul.f32 -1.442695, %v559_v48 }
 0x404   :  { %v2511_v51 = vpop.eup %2510 }
 0x405   :  { %644 = vrot.lane.b32.xlu1 %v2511_v51, %s2820_s4 }
 0x413   :  { %v630_v53 = vpop.f32.mrb[6].mxu1 }
 0x414   :  { %v634_v54 = vadd.f32 %v630_v53, %v3012_v6  ;;  %v2243_v56 = vpop.f32.mrb[7].mxu1 }
 0x416   :  { %2512 = vtanh.f32 %v634_v54  ;;  %v2095_v3 = vmul.f32 -1.442695, %v634_v54 }
 0x417   :  { %2514 = vpow2.f32 %v2094_v59 }
 0x420   :  { %v2513_v57 = vpop.eup %2512 }
 0x421   :  { %668 = vrot.lane.b32.xlu0 %v2513_v57, %s2820_s4  ;;  %v2515_v61 = vpop.eup %2514 }
 0x422   :  { %v638_v63 = vadd.f32 1.0, %v2515_v61 }
 0x424   :  { %2516 = vrcp.f32 %v638_v63 }
 0x425   :  { %2518 = vpow2.f32 %v2095_v3 }
 0x42e   :  { %v2517_v42 = vpop.eup %2516 }
 0x42f   :  { %v2519_v10 = vpop.eup %2518  ;;  %v642_v15 = vmul.f32 %v2517_v42, %v3019_v31 }
 0x430   :  { %v662_v11 = vadd.f32 1.0, %v2519_v10 }
 0x432   :  { %2520 = vrcp.f32 %v662_v11 }
 0x43c   :  { %v2521_v6 = vpop.eup %2520 }
 0x43d   :  { %v666_v20 = vmul.f32 %v2521_v6, %v3023_v35 }
 0x477   :  { %v645_v5 = vpop.permute.xlu1 %644 }
 0x478   :  { %v647_v7 = vmul.f32 %v2517_v42, %v645_v5 }
 0x47a   :  { %649 = vrot.lane.b32.xlu1 %v647_v7, %s2821_s15 }
 0x493   :  { %v669_v12 = vpop.permute.xlu0 %668 }
 0x494   :  { %v671_v13 = vmul.f32 %v2521_v6, %v669_v12 }
 0x496   :  { %673 = vrot.lane.b32.xlu0 %v671_v13, %s2821_s15 }
 0x4ec   :  { %v650_v16 = vpop.permute.xlu1 %649 }
 0x4ed   :  { %v652_v17 = vadd.f32 %v650_v16, %v642_v15 }
 0x4ef   :  { %2522 = vtanh.f32 %v652_v17 }
 0x4f9   :  { %v2523_v19 = vpop.eup %2522 }
 0x4fa   :  { %655 = vrot.lane.b32.xlu1 %v2523_v19, %s2820_s4 }
 0x508   :  { %v674_v21 = vpop.permute.xlu0 %673 }
 0x509   :  { %v676_v23 = vadd.f32 %v674_v21, %v666_v20 }
 0x50b   :  { %2524 = vtanh.f32 %v676_v23 }
 0x515   :  { %v2525_v24 = vpop.eup %2524 }
 0x516   :  { %679 = vrot.lane.b32.xlu0 %v2525_v24, %s2820_s4 }
 0x56c   :  { %v656_v25 = vpop.permute.xlu1 %655 }
 0x56d   :  { %v658_v26 = vmul.f32 %v2517_v42, %v656_v25 }
 0x56f   :  { %684 = vrot.lane.b32.xlu1 %v658_v26, %s2821_s15 }
 0x588   :  { %v680_v27 = vpop.permute.xlu0 %679 }
 0x589   :  { %v682_v28 = vmul.f32 %v2521_v6, %v680_v27 }
 0x58b   :  { %690 = vrot.lane.b32.xlu0 %v682_v28, %s2821_s15 }
 0x5e1   :  { %v685_v29 = vpop.permute.xlu1 %684 }
 0x5e2   :  { %688 = vst.msk [vmem:[#allocation4 + $0x8] sm:$0xff] %vm278_vm2, %v685_v29  ;;  %2253 = vmatmul.mubr.msk.f32.vlgmr.msra.gmra.mrb[16].mxu0 %vm278_vm2, %v685_v29 }
 0x5e3   :  { %2418 = vmatpush3.bf16.msra.mxu0 %v2939_v9  ;;  %2274 = vmatprep.mubr.msk.f32.mxu0 %vm2819_vm0, %v2818_v1 }
 0x5e4   :  { %2419 = vmatprep.subr.bf16.mxu0 %v2817_v0 }
 0x5e7   :  { %2421 = vmatpush3.bf16.msra.mxu0 %v2942_v14 }
 0x5e8   :  { %2428 = vmatprep.subr.bf16.mxu0 %v2817_v0 }
 0x5fd   :  { %v691_v30 = vpop.permute.xlu0 %690 }
 0x5fe   :  { %694 = vst.msk [vmem:[#allocation5 + $0x30] sm:$0xff] %vm278_vm2, %v691_v30  ;;  %2264 = vmatmul.mubr.msk.f32.vlgmr.msra.gmra.mrb[8].mxu1 %vm278_vm2, %v691_v30 }
 0x5ff   :  { %2424 = vmatpush3.bf16.msra.mxu1 %v2949_v18  ;;  %2285 = vmatprep.mubr.msk.f32.mxu1 %vm2819_vm0, %v2818_v1 }
 0x600   :  { %2425 = vmatprep.subr.bf16.mxu1 %v2817_v0 }
 0x603   :  { %2427 = vmatpush3.bf16.msra.mxu1 %v2958_v22 }
 0x604   :  { %2434 = vmatprep.subr.bf16.mxu1 %v2817_v0 }
 0x6b5   :  { %v765_v31 = vpop.f32.mrb[16].mxu0 }
 0x6b6   :  { %v769_v32 = vadd.f32 %v765_v31, %v2993_v47  ;;  %v2254_v33 = vpop.f32.mrb[17].mxu0 }
 0x6b8   :  { %2526 = vtanh.f32 %v769_v32  ;;  %v2098_v40 = vmul.f32 -1.442695, %v769_v32 }
 0x6c2   :  { %v2527_v34 = vpop.eup %2526 }
 0x6c3   :  { %854 = vrot.lane.b32.xlu1 %v2527_v34, %s2820_s4 }
 0x6d1   :  { %v840_v35 = vpop.f32.mrb[8].mxu1 }
 0x6d2   :  { %v844_v36 = vadd.f32 %v840_v35, %v3008_v2  ;;  %v2265_v37 = vpop.f32.mrb[9].mxu1 }
 0x6d4   :  { %2528 = vtanh.f32 %v844_v36  ;;  %v2099_v44 = vmul.f32 -1.442695, %v844_v36 }
 0x6d5   :  { %2530 = vpow2.f32 %v2098_v40 }
 0x6de   :  { %v2529_v39 = vpop.eup %2528 }
 0x6df   :  { %878 = vrot.lane.b32.xlu0 %v2529_v39, %s2820_s4  ;;  %v2531_v41 = vpop.eup %2530 }
 0x6e0   :  { %v848_v43 = vadd.f32 1.0, %v2531_v41 }
 0x6e2   :  { %2532 = vrcp.f32 %v848_v43 }
 0x6e3   :  { %2534 = vpow2.f32 %v2099_v44 }
 0x6ec   :  { %v2533_v47 = vpop.eup %2532 }
 0x6ed   :  { %v2535_v50 = vpop.eup %2534  ;;  %v852_v56 = vmul.f32 %v2533_v47, %v652_v17 }
 0x6ee   :  { %v872_v51 = vadd.f32 1.0, %v2535_v50 }
 0x6f0   :  { %2536 = vrcp.f32 %v872_v51 }
 0x6fa   :  { %v2537_v2 = vpop.eup %2536 }
 0x6fb   :  { %v876_v63 = vmul.f32 %v2537_v2, %v676_v23 }
 0x735   :  { %v855_v46 = vpop.permute.xlu1 %854 }
 0x736   :  { %v857_v48 = vmul.f32 %v2533_v47, %v855_v46 }
 0x738   :  { %859 = vrot.lane.b32.xlu1 %v857_v48, %s2821_s15 }
 0x751   :  { %v879_v53 = vpop.permute.xlu0 %878 }
 0x752   :  { %v881_v54 = vmul.f32 %v2537_v2, %v879_v53 }
 0x754   :  { %883 = vrot.lane.b32.xlu0 %v881_v54, %s2821_s15 }
 0x7aa   :  { %v860_v57 = vpop.permute.xlu1 %859 }
 0x7ab   :  { %v862_v59 = vadd.f32 %v860_v57, %v852_v56 }
 0x7ad   :  { %2538 = vtanh.f32 %v862_v59 }
 0x7b7   :  { %v2539_v61 = vpop.eup %2538 }
 0x7b8   :  { %865 = vrot.lane.b32.xlu1 %v2539_v61, %s2820_s4 }
 0x7c6   :  { %v884_v3 = vpop.permute.xlu0 %883 }
 0x7c7   :  { %v886_v42 = vadd.f32 %v884_v3, %v876_v63 }
 0x7c9   :  { %2540 = vtanh.f32 %v886_v42 }
 0x7d3   :  { %v2541_v5 = vpop.eup %2540 }
 0x7d4   :  { %889 = vrot.lane.b32.xlu0 %v2541_v5, %s2820_s4 }
 0x82a   :  { %v866_v7 = vpop.permute.xlu1 %865 }
 0x82b   :  { %v868_v10 = vmul.f32 %v2533_v47, %v866_v7 }
 0x82d   :  { %894 = vrot.lane.b32.xlu1 %v868_v10, %s2821_s15 }
 0x846   :  { %v890_v11 = vpop.permute.xlu0 %889 }
 0x847   :  { %v892_v6 = vmul.f32 %v2537_v2, %v890_v11 }
 0x849   :  { %900 = vrot.lane.b32.xlu0 %v892_v6, %s2821_s15 }
 0x89f   :  { %v895_v12 = vpop.permute.xlu1 %894 }
 0x8a0   :  { %898 = vst.msk [vmem:[#allocation4 + $0x10] sm:$0xff] %vm278_vm2, %v895_v12  ;;  %2275 = vmatmul.mubr.msk.f32.vlgmr.msra.gmra.mrb[18].mxu0 %vm278_vm2, %v895_v12 }
 0x8a1   :  { %2430 = vmatpush3.bf16.msra.mxu0 %v2939_v9  ;;  %2296 = vmatprep.mubr.msk.f32.mxu0 %vm2819_vm0, %v2818_v1 }
 0x8a2   :  { %2431 = vmatprep.subr.bf16.mxu0 %v2817_v0 }
 0x8a5   :  { %2433 = vmatpush3.bf16.msra.mxu0 %v2942_v14 }
 0x8a6   :  { %2440 = vmatprep.subr.bf16.mxu0 %v2817_v0 }
 0x8bb   :  { %v901_v13 = vpop.permute.xlu0 %900 }
 0x8bc   :  { %904 = vst.msk [vmem:[#allocation5 + $0x28] sm:$0xff] %vm278_vm2, %v901_v13  ;;  %2286 = vmatmul.mubr.msk.f32.vlgmr.msra.gmra.mrb[10].mxu1 %vm278_vm2, %v901_v13 }
 0x8bd   :  { %2436 = vmatpush3.bf16.msra.mxu1 %v2949_v18  ;;  %2307 = vmatprep.mubr.msk.f32.mxu1 %vm2819_vm0, %v2818_v1 }
 0x8be   :  { %2437 = vmatprep.subr.bf16.mxu1 %v2817_v0 }
 0x8c1   :  { %2439 = vmatpush3.bf16.msra.mxu1 %v2958_v22 }
 0x8c2   :  { %2446 = vmatprep.subr.bf16.mxu1 %v2817_v0 }
 0x973   :  { %v975_v15 = vpop.f32.mrb[18].mxu0 }
 0x974   :  { %v979_v16 = vadd.f32 %v975_v15, %v2997_v52  ;;  %v2276_v17 = vpop.f32.mrb[19].mxu0 }
 0x976   :  { %2542 = vtanh.f32 %v979_v16  ;;  %v2102_v25 = vmul.f32 -1.442695, %v979_v16 }
 0x980   :  { %v2543_v19 = vpop.eup %2542 }
 0x981   :  { %1064 = vrot.lane.b32.xlu1 %v2543_v19, %s2820_s4 }
 0x98f   :  { %v1050_v20 = vpop.f32.mrb[10].mxu1 }
 0x990   :  { %v1054_v21 = vadd.f32 %v1050_v20, %v3003_v60  ;;  %v2287_v23 = vpop.f32.mrb[11].mxu1 }
 0x992   :  { %2544 = vtanh.f32 %v1054_v21  ;;  %v2103_v28 = vmul.f32 -1.442695, %v1054_v21 }
 0x993   :  { %2546 = vpow2.f32 %v2102_v25 }
 0x99c   :  { %v2545_v24 = vpop.eup %2544 }
 0x99d   :  { %1088 = vrot.lane.b32.xlu0 %v2545_v24, %s2820_s4  ;;  %v2547_v26 = vpop.eup %2546 }
 0x99e   :  { %v1058_v27 = vadd.f32 1.0, %v2547_v26 }
 0x9a0   :  { %2548 = vrcp.f32 %v1058_v27 }
 0x9a1   :  { %2550 = vpow2.f32 %v2103_v28 }
 0x9aa   :  { %v2549_v52 = vpop.eup %2548 }
 0x9ab   :  { %v2551_v31 = vpop.eup %2550  ;;  %v1062_v35 = vmul.f32 %v2549_v52, %v862_v59 }
 0x9ac   :  { %v1082_v32 = vadd.f32 1.0, %v2551_v31 }
 0x9ae   :  { %2552 = vrcp.f32 %v1082_v32 }
 0x9b8   :  { %v2553_v60 = vpop.eup %2552 }
 0x9b9   :  { %v1086_v40 = vmul.f32 %v2553_v60, %v886_v42 }
 0x9f3   :  { %v1065_v29 = vpop.permute.xlu1 %1064 }
 0x9f4   :  { %v1067_v30 = vmul.f32 %v2549_v52, %v1065_v29 }
 0x9f6   :  { %1069 = vrot.lane.b32.xlu1 %v1067_v30, %s2821_s15 }
 0xa0f   :  { %v1089_v33 = vpop.permute.xlu0 %1088 }
 0xa10   :  { %v1091_v34 = vmul.f32 %v2553_v60, %v1089_v33 }
 0xa12   :  { %1093 = vrot.lane.b32.xlu0 %v1091_v34, %s2821_s15 }
 0xa68   :  { %v1070_v36 = vpop.permute.xlu1 %1069 }
 0xa69   :  { %v1072_v37 = vadd.f32 %v1070_v36, %v1062_v35 }
 0xa6b   :  { %2554 = vtanh.f32 %v1072_v37 }
 0xa75   :  { %v2555_v39 = vpop.eup %2554 }
 0xa76   :  { %1075 = vrot.lane.b32.xlu1 %v2555_v39, %s2820_s4 }
 0xa84   :  { %v1094_v41 = vpop.permute.xlu0 %1093 }
 0xa85   :  { %v1096_v43 = vadd.f32 %v1094_v41, %v1086_v40 }
 0xa87   :  { %2556 = vtanh.f32 %v1096_v43 }
 0xa91   :  { %v2557_v44 = vpop.eup %2556 }
 0xa92   :  { %1099 = vrot.lane.b32.xlu0 %v2557_v44, %s2820_s4 }
 0xae8   :  { %v1076_v47 = vpop.permute.xlu1 %1075 }
 0xae9   :  { %v1078_v46 = vmul.f32 %v2549_v52, %v1076_v47 }
 0xaeb   :  { %1104 = vrot.lane.b32.xlu1 %v1078_v46, %s2821_s15 }
 0xb04   :  { %v1100_v48 = vpop.permute.xlu0 %1099 }
 0xb05   :  { %v1102_v50 = vmul.f32 %v2553_v60, %v1100_v48 }
 0xb07   :  { %1110 = vrot.lane.b32.xlu0 %v1102_v50, %s2821_s15 }
 0xb5d   :  { %v1105_v51 = vpop.permute.xlu1 %1104 }
 0xb5e   :  { %1108 = vst.msk [vmem:[#allocation4 + $0x18] sm:$0xff] %vm278_vm2, %v1105_v51  ;;  %2297 = vmatmul.mubr.msk.f32.vlgmr.msra.gmra.mrb[20].mxu0 %vm278_vm2, %v1105_v51 }
 0xb5f   :  { %2442 = vmatpush3.bf16.msra.mxu0 %v2939_v9  ;;  %2318 = vmatprep.mubr.msk.f32.mxu0 %vm2819_vm0, %v2818_v1 }
 0xb60   :  { %2443 = vmatprep.subr.bf16.mxu0 %v2817_v0 }
 0xb63   :  { %2445 = vmatpush3.bf16.msra.mxu0 %v2942_v14 }
 0xb64   :  { %2452 = vmatprep.subr.bf16.mxu0 %v2817_v0 }
 0xb79   :  { %v1111_v2 = vpop.permute.xlu0 %1110 }
 0xb7a   :  { %1114 = vst.msk [vmem:[#allocation5 + $0x20] sm:$0xff] %vm278_vm2, %v1111_v2  ;;  %2308 = vmatmul.mubr.msk.f32.vlgmr.msra.gmra.mrb[12].mxu1 %vm278_vm2, %v1111_v2 }
 0xb7b   :  { %2448 = vmatpush3.bf16.msra.mxu1 %v2949_v18  ;;  %2329 = vmatprep.mubr.msk.f32.mxu1 %vm2819_vm0, %v2818_v1 }
 0xb7c   :  { %2449 = vmatprep.subr.bf16.mxu1 %v2817_v0 }
 0xb7f   :  { %2451 = vmatpush3.bf16.msra.mxu1 %v2958_v22 }
 0xb80   :  { %2458 = vmatprep.subr.bf16.mxu1 %v2817_v0 }
 0xc31   :  { %v1185_v53 = vpop.f32.mrb[20].mxu0 }
 0xc32   :  { %v1189_v54 = vadd.f32 %v1185_v53, %v3001_v58  ;;  %v2298_v56 = vpop.f32.mrb[21].mxu0 }
 0xc34   :  { %2558 = vtanh.f32 %v1189_v54  ;;  %v2106_v42 = vmul.f32 -1.442695, %v1189_v54 }
 0xc3e   :  { %v2559_v57 = vpop.eup %2558 }
 0xc3f   :  { %1274 = vrot.lane.b32.xlu1 %v2559_v57, %s2820_s4 }
 0xc4d   :  { %v1260_v59 = vpop.f32.mrb[12].mxu1 }
 0xc4e   :  { %v1264_v61 = vadd.f32 %v1260_v59, %v2999_v55  ;;  %v2309_v63 = vpop.f32.mrb[13].mxu1 }
 0xc50   :  { %2560 = vtanh.f32 %v1264_v61  ;;  %v2107_v10 = vmul.f32 -1.442695, %v1264_v61 }
 0xc51   :  { %2562 = vpow2.f32 %v2106_v42 }
 0xc5a   :  { %v2561_v3 = vpop.eup %2560 }
 0xc5b   :  { %1298 = vrot.lane.b32.xlu0 %v2561_v3, %s2820_s4  ;;  %v2563_v5 = vpop.eup %2562 }
 0xc5c   :  { %v1268_v7 = vadd.f32 1.0, %v2563_v5 }
 0xc5e   :  { %2564 = vrcp.f32 %v1268_v7 }
 0xc5f   :  { %2566 = vpow2.f32 %v2107_v10 }
 0xc68   :  { %v2565_v58 = vpop.eup %2564 }
 0xc69   :  { %v2567_v12 = vpop.eup %2566  ;;  %v1272_v17 = vmul.f32 %v2565_v58, %v1072_v37 }
 0xc6a   :  { %v1292_v13 = vadd.f32 1.0, %v2567_v12 }
 0xc6c   :  { %2568 = vrcp.f32 %v1292_v13 }
 0xc76   :  { %v2569_v55 = vpop.eup %2568 }
 0xc77   :  { %v1296_v23 = vmul.f32 %v2569_v55, %v1096_v43 }
 0xcb1   :  { %v1275_v11 = vpop.permute.xlu1 %1274 }
 0xcb2   :  { %v1277_v6 = vmul.f32 %v2565_v58, %v1275_v11 }
 0xcb4   :  { %1279 = vrot.lane.b32.xlu1 %v1277_v6, %s2821_s15 }
 0xccd   :  { %v1299_v15 = vpop.permute.xlu0 %1298 }
 0xcce   :  { %v1301_v16 = vmul.f32 %v2569_v55, %v1299_v15 }
 0xcd0   :  { %1303 = vrot.lane.b32.xlu0 %v1301_v16, %s2821_s15 }
 0xd26   :  { %v1280_v19 = vpop.permute.xlu1 %1279 }
 0xd27   :  { %v1282_v20 = vadd.f32 %v1280_v19, %v1272_v17 }
 0xd29   :  { %2570 = vtanh.f32 %v1282_v20 }
 0xd33   :  { %v2571_v21 = vpop.eup %2570 }
 0xd34   :  { %1285 = vrot.lane.b32.xlu1 %v2571_v21, %s2820_s4 }
 0xd42   :  { %v1304_v24 = vpop.permute.xlu0 %1303 }
 0xd43   :  { %v1306_v25 = vadd.f32 %v1304_v24, %v1296_v23 }
 0xd45   :  { %2572 = vtanh.f32 %v1306_v25 }
 0xd4f   :  { %v2573_v26 = vpop.eup %2572 }
 0xd50   :  { %1309 = vrot.lane.b32.xlu0 %v2573_v26, %s2820_s4 }
 0xda6   :  { %v1286_v27 = vpop.permute.xlu1 %1285 }
 0xda7   :  { %v1288_v28 = vmul.f32 %v2565_v58, %v1286_v27 }
 0xda9   :  { %1314 = vrot.lane.b32.xlu1 %v1288_v28, %s2821_s15 }
 0xdc2   :  { %v1310_v52 = vpop.permute.xlu0 %1309 }
 0xdc3   :  { %v1312_v29 = vmul.f32 %v2569_v55, %v1310_v52 }
 0xdc5   :  { %1320 = vrot.lane.b32.xlu0 %v1312_v29, %s2821_s15 }
 0xe1b   :  { %v1315_v30 = vpop.permute.xlu1 %1314 }
 0xe1c   :  { %1318 = vst.msk [vmem:[#allocation4 + $0x20] sm:$0xff] %vm278_vm2, %v1315_v30  ;;  %2319 = vmatmul.mubr.msk.f32.vlgmr.msra.gmra.mrb[22].mxu0 %vm278_vm2, %v1315_v30 }
 0xe1d   :  { %2454 = vmatpush3.bf16.msra.mxu0 %v2939_v9  ;;  %2340 = vmatprep.mubr.msk.f32.mxu0 %vm2819_vm0, %v2818_v1 }
 0xe1e   :  { %2455 = vmatprep.subr.bf16.mxu0 %v2817_v0 }
 0xe21   :  { %2457 = vmatpush3.bf16.msra.mxu0 %v2942_v14 }
 0xe22   :  { %2464 = vmatprep.subr.bf16.mxu0 %v2817_v0 }
 0xe37   :  { %v1321_v31 = vpop.permute.xlu0 %1320 }
 0xe38   :  { %1324 = vst.msk [vmem:[#allocation5 + $0x18] sm:$0xff] %vm278_vm2, %v1321_v31  ;;  %2330 = vmatmul.mubr.msk.f32.vlgmr.msra.gmra.mrb[14].mxu1 %vm278_vm2, %v1321_v31 }
 0xe39   :  { %2460 = vmatpush3.bf16.msra.mxu1 %v2949_v18  ;;  %2351 = vmatprep.mubr.msk.f32.mxu1 %vm2819_vm0, %v2818_v1 }
 0xe3a   :  { %2461 = vmatprep.subr.bf16.mxu1 %v2817_v0 }
 0xe3d   :  { %2463 = vmatpush3.bf16.msra.mxu1 %v2958_v22 }
 0xe3e   :  { %2470 = vmatprep.subr.bf16.mxu1 %v2817_v0 }
 0xeef   :  { %v1395_v32 = vpop.f32.mrb[22].mxu0 }
 0xef0   :  { %v1399_v60 = vadd.f32 %v1395_v32, %v3006_v62  ;;  %v2320_v33 = vpop.f32.mrb[23].mxu0 }
 0xef2   :  { %2574 = vtanh.f32 %v1399_v60  ;;  %v2110_v40 = vmul.f32 -1.442695, %v1399_v60 }
 0xefc   :  { %v2575_v34 = vpop.eup %2574 }
 0xefd   :  { %1484 = vrot.lane.b32.xlu1 %v2575_v34, %s2820_s4 }
 0xf0b   :  { %v1470_v35 = vpop.f32.mrb[14].mxu1 }
 0xf0c   :  { %v1474_v36 = vadd.f32 %v1470_v35, %v2995_v49  ;;  %v2331_v37 = vpop.f32.mrb[15].mxu1 }
 0xf0e   :  { %2576 = vtanh.f32 %v1474_v36  ;;  %v2111_v44 = vmul.f32 -1.442695, %v1474_v36 }
 0xf0f   :  { %2578 = vpow2.f32 %v2110_v40 }
 0xf18   :  { %v2577_v39 = vpop.eup %2576 }
 0xf19   :  { %1508 = vrot.lane.b32.xlu0 %v2577_v39, %s2820_s4  ;;  %v2579_v41 = vpop.eup %2578 }
 0xf1a   :  { %v1478_v43 = vadd.f32 1.0, %v2579_v41 }
 0xf1c   :  { %2580 = vrcp.f32 %v1478_v43 }
 0xf1d   :  { %2582 = vpow2.f32 %v2111_v44 }
 0xf26   :  { %v2581_v62 = vpop.eup %2580 }
 0xf27   :  { %v2583_v48 = vpop.eup %2582  ;;  %v1482_v53 = vmul.f32 %v2581_v62, %v1282_v20 }
 0xf28   :  { %v1502_v50 = vadd.f32 1.0, %v2583_v48 }
 0xf2a   :  { %2584 = vrcp.f32 %v1502_v50 }
 0xf34   :  { %v2585_v49 = vpop.eup %2584 }
 0xf35   :  { %v1506_v59 = vmul.f32 %v2585_v49, %v1306_v25 }
 0xf6f   :  { %v1485_v47 = vpop.permute.xlu1 %1484 }
 0xf70   :  { %v1487_v46 = vmul.f32 %v2581_v62, %v1485_v47 }
 0xf72   :  { %1489 = vrot.lane.b32.xlu1 %v1487_v46, %s2821_s15 }
 0xf8b   :  { %v1509_v51 = vpop.permute.xlu0 %1508 }
 0xf8c   :  { %v1511_v2 = vmul.f32 %v2585_v49, %v1509_v51 }
 0xf8e   :  { %1513 = vrot.lane.b32.xlu0 %v1511_v2, %s2821_s15 }
 0xfe4   :  { %v1490_v54 = vpop.permute.xlu1 %1489 }
 0xfe5   :  { %v1492_v56 = vadd.f32 %v1490_v54, %v1482_v53 }
 0xfe7   :  { %2586 = vtanh.f32 %v1492_v56 }
 0xff1   :  { %v2587_v57 = vpop.eup %2586 }
 0xff2   :  { %1495 = vrot.lane.b32.xlu1 %v2587_v57, %s2820_s4 }
0x1000   :  { %v1514_v61 = vpop.permute.xlu0 %1513 }
0x1001   :  { %v1516_v63 = vadd.f32 %v1514_v61, %v1506_v59 }
0x1003   :  { %2588 = vtanh.f32 %v1516_v63 }
0x100d   :  { %v2589_v3 = vpop.eup %2588 }
0x100e   :  { %1519 = vrot.lane.b32.xlu0 %v2589_v3, %s2820_s4 }
0x1064   :  { %v1496_v42 = vpop.permute.xlu1 %1495 }
0x1065   :  { %v1498_v5 = vmul.f32 %v2581_v62, %v1496_v42 }
0x1067   :  { %1524 = vrot.lane.b32.xlu1 %v1498_v5, %s2821_s15 }
0x1080   :  { %v1520_v7 = vpop.permute.xlu0 %1519 }
0x1081   :  { %v1522_v10 = vmul.f32 %v2585_v49, %v1520_v7 }
0x1083   :  { %1530 = vrot.lane.b32.xlu0 %v1522_v10, %s2821_s15 }
0x10d9   :  { %v1525_v58 = vpop.permute.xlu1 %1524 }
0x10da   :  { %1528 = vst.msk [vmem:[#allocation4 + $0x28] sm:$0xff] %vm278_vm2, %v1525_v58  ;;  %2341 = vmatmul.mubr.msk.f32.vlgmr.msra.gmra.mrb[24].mxu0 %vm278_vm2, %v1525_v58 }
0x10db   :  { %2466 = vmatpush3.bf16.msra.mxu0 %v2939_v9  ;;  %2362 = vmatprep.mubr.msk.f32.mxu0 %vm2819_vm0, %v2818_v1 }
0x10dc   :  { %2467 = vmatprep.subr.bf16.mxu0 %v2817_v0 }
0x10df   :  { %2469 = vmatpush3.bf16.msra.mxu0 %v2942_v14 }
0x10f5   :  { %v1531_v11 = vpop.permute.xlu0 %1530 }
0x10f6   :  { %1534 = vst.msk [vmem:[#allocation5 + $0x10] sm:$0xff] %vm278_vm2, %v1531_v11  ;;  %2352 = vmatmul.mubr.msk.f32.vlgmr.msra.gmra.mrb[16].mxu1 %vm278_vm2, %v1531_v11 }
0x10f7   :  { %2472 = vmatpush3.bf16.msra.mxu1 %v2949_v18  ;;  %2373 = vmatprep.mubr.msk.f32.mxu1 %vm2819_vm0, %v2818_v1 }
0x10f8   :  { %2473 = vmatprep.subr.bf16.mxu1 %v2817_v0 }
0x10fb   :  { %2475 = vmatpush3.bf16.msra.mxu1 %v2958_v22 }
0x11ad   :  { %v1605_v9 = vpop.f32.mrb[24].mxu0 }
0x11ae   :  { %v1609_v6 = vadd.f32 %v1605_v9, %v3010_v4  ;;  %v2342_v12 = vpop.f32.mrb[25].mxu0 }
0x11af   :  { %v1966_v12 = vld [vmem:[#allocation5 + $0x28] sm:$0xff] }
0x11b0   :  { %2590 = vtanh.f32 %v1609_v6  ;;  %v2114_v1 = vmul.f32 -1.442695, %v1609_v6  ;;  %v1964_v6 = vld [vmem:[#allocation5 + $0x18] sm:$0xff] }
0x11ba   :  { %v2591_v14 = vpop.eup %2590 }
0x11bb   :  { %1694 = vrot.lane.b32.xlu1 %v2591_v14, %s2820_s4  ;;  %v1968_v14 = vld [vmem:[#allocation5 + $0x38] sm:$0xff] }
0x11c9   :  { %v1680_v13 = vpop.f32.mrb[16].mxu1 }
0x11ca   :  { %v1684_v55 = vadd.f32 %v1680_v13, %v2991_v45  ;;  %v2353_v15 = vpop.f32.mrb[17].mxu1 }
0x11cb   :  { %v1963_v15 = vld [vmem:[#allocation5 + $0x10] sm:$0xff] }
0x11cc   :  { %2592 = vtanh.f32 %v1684_v55  ;;  %v2115_v16 = vmul.f32 -1.442695, %v1684_v55 }
0x11cd   :  { %2594 = vpow2.f32 %v2114_v1  ;;  %v1967_v1 = vld [vmem:[#allocation5 + $0x30] sm:$0xff] }
0x11d6   :  { %v2593_v18 = vpop.eup %2592 }
0x11d7   :  { %1718 = vrot.lane.b32.xlu0 %v2593_v18, %s2820_s4  ;;  %v2595_v0 = vpop.eup %2594  ;;  %v1965_v18 = vld [vmem:[#allocation5 + $0x20] sm:$0xff] }
0x11d8   :  { %v1688_v22 = vadd.f32 1.0, %v2595_v0 }
0x11da   :  { %2596 = vrcp.f32 %v1688_v22  ;;  %v1954_v22 = vld [vmem:[#allocation4 + $0x8] sm:$0xff] }
0x11db   :  { %2598 = vpow2.f32 %v2115_v16 }
0x11e4   :  { %v2597_v4 = vpop.eup %2596 }
0x11e5   :  { %v2599_v20 = vpop.eup %2598  ;;  %v1692_v25 = vmul.f32 %v2597_v4, %v1492_v56 }
0x11e6   :  { %v1712_v21 = vadd.f32 1.0, %v2599_v20 }
0x11e8   :  { %2600 = vrcp.f32 %v1712_v21  ;;  %v1958_v21 = vld [vmem:[#allocation4 + $0x28] sm:$0xff] }
0x11f2   :  { %v2601_v45 = vpop.eup %2600 }
0x11f3   :  { %v1716_v52 = vmul.f32 %v2601_v45, %v1516_v63 }
0x122d   :  { %v1695_v17 = vpop.permute.xlu1 %1694 }
0x122e   :  { %v1697_v19 = vmul.f32 %v2597_v4, %v1695_v17  ;;  %v1956_v17 = vld [vmem:[#allocation4 + $0x18] sm:$0xff] }
0x1230   :  { %1699 = vrot.lane.b32.xlu1 %v1697_v19, %s2821_s15 }
0x1249   :  { %v1719_v23 = vpop.permute.xlu0 %1718 }
0x124a   :  { %v1721_v24 = vmul.f32 %v2601_v45, %v1719_v23 }
0x124c   :  { %1723 = vrot.lane.b32.xlu0 %v1721_v24, %s2821_s15 }
0x12a2   :  { %v1700_v26 = vpop.permute.xlu1 %1699 }
0x12a3   :  { %v1702_v27 = vadd.f32 %v1700_v26, %v1692_v25 }
0x12a5   :  { %2602 = vtanh.f32 %v1702_v27 }
0x12af   :  { %v2603_v28 = vpop.eup %2602 }
0x12b0   :  { %1705 = vrot.lane.b32.xlu1 %v2603_v28, %s2820_s4 }
0x12be   :  { %v1724_v29 = vpop.permute.xlu0 %1723 }
0x12bf   :  { %v1726_v30 = vadd.f32 %v1724_v29, %v1716_v52 }
0x12c1   :  { %2604 = vtanh.f32 %v1726_v30 }
0x12cb   :  { %v2605_v31 = vpop.eup %2604 }
0x12cc   :  { %1729 = vrot.lane.b32.xlu0 %v2605_v31, %s2820_s4 }
0x1322   :  { %v1706_v32 = vpop.permute.xlu1 %1705 }
0x1323   :  { %v1708_v60 = vmul.f32 %v2597_v4, %v1706_v32 }
0x1325   :  { %1734 = vrot.lane.b32.xlu1 %v1708_v60, %s2821_s15 }
0x133e   :  { %v1730_v33 = vpop.permute.xlu0 %1729 }
0x133f   :  { %v1732_v34 = vmul.f32 %v2601_v45, %v1730_v33 }
0x1341   :  { %1740 = vrot.lane.b32.xlu0 %v1732_v34, %s2821_s15 }
0x1397   :  { %v1735_v35 = vpop.permute.xlu1 %1734 }
0x1398   :  { %1738 = vst.msk [vmem:[#allocation4 + $0x30] sm:$0xff] %vm278_vm2, %v1735_v35  ;;  %2363 = vmatmul.mubr.msk.f32.vlgmr.msra.gmra.mrb[26].mxu0 %vm278_vm2, %v1735_v35 }
0x13b3   :  { %v1741_v36 = vpop.permute.xlu0 %1740 }
0x13b4   :  { %1744 = vst.msk [vmem:[#allocation5 + $0x8] sm:$0xff] %vm278_vm2, %v1741_v36  ;;  %2374 = vmatmul.mubr.msk.f32.vlgmr.msra.gmra.mrb[18].mxu1 %vm278_vm2, %v1741_v36 }
0x13bb   :  { %v1962_v9 = vld [vmem:[#allocation5 + $0x8] sm:$0xff] }
0x146b   :  { %v1815_v37 = vpop.f32.mrb[26].mxu0 }
0x146c   :  { %v1819_v39 = vadd.f32 %v1815_v37, %v3014_v8  ;;  %v2364_v40 = vpop.f32.mrb[27].mxu0 }
0x146e   :  { %2606 = vtanh.f32 %v1819_v39  ;;  %v2118_v46 = vmul.f32 -1.442695, %v1819_v39 }
0x1478   :  { %v2607_v41 = vpop.eup %2606 }
0x1479   :  { %1903 = vrot.lane.b32.xlu1 %v2607_v41, %s2820_s4 }
0x1487   :  { %v1889_v43 = vpop.f32.mrb[18].mxu1 }
0x1488   :  { %v1893_v44 = vadd.f32 %v1889_v43, %v2987_v38  ;;  %v2375_v62 = vpop.f32.mrb[19].mxu1 }
0x148a   :  { %2608 = vtanh.f32 %v1893_v44  ;;  %v2119_v49 = vmul.f32 -1.442695, %v1893_v44 }
0x148b   :  { %2610 = vpow2.f32 %v2118_v46 }
0x1494   :  { %v2609_v47 = vpop.eup %2608 }
0x1495   :  { %1927 = vrot.lane.b32.xlu0 %v2609_v47, %s2820_s4  ;;  %v2611_v48 = vpop.eup %2610 }
0x1496   :  { %v1897_v50 = vadd.f32 1.0, %v2611_v48 }
0x1498   :  { %2612 = vrcp.f32 %v1897_v50 }
0x1499   :  { %2614 = vpow2.f32 %v2119_v49 }
0x14a2   :  { %v2613_v8 = vpop.eup %2612 }
0x14a3   :  { %v2615_v53 = vpop.eup %2614  ;;  %v1901_v59 = vmul.f32 %v2613_v8, %v1702_v27 }
0x14a4   :  { %v1921_v54 = vadd.f32 1.0, %v2615_v53 }
0x14a6   :  { %2616 = vrcp.f32 %v1921_v54 }
0x14b0   :  { %v2617_v38 = vpop.eup %2616 }
0x14b1   :  { %v1925_v42 = vmul.f32 %v2617_v38, %v1726_v30 }
0x14eb   :  { %v1904_v51 = vpop.permute.xlu1 %1903 }
0x14ec   :  { %v1906_v2 = vmul.f32 %v2613_v8, %v1904_v51 }
0x14ee   :  { %1908 = vrot.lane.b32.xlu1 %v1906_v2, %s2821_s15 }
0x1507   :  { %v1928_v56 = vpop.permute.xlu0 %1927 }
0x1508   :  { %v1930_v57 = vmul.f32 %v2617_v38, %v1928_v56 }
0x150a   :  { %1932 = vrot.lane.b32.xlu0 %v1930_v57, %s2821_s15 }
0x1560   :  { %v1909_v61 = vpop.permute.xlu1 %1908 }
0x1561   :  { %v3195_v63 = vadd.f32 %v1909_v61, %v1901_v59 }
0x1563   :  { %2618 = vtanh.f32 %v3195_v63 }
0x156d   :  { %v2619_v3 = vpop.eup %2618 }
0x156e   :  { %1914 = vrot.lane.b32.xlu1 %v2619_v3, %s2820_s4 }
0x157c   :  { %v1933_v5 = vpop.permute.xlu0 %1932 }
0x157d   :  { %v1935_v7 = vadd.f32 %v1933_v5, %v1925_v42 }
0x157f   :  { %2620 = vtanh.f32 %v1935_v7 }
0x1589   :  { %v2621_v10 = vpop.eup %2620 }
0x158a   :  { %1938 = vrot.lane.b32.xlu0 %v2621_v10, %s2820_s4 }
0x15e0   :  { %v1915_v58 = vpop.permute.xlu1 %1914 }
0x15e1   :  { %v1917_v11 = vmul.f32 %v2613_v8, %v1915_v58 }
0x15e3   :  { %1943 = vrot.lane.b32.xlu1 %v1917_v11, %s2821_s15 }
0x15e7   :  { %1979 = vrot.lane.b32.xlu1 %v1962_v9, %s2821_s15 }
0x15eb   :  { %1983 = vrot.lane.b32.xlu1 %v1964_v6, %s2821_s15 }
0x15ef   :  { %1987 = vrot.lane.b32.xlu1 %v1966_v12, %s2821_s15 }
0x15f3   :  { %1991 = vrot.lane.b32.xlu1 %v1968_v14, %s2821_s15 }
0x15f7   :  { %2027 = vrot.lane.b32.xlu1 %v1935_v7, %s2822_s16 }
0x15fc   :  { %v1939_v13 = vpop.permute.xlu0 %1938 }
0x15fd   :  { %v1941_v55 = vmul.f32 %v2617_v38, %v1939_v13 }
0x15ff   :  { %1949 = vrot.lane.b32.xlu0 %v1941_v55, %s2821_s15 }
0x1603   :  { %1981 = vrot.lane.b32.xlu0 %v1963_v15, %s2821_s15 }
0x1607   :  { %1985 = vrot.lane.b32.xlu0 %v1965_v18, %s2821_s15 }
0x160b   :  { %1989 = vrot.lane.b32.xlu0 %v1967_v1, %s2821_s15 }
0x1655   :  { %v1944_v0 = vpop.permute.xlu1 %1943 }
0x1656   :  { %1947 = vst.msk [vmem:[#allocation4 + $0x38] sm:$0xff] %vm278_vm2, %v1944_v0  ;;  %2018 = vst.msk [vmem:[#allocation16] sm:$0xff] %vm278_vm2, %v1944_v0 }
0x1659   :  { %v1980_v16 = vpop.permute.xlu1 %1979 }
0x165a   :  { %v2002_v4 = vsel %vm278_vm2, %v1954_v22, %v1980_v16 }
0x165b   :  { %2011 = vst.msk [vmem:[#allocation15 + $0x8] sm:$0xff] %vm2009_vm3, %v2002_v4 }
0x165d   :  { %v1984_v19 = vpop.permute.xlu1 %1983  ;;  %v1960_v24 = vld [vmem:[#allocation4 + $0x38] sm:$0xff] }
0x165e   :  { %v2004_v20 = vsel %vm278_vm2, %v1956_v17, %v1984_v19 }
0x165f   :  { %2013 = vst.msk [vmem:[#allocation15 + $0x18] sm:$0xff] %vm2009_vm3, %v2004_v20 }
0x1661   :  { %v1988_v45 = vpop.permute.xlu1 %1987 }
0x1662   :  { %v2006_v23 = vsel %vm278_vm2, %v1958_v21, %v1988_v45 }
0x1663   :  { %2015 = vst.msk [vmem:[#allocation15 + $0x28] sm:$0xff] %vm2009_vm3, %v2006_v23 }
0x1665   :  { %v1992_v25 = vpop.permute.xlu1 %1991 }
0x1666   :  { %v2008_v26 = vsel %vm278_vm2, %v1960_v24, %v1992_v25 }
0x1667   :  { %2017 = vst.msk [vmem:[#allocation15 + $0x38] sm:$0xff] %vm2009_vm3, %v2008_v26 }
0x1669   :  { %v2028_v27 = vpop.permute.xlu1 %2027 }
0x166a   :  { %2031 = vst.msk [vmem:[#allocation18 + $0x8] sm:$0xff] %vm278_vm2, %v2028_v27 }
0x1671   :  { %v1950_v28 = vpop.permute.xlu0 %1949 }
0x1672   :  { %1952 = vst.msk [vmem:[#allocation5] sm:$0xff] %vm278_vm2, %v1950_v28  ;;  %2020 = vst.msk [vmem:[#allocation16 + $0x8] sm:$0xff] %vm278_vm2, %v1950_v28 }
0x1673   :  { %2743 = shalt.err (!%p2740_p2)
}
0x1674   :  { %s2744_s23 = scalar_lea.hbm %s3293_s6, 256 }
0x1675   :  { %p2745_p3 = scmp.ne.s32.totalorder %s3293_s6, %s2744_s23  ;;  %p2748_p4 = scmp.lt.u32.totalorder %s2744_s23, %s3293_s6 }
0x1677   :  { %p2750_p5 = pnand %p2748_p4, %p2745_p3 }
0x1679   :  { %2753 = shalt.err (!%p2750_p5)
}
0x167a   :  { %2055 = dma.vmem_to_hbm [thread:$0]  %s2050_s19, 256, %s3293_s6, [#allocation17], %s2813_s25, %s2813_s25, %s2814_s27   ;;  %v1955_v52 = vld [vmem:[#allocation4 + $0x10] sm:$0xff]  ;;  %v1982_v29 = vpop.permute.xlu0 %1981  ;;  %v1957_v31 = vld [vmem:[#allocation4 + $0x20] sm:$0xff] }
0x167b   :  { %v2003_v30 = vsel %vm278_vm2, %v1955_v52, %v1982_v29  ;;  %v1961_v60 = vld [vmem:[#allocation5] sm:$0xff]  ;;  %v1959_v34 = vld [vmem:[#allocation4 + $0x30] sm:$0xff]  ;;  %s2824_s6 = smov [#allocation15]   ;;  %s2825_s30 = smov [#allocation18]  }
0x167c   :  { %2012 = vst.msk [vmem:[#allocation15 + $0x10] sm:$0xff] %vm2009_vm3, %v2003_v30  ;;  %1977 = vrot.lane.b32.xlu0 %v1961_v60, %s2821_s15  ;;  %s2037_s29 = sshll.u32 %s2824_s6, 4  ;;  %s2061_s8 = sshll.u32 %s2825_s30, 4  ;;  %v1953_v39 = vld [vmem:[#allocation4] sm:$0xff]  ;;  %s2038_s29 = int_to_ptr.vmem [resolvable:$true] %s2037_s29  ;;  %s3249_s8 = int_to_ptr.vmem [resolvable:$true] %s2061_s8 }
0x167d   :  { %s2754_s9 = scalar_lea.vmem %s2038_s29, 1024  ;;  %p2759_p7 = scmp.lt.s32.totalorder %s2038_s29, %s2038_s29 }
0x167e   :  { %v1986_v32 = vpop.permute.xlu0 %1985  ;;  %p2755_p6 = scmp.ne.s32.totalorder %s2038_s29, %s2754_s9  ;;  %p2760_p8 = scmp.lt.s32.totalorder %s2754_s9, %s2754_s9 }
0x167f   :  { %v2005_v33 = vsel %vm278_vm2, %v1957_v31, %v1986_v32 }
0x1680   :  { %2014 = vst.msk [vmem:[#allocation15 + $0x20] sm:$0xff] %vm2009_vm3, %v2005_v33  ;;  %2022 = vrot.lane.b32.xlu0 %v3195_v63, %s2822_s16  ;;  %p2761_p9 = por %p2760_p8, %p2759_p7 }
0x1682   :  { %v1990_v35 = vpop.permute.xlu0 %1989  ;;  %p2762_p10 = pnand %p2761_p9, %p2755_p6 }
0x1683   :  { %v2007_v36 = vsel %vm278_vm2, %v1959_v34, %v1990_v35 }
0x1684   :  { %2016 = vst.msk [vmem:[#allocation15 + $0x30] sm:$0xff] %vm2009_vm3, %v2007_v36 }
0x16ee   :  { %v1978_v37 = vpop.permute.xlu0 %1977 }
0x16ef   :  { %v2001_v40 = vsel %vm278_vm2, %v1953_v39, %v1978_v37 }
0x16f0   :  { %2010 = vst.msk [vmem:[#allocation15] sm:$0xff] %vm2009_vm3, %v2001_v40 }
0x16f1   :  { %2765 = shalt.err (!%p2762_p10)
}
0x16f2   :  { %s2766_s12 = scalar_lea.hbm %s3292_s5, 1024 }
0x16f3   :  { %p2767_p11 = scmp.ne.s32.totalorder %s3292_s5, %s2766_s12  ;;  %p2770_p12 = scmp.lt.u32.totalorder %s2766_s12, %s3292_s5 }
0x16f5   :  { %p2772_p13 = pnand %p2770_p12, %p2767_p11 }
0x16f7   :  { %2775 = shalt.err (!%p2772_p13)
}
0x16f8   :  { %2043 = dma.vmem_to_hbm [thread:$0]  %s2038_s29, 1024, %s3292_s5, [#allocation8], %s2813_s25, %s2813_s25, %s2814_s27   ;;  %v2023_v41 = vpop.permute.xlu0 %2022 }
0x16f9   :  { %2025 = vst.msk [vmem:[#allocation18] sm:$0xff] %vm278_vm2, %v2023_v41  ;;  %s2776_s16 = scalar_lea.vmem %s3249_s8, 256  ;;  %p2781_p1 = scmp.lt.s32.totalorder %s3249_s8, %s3249_s8 }
0x16fa   :  { %p2777_p0 = scmp.ne.s32.totalorder %s3249_s8, %s2776_s16  ;;  %p2782_p2 = scmp.lt.s32.totalorder %s2776_s16, %s2776_s16 }
0x16fc   :  { %p2783_p3 = por %p2782_p2, %p2781_p1 }
0x16fe   :  { %p2784_p4 = pnand %p2783_p3, %p2777_p0 }
0x1700   :  { %2787 = shalt.err (!%p2784_p4)
}
0x1701   :  { %s2788_s20 = scalar_lea.hbm %s3294_s7, 256 }
0x1702   :  { %p2789_p5 = scmp.ne.s32.totalorder %s3294_s7, %s2788_s20  ;;  %p2792_p6 = scmp.lt.u32.totalorder %s2788_s20, %s3294_s7 }
0x1704   :  { %p2794_p7 = pnand %p2792_p6, %p2789_p5 }
0x1706   :  { %2797 = shalt.err (!%p2794_p7)
}
0x1707   :  { %2067 = dma.vmem_to_hbm [thread:$0]  %s3249_s8, 256, %s3294_s7, [#allocation17], %s2813_s25, %s2813_s25, %s2814_s27  }
0x1708   :  { %2804 = dma.done.wait [#allocation8], 1024  }
0x1709   :  { %2805 = vsyncadd [#allocation8], 4294966272 }
0x170a   :  { %2806 = dma.done.wait [#allocation17], 512  }
0x170b   :  { %2807 = vsyncadd [#allocation17], 4294966784 }
0x170c   :  { %2077 = vsyncpa [#allocation7], 1 }
0x170d   :  { %2078 = vsyncpa [#allocation10], 1 }
0x170e   :  { %2079 = vsyncpa [#allocation13], 1 }
0x170f   :  { %2080 = vsyncpa [#allocation8], 1 }
0x1710   :  { %2081 = vsyncpa [#allocation17], 1 }

</bundles_post_ra>
